<compile_context>
chip_gen: v6e
topology: v6e:2x2x1
jax: 0.10.0
libtpu: 0.0.40
codegen_flags: <defaults>
</compile_context>

<pallas_src>
import functools

import jax
import jax.numpy as jnp
from jax.experimental import pallas as pl
from jax.experimental.pallas import tpu as pltpu

BN_EPS = 1e-5


def _ds(start, size, step):
    # pl.ds with optional stride (avoid passing stride=1 explicitly)
    return pl.ds(start, size) if step == 1 else pl.ds(start, size, step)


def _batchnorm(y2d, g_ref, be_ref):
    """Training-mode (biased) BatchNorm over the flattened (N*H*W, C) axis 0."""
    c = y2d.shape[-1]
    mean = jnp.mean(y2d, axis=0, keepdims=True)
    var = jnp.mean((y2d - mean) ** 2, axis=0, keepdims=True)
    inv = jax.lax.rsqrt(var + BN_EPS)                    # EUP rsqrt, no divide
    return (y2d - mean) * (inv * g_ref[...].reshape(1, c)) + be_ref[...].reshape(1, c)


def _im2col_taps(src_ref, hout, wout, stride):
    """Gather the 9 taps of a 3x3 conv from a zero-padded NHWC ref.

    Returns (lhs, center):
      lhs    : (M, 9*Cin) f32 register value (no VMEM scratch round-trip),
               rows ordered (n, h, w), columns ordered (kh, kw, cin) to match
               the flattened weights.
      center : the (kh=1, kw=1) tap, i.e. the stride-subsampled unpadded
               input, (M, Cin) f32 -- reused by the 1x1 shortcut conv.
    """
    n = src_ref.shape[0]
    cin = src_ref.shape[-1]
    m = n * hout * wout
    taps = []
    for kh in range(3):
        for kw in range(3):
            t = src_ref[:, _ds(kh, hout, stride), _ds(kw, wout, stride), :]
            taps.append(t.astype(jnp.float32).reshape(m, cin))
    return jnp.concatenate(taps, axis=-1), taps[4]


def _conv_matmul(lhs_f32, w_ref, b_ref):
    """One MXU matmul: bf16 operands, f32 accumulation, f32 bias add."""
    y = jnp.dot(lhs_f32.astype(jnp.bfloat16), w_ref[...],
                preferred_element_type=jnp.float32)
    return y + b_ref[...]


def _residual_block_kernel(stride,
                           x_ref, w1_ref, b1_ref, g1_ref, be1_ref, a_ref,
                           w2_ref, b2_ref, g2_ref, be2_ref,
                           wsc_ref, bsc_ref,
                           out_ref, xpad_ref, ypad_ref):
    N, H, W, Cin = x_ref.shape
    Hout = ypad_ref.shape[1] - 2
    Wout = ypad_ref.shape[2] - 2
    Cout = ypad_ref.shape[3]
    S = stride
    f32 = jnp.float32

    # ---- zero-pad the input in VMEM (halo-only zero stores, interior once) ----
    # TODO(synk): at real shapes, take x via memory_space=pl.ANY and DMA it into
    # this interior window so the input is not resident twice in VMEM.
    xpad_ref[:, 0:1, :, :] = jnp.zeros((N, 1, W + 2, Cin), f32)
    xpad_ref[:, H + 1:H + 2, :, :] = jnp.zeros((N, 1, W + 2, Cin), f32)
    xpad_ref[:, 1:H + 1, 0:1, :] = jnp.zeros((N, H, 1, Cin), f32)
    xpad_ref[:, 1:H + 1, W + 1:W + 2, :] = jnp.zeros((N, H, 1, Cin), f32)
    xpad_ref[:, 1:H + 1, 1:W + 1, :] = x_ref[...].astype(f32)

    # ---- conv1 (3x3, stride S): im2col assembled in registers, one MXU matmul ----
    lhs1, center = _im2col_taps(xpad_ref, Hout, Wout, S)          # (M,9*Cin),(M,Cin)
    y = _conv_matmul(lhs1, w1_ref, b1_ref)                        # (M, Cout) f32

    # ---- 1x1 shortcut conv (stride S) right away so `center` dies early ----
    sc = jnp.dot(center.astype(jnp.bfloat16), wsc_ref[...],
                 preferred_element_type=jnp.float32) + bsc_ref[...]

    # ---- BN1 + PReLU (single learnable slope, matches nn.PReLU() default) ----
    y = _batchnorm(y, g1_ref, be1_ref)
    alpha = a_ref[0, 0]                                           # SMEM scalar read
    y = jnp.where(y >= 0.0, y, alpha * y)

    # ---- pad the intermediate (halo-only) and run conv2 (3x3, stride 1) + BN2 ----
    ypad_ref[:, 0:1, :, :] = jnp.zeros((N, 1, Wout + 2, Cout), f32)
    ypad_ref[:, Hout + 1:Hout + 2, :, :] = jnp.zeros((N, 1, Wout + 2, Cout), f32)
    ypad_ref[:, 1:Hout + 1, 0:1, :] = jnp.zeros((N, Hout, 1, Cout), f32)
    ypad_ref[:, 1:Hout + 1, Wout + 1:Wout + 2, :] = jnp.zeros((N, Hout, 1, Cout), f32)
    ypad_ref[:, 1:Hout + 1, 1:Wout + 1, :] = y.reshape(N, Hout, Wout, Cout)

    lhs2, _ = _im2col_taps(ypad_ref, Hout, Wout, 1)               # (M, 9*Cout)
    y2 = _conv_matmul(lhs2, w2_ref, b2_ref)
    y2 = _batchnorm(y2, g2_ref, be2_ref)

    # ---- residual add + ReLU; store lane-dense as (Cout, M) ----
    out = jnp.maximum(y2 + sc, 0.0)                               # (M, Cout)
    out_ref[...] = out.T.astype(out_ref.dtype)                    # (Cout, M) full-lane vst


def residual_block(x_nchw, params, stride):
    """Forward pass of Residual_Block (use_1x1_conv=True). Input/output NCHW."""
    x = jnp.transpose(x_nchw, (0, 2, 3, 1)).astype(jnp.float32)   # NHWC
    N, H, W, Cin = x.shape
    Cout = params["w1"].shape[-1]
    Hout = (H + 2 - 3) // stride + 1
    Wout = (W + 2 - 3) // stride + 1
    M = N * Hout * Wout

    # Flatten 3x3 weights to im2col layout (rows ordered kh, kw, cin) and cast
    # the matmul operands to bf16; accumulation stays f32 inside the kernel.
    w1 = params["w1"].reshape(9 * Cin, Cout).astype(jnp.bfloat16)
    w2 = params["w2"].reshape(9 * Cout, Cout).astype(jnp.bfloat16)
    wsc = params["wsc"].astype(jnp.bfloat16)

    args = (x, w1, params["b1"], params["g1"], params["be1"], params["a"],
            w2, params["b2"], params["g2"], params["be2"],
            wsc, params["bsc"])

    vmem = pl.BlockSpec(memory_space=pltpu.MemorySpace.VMEM)
    smem = pl.BlockSpec(memory_space=pltpu.MemorySpace.SMEM)
    in_specs = [vmem] * len(args)
    in_specs[5] = smem                       # PReLU slope read as an SMEM scalar

    flops = (2 * M * (9 * Cin) * Cout        # conv1
             + 2 * M * (9 * Cout) * Cout     # conv2
             + 2 * M * Cin * Cout)           # 1x1 shortcut
    bytes_accessed = (x.size * 4 + (w1.size + w2.size + wsc.size) * 2
                      + 8 * Cout * 4 + Cout * M * 4)
    cost = pl.CostEstimate(flops=flops, transcendentals=2 * Cout,
                           bytes_accessed=bytes_accessed)

    # TODO(synk): for non-toy shapes add a (batch, row-tile) grid with BlockSpec
    # pipelining and a two-pass BN; mark those axes "parallel" in
    # dimension_semantics so v7x's two TensorCores both work and scratch stays
    # within v7x's 64 MiB VMEM. At these sizes everything fits in one shot.
    out = pl.pallas_call(
        functools.partial(_residual_block_kernel, stride),
        out_shape=jax.ShapeDtypeStruct((Cout, M), jnp.float32),   # lane-dense minor dim
        in_specs=in_specs,
        out_specs=vmem,
        scratch_shapes=[
            pltpu.VMEM((N, H + 2, W + 2, Cin), jnp.float32),          # padded input
            pltpu.VMEM((N, Hout + 2, Wout + 2, Cout), jnp.float32),   # padded conv1 out
        ],
        compiler_params=pltpu.CompilerParams(vmem_limit_bytes=32 * 1024 * 1024),
        cost_estimate=cost,
    )(*args)
    # (Cout, N*Hout*Wout) -> (N, Cout, Hout, Wout)
    return jnp.transpose(out.reshape(Cout, N, Hout, Wout), (1, 0, 2, 3))


def reference_nchw(x_nchw, p, stride):
    """Pure-JAX f32 reference (lax conv) mirroring the PyTorch forward."""
    x = jnp.transpose(x_nchw, (0, 2, 3, 1)).astype(jnp.float32)

    def conv(inp, w, b, s, pad):
        y = jax.lax.conv_general_dilated(
            inp, w, (s, s), [(pad, pad), (pad, pad)],
            dimension_numbers=("NHWC", "HWIO", "NHWC"))
        return y + b.reshape(1, 1, 1, -1)

    def bn(y, g, be):
        m = jnp.mean(y, axis=(0, 1, 2), keepdims=True)
        v = jnp.mean((y - m) ** 2, axis=(0, 1, 2), keepdims=True)
        return (y - m) / jnp.sqrt(v + BN_EPS) * g.reshape(1, 1, 1, -1) + be.reshape(1, 1, 1, -1)

    y = conv(x, p["w1"], p["b1"], stride, 1)
    y = bn(y, p["g1"], p["be1"])
    a = p["a"].reshape(())
    y = jnp.where(y >= 0.0, y, a * y)
    y = conv(y, p["w2"], p["b2"], 1, 1)
    y = bn(y, p["g2"], p["be2"])
    cin, cout = p["wsc"].shape
    sc = conv(x, p["wsc"].reshape(1, 1, cin, cout), p["bsc"], stride, 0)
    out = jnp.maximum(y + sc, 0.0)
    return jnp.transpose(out, (0, 3, 1, 2))


if __name__ == "__main__":
    N, Cin, H, W = 2, 4, 16, 16
    Cout, stride = 8, 2

    key = jax.random.PRNGKey(0)
    ks = jax.random.split(key, 8)
    x = jax.random.normal(ks[0], (N, Cin, H, W), jnp.float32)

    params = dict(
        w1=0.1 * jax.random.normal(ks[1], (3, 3, Cin, Cout), jnp.float32),
        b1=0.1 * jax.random.normal(ks[2], (1, Cout), jnp.float32),
        g1=1.0 + 0.1 * jax.random.normal(ks[3], (1, Cout), jnp.float32),
        be1=0.1 * jax.random.normal(ks[4], (1, Cout), jnp.float32),
        a=jnp.full((1, 1), 0.25, jnp.float32),                     # PReLU default slope
        w2=0.1 * jax.random.normal(ks[5], (3, 3, Cout, Cout), jnp.float32),
        b2=0.1 * jax.random.normal(ks[6], (1, Cout), jnp.float32),
        g2=1.0 + 0.1 * jax.random.normal(ks[7], (1, Cout), jnp.float32),
        be2=0.05 * jnp.ones((1, Cout), jnp.float32),
        wsc=0.1 * jax.random.normal(jax.random.PRNGKey(1), (Cin, Cout), jnp.float32),
        bsc=0.1 * jax.random.normal(jax.random.PRNGKey(2), (1, Cout), jnp.float32),
    )

    out = residual_block(x, params, stride)
    out = jax.block_until_ready(out)

    ref = reference_nchw(x, params, stride)
    assert out.shape == (N, Cout, H // stride, W // stride), out.shape
    # bf16 MXU operands vs. an f32 reference -> loosened tolerance (per review).
    assert jnp.allclose(out, ref, atol=6e-2, rtol=6e-2), \
        f"max abs diff {jnp.max(jnp.abs(out - ref))}"

    print("KERNEL_OK")
</pallas_src>

<mosaic_0001>
module attributes {stable_mosaic.version = 11 : i64} {
  func.func @_residual_block_kernel(%arg0: memref<2x16x16x4xf32, #tpu.memory_space<vmem>>, %arg1: memref<36x8xbf16, #tpu.memory_space<vmem>>, %arg2: memref<1x8xf32, #tpu.memory_space<vmem>>, %arg3: memref<1x8xf32, #tpu.memory_space<vmem>>, %arg4: memref<1x8xf32, #tpu.memory_space<vmem>>, %arg5: memref<1x1xf32, #tpu.memory_space<smem>>, %arg6: memref<72x8xbf16, #tpu.memory_space<vmem>>, %arg7: memref<1x8xf32, #tpu.memory_space<vmem>>, %arg8: memref<1x8xf32, #tpu.memory_space<vmem>>, %arg9: memref<1x8xf32, #tpu.memory_space<vmem>>, %arg10: memref<4x8xbf16, #tpu.memory_space<vmem>>, %arg11: memref<1x8xf32, #tpu.memory_space<vmem>>, %arg12: memref<8x128xf32, #tpu.memory_space<vmem>>, %arg13: memref<2x18x18x4xf32, #tpu.memory_space<vmem>>, %arg14: memref<2x10x10x8xf32, #tpu.memory_space<vmem>>) attributes {dimension_semantics = [], scalar_prefetch = 0 : i64, scratch_operands = 2 : i64, tpu.core_type = #tpu.core_type<tc>} {
    %cst = arith.constant 0.000000e+00 : f32
    %0 = vector.broadcast %cst : f32 to vector<2x1x18x4xf32>
    %c0 = arith.constant 0 : index
    %c0_0 = arith.constant 0 : index
    %c0_1 = arith.constant 0 : index
    %c0_2 = arith.constant 0 : index
    %1 = vector.load %arg13[%c0, %c0_0, %c0_1, %c0_2] : memref<2x18x18x4xf32, #tpu.memory_space<vmem>>, vector<2x1x18x4xf32>
    tpu.vector_store %arg13[%c0, %c0_0, %c0_1, %c0_2], %0 {strides = array<i32>} : memref<2x18x18x4xf32, #tpu.memory_space<vmem>>, vector<2x1x18x4xf32>,
    %cst_3 = arith.constant 0.000000e+00 : f32
    %2 = vector.broadcast %cst_3 : f32 to vector<2x1x18x4xf32>
    %c0_4 = arith.constant 0 : index
    %c17 = arith.constant 17 : index
    %c0_5 = arith.constant 0 : index
    %c0_6 = arith.constant 0 : index
    %3 = vector.load %arg13[%c0_4, %c17, %c0_5, %c0_6] : memref<2x18x18x4xf32, #tpu.memory_space<vmem>>, vector<2x1x18x4xf32>
    tpu.vector_store %arg13[%c0_4, %c17, %c0_5, %c0_6], %2 {strides = array<i32>} : memref<2x18x18x4xf32, #tpu.memory_space<vmem>>, vector<2x1x18x4xf32>,
    %cst_7 = arith.constant 0.000000e+00 : f32
    %4 = vector.broadcast %cst_7 : f32 to vector<2x16x1x4xf32>
    %c0_8 = arith.constant 0 : index
    %c1 = arith.constant 1 : index
    %c0_9 = arith.constant 0 : index
    %c0_10 = arith.constant 0 : index
    %5 = vector.load %arg13[%c0_8, %c1, %c0_9, %c0_10] : memref<2x18x18x4xf32, #tpu.memory_space<vmem>>, vector<2x16x1x4xf32>
    tpu.vector_store %arg13[%c0_8, %c1, %c0_9, %c0_10], %4 {strides = array<i32>} : memref<2x18x18x4xf32, #tpu.memory_space<vmem>>, vector<2x16x1x4xf32>,
    %cst_11 = arith.constant 0.000000e+00 : f32
    %6 = vector.broadcast %cst_11 : f32 to vector<2x16x1x4xf32>
    %c0_12 = arith.constant 0 : index
    %c1_13 = arith.constant 1 : index
    %c17_14 = arith.constant 17 : index
    %c0_15 = arith.constant 0 : index
    %7 = vector.load %arg13[%c0_12, %c1_13, %c17_14, %c0_15] : memref<2x18x18x4xf32, #tpu.memory_space<vmem>>, vector<2x16x1x4xf32>
    tpu.vector_store %arg13[%c0_12, %c1_13, %c17_14, %c0_15], %6 {strides = array<i32>} : memref<2x18x18x4xf32, #tpu.memory_space<vmem>>, vector<2x16x1x4xf32>,
    %c0_16 = arith.constant 0 : index
    %c0_17 = arith.constant 0 : index
    %c0_18 = arith.constant 0 : index
    %c0_19 = arith.constant 0 : index
    %8 = vector.load %arg0[%c0_16, %c0_17, %c0_18, %c0_19] : memref<2x16x16x4xf32, #tpu.memory_space<vmem>>, vector<2x16x16x4xf32>
    %c0_20 = arith.constant 0 : index
    %c1_21 = arith.constant 1 : index
    %c1_22 = arith.constant 1 : index
    %c0_23 = arith.constant 0 : index
    %9 = vector.load %arg13[%c0_20, %c1_21, %c1_22, %c0_23] : memref<2x18x18x4xf32, #tpu.memory_space<vmem>>, vector<2x16x16x4xf32>
    tpu.vector_store %arg13[%c0_20, %c1_21, %c1_22, %c0_23], %8 {strides = array<i32>} : memref<2x18x18x4xf32, #tpu.memory_space<vmem>>, vector<2x16x16x4xf32>,
    %c0_24 = arith.constant 0 : index
    %c0_25 = arith.constant 0 : index
    %c0_26 = arith.constant 0 : index
    %c0_27 = arith.constant 0 : index
    %10 = tpu.strided_load %arg13[%c0_24, %c0_25, %c0_26, %c0_27] {strides = array<i32: 1, 2, 2, 1>} : memref<2x18x18x4xf32, #tpu.memory_space<vmem>>, vector<2x8x8x4xf32>
    %11 = vector.shape_cast %10 : vector<2x8x8x4xf32> to vector<128x4xf32>
    %c0_28 = arith.constant 0 : index
    %c0_29 = arith.constant 0 : index
    %c1_30 = arith.constant 1 : index
    %c0_31 = arith.constant 0 : index
    %12 = tpu.strided_load %arg13[%c0_28, %c0_29, %c1_30, %c0_31] {strides = array<i32: 1, 2, 2, 1>} : memref<2x18x18x4xf32, #tpu.memory_space<vmem>>, vector<2x8x8x4xf32>
    %13 = vector.shape_cast %12 : vector<2x8x8x4xf32> to vector<128x4xf32>
    %c0_32 = arith.constant 0 : index
    %c0_33 = arith.constant 0 : index
    %c2 = arith.constant 2 : index
    %c0_34 = arith.constant 0 : index
    %14 = tpu.strided_load %arg13[%c0_32, %c0_33, %c2, %c0_34] {strides = array<i32: 1, 2, 2, 1>} : memref<2x18x18x4xf32, #tpu.memory_space<vmem>>, vector<2x8x8x4xf32>
    %15 = vector.shape_cast %14 : vector<2x8x8x4xf32> to vector<128x4xf32>
    %c0_35 = arith.constant 0 : index
    %c1_36 = arith.constant 1 : index
    %c0_37 = arith.constant 0 : index
    %c0_38 = arith.constant 0 : index
    %16 = tpu.strided_load %arg13[%c0_35, %c1_36, %c0_37, %c0_38] {strides = array<i32: 1, 2, 2, 1>} : memref<2x18x18x4xf32, #tpu.memory_space<vmem>>, vector<2x8x8x4xf32>
    %17 = vector.shape_cast %16 : vector<2x8x8x4xf32> to vector<128x4xf32>
    %c0_39 = arith.constant 0 : index
    %c1_40 = arith.constant 1 : index
    %c1_41 = arith.constant 1 : index
    %c0_42 = arith.constant 0 : index
    %18 = tpu.strided_load %arg13[%c0_39, %c1_40, %c1_41, %c0_42] {strides = array<i32: 1, 2, 2, 1>} : memref<2x18x18x4xf32, #tpu.memory_space<vmem>>, vector<2x8x8x4xf32>
    %19 = vector.shape_cast %18 : vector<2x8x8x4xf32> to vector<128x4xf32>
    %c0_43 = arith.constant 0 : index
    %c1_44 = arith.constant 1 : index
    %c2_45 = arith.constant 2 : index
    %c0_46 = arith.constant 0 : index
    %20 = tpu.strided_load %arg13[%c0_43, %c1_44, %c2_45, %c0_46] {strides = array<i32: 1, 2, 2, 1>} : memref<2x18x18x4xf32, #tpu.memory_space<vmem>>, vector<2x8x8x4xf32>
    %21 = vector.shape_cast %20 : vector<2x8x8x4xf32> to vector<128x4xf32>
    %c0_47 = arith.constant 0 : index
    %c2_48 = arith.constant 2 : index
    %c0_49 = arith.constant 0 : index
    %c0_50 = arith.constant 0 : index
    %22 = tpu.strided_load %arg13[%c0_47, %c2_48, %c0_49, %c0_50] {strides = array<i32: 1, 2, 2, 1>} : memref<2x18x18x4xf32, #tpu.memory_space<vmem>>, vector<2x8x8x4xf32>
    %23 = vector.shape_cast %22 : vector<2x8x8x4xf32> to vector<128x4xf32>
    %c0_51 = arith.constant 0 : index
    %c2_52 = arith.constant 2 : index
    %c1_53 = arith.constant 1 : index
    %c0_54 = arith.constant 0 : index
    %24 = tpu.strided_load %arg13[%c0_51, %c2_52, %c1_53, %c0_54] {strides = array<i32: 1, 2, 2, 1>} : memref<2x18x18x4xf32, #tpu.memory_space<vmem>>, vector<2x8x8x4xf32>
    %25 = vector.shape_cast %24 : vector<2x8x8x4xf32> to vector<128x4xf32>
    %c0_55 = arith.constant 0 : index
    %c2_56 = arith.constant 2 : index
    %c2_57 = arith.constant 2 : index
    %c0_58 = arith.constant 0 : index
    %26 = tpu.strided_load %arg13[%c0_55, %c2_56, %c2_57, %c0_58] {strides = array<i32: 1, 2, 2, 1>} : memref<2x18x18x4xf32, #tpu.memory_space<vmem>>, vector<2x8x8x4xf32>
    %27 = vector.shape_cast %26 : vector<2x8x8x4xf32> to vector<128x4xf32>
    %28 = tpu.concatenate %11, %13, %15, %17, %19, %21, %23, %25, %27 in 1 : vector<128x4xf32>, vector<128x4xf32>, vector<128x4xf32>, vector<128x4xf32>, vector<128x4xf32>, vector<128x4xf32>, vector<128x4xf32>, vector<128x4xf32>, vector<128x4xf32> -> vector<128x36xf32>
    %29 = arith.truncf %28 : vector<128x36xf32> to vector<128x36xbf16>
    %c0_59 = arith.constant 0 : index
    %c0_60 = arith.constant 0 : index
    %30 = vector.load %arg1[%c0_59, %c0_60] : memref<36x8xbf16, #tpu.memory_space<vmem>>, vector<36x8xbf16>
    %cst_61 = arith.constant dense<0.000000e+00> : vector<128x8xf32>
    %31 = tpu.matmul %29, %30, %cst_61 {dimension_numbers = #tpu.dot_dimension_numbers<[1], [0], [0], [1], [0, 0, 1, 1], [], []>} : vector<128x36xbf16>, vector<36x8xbf16>, vector<128x8xf32> -> vector<128x8xf32>
    %c0_62 = arith.constant 0 : index
    %c0_63 = arith.constant 0 : index
    %32 = vector.load %arg2[%c0_62, %c0_63] : memref<1x8xf32, #tpu.memory_space<vmem>>, vector<1x8xf32>
    %33 = vector.broadcast %32 : vector<1x8xf32> to vector<128x8xf32>
    %34 = arith.addf %31, %33 : vector<128x8xf32>
    %35 = arith.truncf %19 : vector<128x4xf32> to vector<128x4xbf16>
    %c0_64 = arith.constant 0 : index
    %c0_65 = arith.constant 0 : index
    %36 = vector.load %arg10[%c0_64, %c0_65] : memref<4x8xbf16, #tpu.memory_space<vmem>>, vector<4x8xbf16>
    %cst_66 = arith.constant dense<0.000000e+00> : vector<128x8xf32>
    %37 = tpu.matmul %35, %36, %cst_66 {dimension_numbers = #tpu.dot_dimension_numbers<[1], [0], [0], [1], [0, 0, 1, 1], [], []>} : vector<128x4xbf16>, vector<4x8xbf16>, vector<128x8xf32> -> vector<128x8xf32>
    %c0_67 = arith.constant 0 : index
    %c0_68 = arith.constant 0 : index
    %38 = vector.load %arg11[%c0_67, %c0_68] : memref<1x8xf32, #tpu.memory_space<vmem>>, vector<1x8xf32>
    %39 = vector.broadcast %38 : vector<1x8xf32> to vector<128x8xf32>
    %40 = arith.addf %37, %39 : vector<128x8xf32>
    %cst_69 = arith.constant dense<0.000000e+00> : vector<8xf32>
    %41 = vector.multi_reduction <add>, %34, %cst_69 [0] : vector<128x8xf32> to vector<8xf32>
    %42 = vector.shape_cast %41 : vector<8xf32> to vector<1x8xf32>
    %cst_70 = arith.constant 1.280000e+02 : f32
    %43 = vector.broadcast %cst_70 : f32 to vector<1x8xf32>
    %44 = arith.divf %42, %43 : vector<1x8xf32>
    %45 = vector.broadcast %44 : vector<1x8xf32> to vector<128x8xf32>
    %46 = arith.subf %34, %45 : vector<128x8xf32>
    %47 = arith.mulf %46, %46 : vector<128x8xf32>
    %cst_71 = arith.constant dense<0.000000e+00> : vector<8xf32>
    %48 = vector.multi_reduction <add>, %47, %cst_71 [0] : vector<128x8xf32> to vector<8xf32>
    %49 = vector.shape_cast %48 : vector<8xf32> to vector<1x8xf32>
    %cst_72 = arith.constant 1.280000e+02 : f32
    %50 = vector.broadcast %cst_72 : f32 to vector<1x8xf32>
    %51 = arith.divf %49, %50 : vector<1x8xf32>
    %cst_73 = arith.constant 9.99999974E-6 : f32
    %52 = vector.broadcast %cst_73 : f32 to vector<1x8xf32>
    %53 = arith.addf %51, %52 : vector<1x8xf32>
    %54 = math.rsqrt %53 : vector<1x8xf32>
    %55 = vector.broadcast %44 : vector<1x8xf32> to vector<128x8xf32>
    %56 = arith.subf %34, %55 : vector<128x8xf32>
    %c0_74 = arith.constant 0 : index
    %c0_75 = arith.constant 0 : index
    %57 = vector.load %arg3[%c0_74, %c0_75] : memref<1x8xf32, #tpu.memory_space<vmem>>, vector<1x8xf32>
    %58 = arith.mulf %54, %57 : vector<1x8xf32>
    %59 = vector.broadcast %58 : vector<1x8xf32> to vector<128x8xf32>
    %60 = arith.mulf %56, %59 : vector<128x8xf32>
    %c0_76 = arith.constant 0 : index
    %c0_77 = arith.constant 0 : index
    %61 = vector.load %arg4[%c0_76, %c0_77] : memref<1x8xf32, #tpu.memory_space<vmem>>, vector<1x8xf32>
    %62 = vector.broadcast %61 : vector<1x8xf32> to vector<128x8xf32>
    %63 = arith.addf %60, %62 : vector<128x8xf32>
    %c0_78 = arith.constant 0 : index
    %c0_79 = arith.constant 0 : index
    %64 = memref.load %arg5[%c0_78, %c0_79] : memref<1x1xf32, #tpu.memory_space<smem>>
    %cst_80 = arith.constant 0.000000e+00 : f32
    %65 = vector.broadcast %cst_80 : f32 to vector<128x8xf32>
    %66 = arith.cmpf oge, %63, %65 : vector<128x8xf32>
    %67 = vector.broadcast %64 : f32 to vector<128x8xf32>
    %68 = arith.mulf %67, %63 : vector<128x8xf32>
    %69 = arith.select %66, %63, %68 : vector<128x8xi1>, vector<128x8xf32>
    %cst_81 = arith.constant 0.000000e+00 : f32
    %70 = vector.broadcast %cst_81 : f32 to vector<2x1x10x8xf32>
    %c0_82 = arith.constant 0 : index
    %c0_83 = arith.constant 0 : index
    %c0_84 = arith.constant 0 : index
    %c0_85 = arith.constant 0 : index
    %71 = vector.load %arg14[%c0_82, %c0_83, %c0_84, %c0_85] : memref<2x10x10x8xf32, #tpu.memory_space<vmem>>, vector<2x1x10x8xf32>
    tpu.vector_store %arg14[%c0_82, %c0_83, %c0_84, %c0_85], %70 {strides = array<i32>} : memref<2x10x10x8xf32, #tpu.memory_space<vmem>>, vector<2x1x10x8xf32>,
    %cst_86 = arith.constant 0.000000e+00 : f32
    %72 = vector.broadcast %cst_86 : f32 to vector<2x1x10x8xf32>
    %c0_87 = arith.constant 0 : index
    %c9 = arith.constant 9 : index
    %c0_88 = arith.constant 0 : index
    %c0_89 = arith.constant 0 : index
    %73 = vector.load %arg14[%c0_87, %c9, %c0_88, %c0_89] : memref<2x10x10x8xf32, #tpu.memory_space<vmem>>, vector<2x1x10x8xf32>
    tpu.vector_store %arg14[%c0_87, %c9, %c0_88, %c0_89], %72 {strides = array<i32>} : memref<2x10x10x8xf32, #tpu.memory_space<vmem>>, vector<2x1x10x8xf32>,
    %cst_90 = arith.constant 0.000000e+00 : f32
    %74 = vector.broadcast %cst_90 : f32 to vector<2x8x1x8xf32>
    %c0_91 = arith.constant 0 : index
    %c1_92 = arith.constant 1 : index
    %c0_93 = arith.constant 0 : index
    %c0_94 = arith.constant 0 : index
    %75 = vector.load %arg14[%c0_91, %c1_92, %c0_93, %c0_94] : memref<2x10x10x8xf32, #tpu.memory_space<vmem>>, vector<2x8x1x8xf32>
    tpu.vector_store %arg14[%c0_91, %c1_92, %c0_93, %c0_94], %74 {strides = array<i32>} : memref<2x10x10x8xf32, #tpu.memory_space<vmem>>, vector<2x8x1x8xf32>,
    %cst_95 = arith.constant 0.000000e+00 : f32
    %76 = vector.broadcast %cst_95 : f32 to vector<2x8x1x8xf32>
    %c0_96 = arith.constant 0 : index
    %c1_97 = arith.constant 1 : index
    %c9_98 = arith.constant 9 : index
    %c0_99 = arith.constant 0 : index
    %77 = vector.load %arg14[%c0_96, %c1_97, %c9_98, %c0_99] : memref<2x10x10x8xf32, #tpu.memory_space<vmem>>, vector<2x8x1x8xf32>
    tpu.vector_store %arg14[%c0_96, %c1_97, %c9_98, %c0_99], %76 {strides = array<i32>} : memref<2x10x10x8xf32, #tpu.memory_space<vmem>>, vector<2x8x1x8xf32>,
    %78 = vector.shape_cast %69 : vector<128x8xf32> to vector<2x8x8x8xf32>
    %c0_100 = arith.constant 0 : index
    %c1_101 = arith.constant 1 : index
    %c1_102 = arith.constant 1 : index
    %c0_103 = arith.constant 0 : index
    %79 = vector.load %arg14[%c0_100, %c1_101, %c1_102, %c0_103] : memref<2x10x10x8xf32, #tpu.memory_space<vmem>>, vector<2x8x8x8xf32>
    tpu.vector_store %arg14[%c0_100, %c1_101, %c1_102, %c0_103], %78 {strides = array<i32>} : memref<2x10x10x8xf32, #tpu.memory_space<vmem>>, vector<2x8x8x8xf32>,
    %c0_104 = arith.constant 0 : index
    %c0_105 = arith.constant 0 : index
    %c0_106 = arith.constant 0 : index
    %c0_107 = arith.constant 0 : index
    %80 = vector.load %arg14[%c0_104, %c0_105, %c0_106, %c0_107] : memref<2x10x10x8xf32, #tpu.memory_space<vmem>>, vector<2x8x8x8xf32>
    %81 = vector.shape_cast %80 : vector<2x8x8x8xf32> to vector<128x8xf32>
    %c0_108 = arith.constant 0 : index
    %c0_109 = arith.constant 0 : index
    %c1_110 = arith.constant 1 : index
    %c0_111 = arith.constant 0 : index
    %82 = vector.load %arg14[%c0_108, %c0_109, %c1_110, %c0_111] : memref<2x10x10x8xf32, #tpu.memory_space<vmem>>, vector<2x8x8x8xf32>
    %83 = vector.shape_cast %82 : vector<2x8x8x8xf32> to vector<128x8xf32>
    %c0_112 = arith.constant 0 : index
    %c0_113 = arith.constant 0 : index
    %c2_114 = arith.constant 2 : index
    %c0_115 = arith.constant 0 : index
    %84 = vector.load %arg14[%c0_112, %c0_113, %c2_114, %c0_115] : memref<2x10x10x8xf32, #tpu.memory_space<vmem>>, vector<2x8x8x8xf32>
    %85 = vector.shape_cast %84 : vector<2x8x8x8xf32> to vector<128x8xf32>
    %c0_116 = arith.constant 0 : index
    %c1_117 = arith.constant 1 : index
    %c0_118 = arith.constant 0 : index
    %c0_119 = arith.constant 0 : index
    %86 = vector.load %arg14[%c0_116, %c1_117, %c0_118, %c0_119] : memref<2x10x10x8xf32, #tpu.memory_space<vmem>>, vector<2x8x8x8xf32>
    %87 = vector.shape_cast %86 : vector<2x8x8x8xf32> to vector<128x8xf32>
    %c0_120 = arith.constant 0 : index
    %c1_121 = arith.constant 1 : index
    %c1_122 = arith.constant 1 : index
    %c0_123 = arith.constant 0 : index
    %88 = vector.load %arg14[%c0_120, %c1_121, %c1_122, %c0_123] : memref<2x10x10x8xf32, #tpu.memory_space<vmem>>, vector<2x8x8x8xf32>
    %89 = vector.shape_cast %88 : vector<2x8x8x8xf32> to vector<128x8xf32>
    %c0_124 = arith.constant 0 : index
    %c1_125 = arith.constant 1 : index
    %c2_126 = arith.constant 2 : index
    %c0_127 = arith.constant 0 : index
    %90 = vector.load %arg14[%c0_124, %c1_125, %c2_126, %c0_127] : memref<2x10x10x8xf32, #tpu.memory_space<vmem>>, vector<2x8x8x8xf32>
    %91 = vector.shape_cast %90 : vector<2x8x8x8xf32> to vector<128x8xf32>
    %c0_128 = arith.constant 0 : index
    %c2_129 = arith.constant 2 : index
    %c0_130 = arith.constant 0 : index
    %c0_131 = arith.constant 0 : index
    %92 = vector.load %arg14[%c0_128, %c2_129, %c0_130, %c0_131] : memref<2x10x10x8xf32, #tpu.memory_space<vmem>>, vector<2x8x8x8xf32>
    %93 = vector.shape_cast %92 : vector<2x8x8x8xf32> to vector<128x8xf32>
    %c0_132 = arith.constant 0 : index
    %c2_133 = arith.constant 2 : index
    %c1_134 = arith.constant 1 : index
    %c0_135 = arith.constant 0 : index
    %94 = vector.load %arg14[%c0_132, %c2_133, %c1_134, %c0_135] : memref<2x10x10x8xf32, #tpu.memory_space<vmem>>, vector<2x8x8x8xf32>
    %95 = vector.shape_cast %94 : vector<2x8x8x8xf32> to vector<128x8xf32>
    %c0_136 = arith.constant 0 : index
    %c2_137 = arith.constant 2 : index
    %c2_138 = arith.constant 2 : index
    %c0_139 = arith.constant 0 : index
    %96 = vector.load %arg14[%c0_136, %c2_137, %c2_138, %c0_139] : memref<2x10x10x8xf32, #tpu.memory_space<vmem>>, vector<2x8x8x8xf32>
    %97 = vector.shape_cast %96 : vector<2x8x8x8xf32> to vector<128x8xf32>
    %98 = tpu.concatenate %81, %83, %85, %87, %89, %91, %93, %95, %97 in 1 : vector<128x8xf32>, vector<128x8xf32>, vector<128x8xf32>, vector<128x8xf32>, vector<128x8xf32>, vector<128x8xf32>, vector<128x8xf32>, vector<128x8xf32>, vector<128x8xf32> -> vector<128x72xf32>
    %99 = arith.truncf %98 : vector<128x72xf32> to vector<128x72xbf16>
    %c0_140 = arith.constant 0 : index
    %c0_141 = arith.constant 0 : index
    %100 = vector.load %arg6[%c0_140, %c0_141] : memref<72x8xbf16, #tpu.memory_space<vmem>>, vector<72x8xbf16>
    %cst_142 = arith.constant dense<0.000000e+00> : vector<128x8xf32>
    %101 = tpu.matmul %99, %100, %cst_142 {dimension_numbers = #tpu.dot_dimension_numbers<[1], [0], [0], [1], [0, 0, 1, 1], [], []>} : vector<128x72xbf16>, vector<72x8xbf16>, vector<128x8xf32> -> vector<128x8xf32>
    %c0_143 = arith.constant 0 : index
    %c0_144 = arith.constant 0 : index
    %102 = vector.load %arg7[%c0_143, %c0_144] : memref<1x8xf32, #tpu.memory_space<vmem>>, vector<1x8xf32>
    %103 = vector.broadcast %102 : vector<1x8xf32> to vector<128x8xf32>
    %104 = arith.addf %101, %103 : vector<128x8xf32>
    %cst_145 = arith.constant dense<0.000000e+00> : vector<8xf32>
    %105 = vector.multi_reduction <add>, %104, %cst_145 [0] : vector<128x8xf32> to vector<8xf32>
    %106 = vector.shape_cast %105 : vector<8xf32> to vector<1x8xf32>
    %cst_146 = arith.constant 1.280000e+02 : f32
    %107 = vector.broadcast %cst_146 : f32 to vector<1x8xf32>
    %108 = arith.divf %106, %107 : vector<1x8xf32>
    %109 = vector.broadcast %108 : vector<1x8xf32> to vector<128x8xf32>
    %110 = arith.subf %104, %109 : vector<128x8xf32>
    %111 = arith.mulf %110, %110 : vector<128x8xf32>
    %cst_147 = arith.constant dense<0.000000e+00> : vector<8xf32>
    %112 = vector.multi_reduction <add>, %111, %cst_147 [0] : vector<128x8xf32> to vector<8xf32>
    %113 = vector.shape_cast %112 : vector<8xf32> to vector<1x8xf32>
    %cst_148 = arith.constant 1.280000e+02 : f32
    %114 = vector.broadcast %cst_148 : f32 to vector<1x8xf32>
    %115 = arith.divf %113, %114 : vector<1x8xf32>
    %cst_149 = arith.constant 9.99999974E-6 : f32
    %116 = vector.broadcast %cst_149 : f32 to vector<1x8xf32>
    %117 = arith.addf %115, %116 : vector<1x8xf32>
    %118 = math.rsqrt %117 : vector<1x8xf32>
    %119 = vector.broadcast %108 : vector<1x8xf32> to vector<128x8xf32>
    %120 = arith.subf %104, %119 : vector<128x8xf32>
    %c0_150 = arith.constant 0 : index
    %c0_151 = arith.constant 0 : index
    %121 = vector.load %arg8[%c0_150, %c0_151] : memref<1x8xf32, #tpu.memory_space<vmem>>, vector<1x8xf32>
    %122 = arith.mulf %118, %121 : vector<1x8xf32>
    %123 = vector.broadcast %122 : vector<1x8xf32> to vector<128x8xf32>
    %124 = arith.mulf %120, %123 : vector<128x8xf32>
    %c0_152 = arith.constant 0 : index
    %c0_153 = arith.constant 0 : index
    %125 = vector.load %arg9[%c0_152, %c0_153] : memref<1x8xf32, #tpu.memory_space<vmem>>, vector<1x8xf32>
    %126 = vector.broadcast %125 : vector<1x8xf32> to vector<128x8xf32>
    %127 = arith.addf %124, %126 : vector<128x8xf32>
    %128 = arith.addf %127, %40 : vector<128x8xf32>
    %cst_154 = arith.constant 0.000000e+00 : f32
    %129 = vector.broadcast %cst_154 : f32 to vector<128x8xf32>
    %130 = arith.maximumf %128, %129 : vector<128x8xf32>
    %131 = tpu.transpose %130, [1, 0] : vector<128x8xf32> -> vector<8x128xf32>
    %c0_155 = arith.constant 0 : index
    %c0_156 = arith.constant 0 : index
    %132 = vector.load %arg12[%c0_155, %c0_156] : memref<8x128xf32, #tpu.memory_space<vmem>>, vector<8x128xf32>
    tpu.vector_store %arg12[%c0_155, %c0_156], %131 {strides = array<i32>} : memref<8x128xf32, #tpu.memory_space<vmem>>, vector<8x128xf32>,
    return
  }
}

</mosaic_0001>

<bundles_post_ra>
// kernel: tpu_custom_call.1
= control target key start
LH: loop header
LB: loop body
LE: loop exit
PB: predicated region body
PF: predicated region fallthrough
CT: control target
= control target key end

     0   :  { %vm44_vm0 = vcmask 31744   ;;  %vm47_vm1 = vcmask 25600   ;;  %v3879_v2 = vmov 0.0   ;;  %vm60_vm2 = vcmask 24576   ;;  %s3880_s13 = smov 8   ;;  %s3881_s14 = smov 4   ;;  %s5492_s0 = inlined_call_operand.vmem [shape: f32[2,16,16,4], index: 0, kind: input, shape index: {}]   ;;  %s5493_s1 = inlined_call_operand.vmem [shape: bf16[36,8], index: 1, kind: input, shape index: {}]   ;;  %s5494_s2 = inlined_call_operand.vmem [shape: f32[1,8], index: 2, kind: input, shape index: {}]   ;;  %s5495_s3 = inlined_call_operand.vmem [shape: f32[1,8], index: 3, kind: input, shape index: {}]   ;;  %s5496_s4 = inlined_call_operand.vmem [shape: f32[1,8], index: 4, kind: input, shape index: {}]   ;;  %s5497_s5 = inlined_call_operand.<no memory space> [shape: f32[1,1], index: 5, kind: input, shape index: {}]   ;;  %s5498_s6 = inlined_call_operand.vmem [shape: bf16[72,8], index: 6, kind: input, shape index: {}]   ;;  %s5499_s7 = inlined_call_operand.vmem [shape: f32[1,8], index: 7, kind: input, shape index: {}]   ;;  %s5500_s8 = inlined_call_operand.vmem [shape: f32[1,8], index: 8, kind: input, shape index: {}]   ;;  %s5501_s9 = inlined_call_operand.vmem [shape: f32[1,8], index: 9, kind: input, shape index: {}]   ;;  %s5502_s10 = inlined_call_operand.vmem [shape: bf16[4,8], index: 10, kind: input, shape index: {}]   ;;  %s5503_s11 = inlined_call_operand.vmem [shape: f32[1,8], index: 11, kind: input, shape index: {}]   ;;  %s5504_s12 = inlined_call_operand.hbm [shape: f32[8,128], index: 12, kind: output, shape index: {}]  }
   0x1   :  { %v127_v0 = vld [vmem:[%s5492_s0 + $0x10] sm:$0xff]  ;;  %v128_v1 = vld [vmem:[%s5492_s0 + $0x18] sm:$0xff]  ;;  %45 = vst.msk [vmem:[#allocation2] sm:$0xff] %vm44_vm0, %v3879_v2  ;;  %46 = vst.msk [vmem:[#allocation2 + $0x8] sm:$0xff] %vm44_vm0, %v3879_v2  ;;  %vm1067_vm3 = vcmask 64512   ;;  %s3882_s15 = smov 12  }
   0x2   :  { %48 = vst.msk [vmem:[#allocation2 + $0x10] sm:$0x3] %vm47_vm1, %v3879_v2  ;;  %51 = vst.msk [vmem:[#allocation2 + $0x1c0] sm:$0x3] %vm47_vm1, %v3879_v2  ;;  %v131_v3 = vld [vmem:[%s5492_s0 + $0x30] sm:$0xff]  ;;  %v132_v4 = vld [vmem:[%s5492_s0 + $0x38] sm:$0xff] }
   0x3   :  { %191 = vst.msk [vmem:[#allocation2 + $0x31] sm:$0xff] %vm44_vm0, %v127_v0  ;;  %192 = vst.msk [vmem:[#allocation2 + $0x39] sm:$0xff] %vm44_vm0, %v128_v1  ;;  %v135_v5 = vld [vmem:[%s5492_s0 + $0x50] sm:$0xff]  ;;  %v136_v6 = vld [vmem:[%s5492_s0 + $0x58] sm:$0xff]  ;;  %s3883_s26 = smov 16   ;;  %s3884_s24 = smov 20  }
   0x4   :  { %49 = vst.msk [vmem:[#allocation2 + $0x1b0] sm:$0xff] %vm44_vm0, %v3879_v2  ;;  %50 = vst.msk [vmem:[#allocation2 + $0x1b8] sm:$0xff] %vm44_vm0, %v3879_v2  ;;  %v133_v7 = vld [vmem:[%s5492_s0 + $0x40] sm:$0xff]  ;;  %v134_v8 = vld [vmem:[%s5492_s0 + $0x48] sm:$0xff]  ;;  %s3885_s17 = smov 24   ;;  %s3886_s20 = smov 28  }
   0x5   :  { %195 = vst.msk [vmem:[#allocation2 + $0x61] sm:$0xff] %vm44_vm0, %v131_v3  ;;  %196 = vst.msk [vmem:[#allocation2 + $0x69] sm:$0xff] %vm44_vm0, %v132_v4  ;;  %v137_v9 = vld [vmem:[%s5492_s0 + $0x60] sm:$0xff]  ;;  %v138_v10 = vld [vmem:[%s5492_s0 + $0x68] sm:$0xff]  ;;  %s3887_s18 = smov 32   ;;  %vm1246_vm4 = vcmask 1041408  }
   0x6   :  { %199 = vst.msk [vmem:[#allocation2 + $0x91] sm:$0xff] %vm44_vm0, %v135_v5  ;;  %200 = vst.msk [vmem:[#allocation2 + $0x99] sm:$0xff] %vm44_vm0, %v136_v6  ;;  %v125_v11 = vld [vmem:[%s5492_s0] sm:$0xff]  ;;  %v126_v12 = vld [vmem:[%s5492_s0 + $0x8] sm:$0xff] }
   0x7   :  { %65 = vst.msk [vmem:[#allocation2 + $0x78] sm:$0x1] %vm60_vm2, %v3879_v2  ;;  %67 = vst.msk [vmem:[#allocation2 + $0xa8] sm:$0x1] %vm60_vm2, %v3879_v2  ;;  %v129_v13 = vld [vmem:[%s5492_s0 + $0x20] sm:$0xff]  ;;  %v130_v14 = vld [vmem:[%s5492_s0 + $0x28] sm:$0xff] }
   0x8   :  { %61 = vst.msk [vmem:[#allocation2 + $0x18] sm:$0x1] %vm60_vm2, %v3879_v2  ;;  %62 = vst.msk [vmem:[#allocation2 + $0x30] sm:$0x1] %vm60_vm2, %v3879_v2  ;;  %v139_v15 = vld [vmem:[%s5492_s0 + $0x70] sm:$0xff]  ;;  %v140_v16 = vld [vmem:[%s5492_s0 + $0x78] sm:$0xff] }
   0x9   :  { %63 = vst.msk [vmem:[#allocation2 + $0x48] sm:$0x1] %vm60_vm2, %v3879_v2  ;;  %64 = vst.msk [vmem:[#allocation2 + $0x60] sm:$0x1] %vm60_vm2, %v3879_v2  ;;  %v143_v17 = vld [vmem:[%s5492_s0 + $0x90] sm:$0xff]  ;;  %v144_v18 = vld [vmem:[%s5492_s0 + $0x98] sm:$0xff] }
   0xa   :  { %66 = vst.msk [vmem:[#allocation2 + $0x90] sm:$0x1] %vm60_vm2, %v3879_v2  ;;  %68 = vst.msk [vmem:[#allocation2 + $0xc0] sm:$0x1] %vm60_vm2, %v3879_v2  ;;  %v147_v19 = vld [vmem:[%s5492_s0 + $0xb0] sm:$0xff]  ;;  %v148_v20 = vld [vmem:[%s5492_s0 + $0xb8] sm:$0xff] }
   0xb   :  { %69 = vst.msk [vmem:[#allocation2 + $0xd8] sm:$0x1] %vm60_vm2, %v3879_v2  ;;  %70 = vst.msk [vmem:[#allocation2 + $0xf0] sm:$0x1] %vm60_vm2, %v3879_v2  ;;  %v151_v21 = vld [vmem:[%s5492_s0 + $0xd0] sm:$0xff]  ;;  %v152_v22 = vld [vmem:[%s5492_s0 + $0xd8] sm:$0xff] }
   0xc   :  { %71 = vst.msk [vmem:[#allocation2 + $0x108] sm:$0x1] %vm60_vm2, %v3879_v2  ;;  %72 = vst.msk [vmem:[#allocation2 + $0x120] sm:$0x1] %vm60_vm2, %v3879_v2  ;;  %v149_v23 = vld [vmem:[%s5492_s0 + $0xc0] sm:$0xff]  ;;  %v150_v54 = vld [vmem:[%s5492_s0 + $0xc8] sm:$0xff] }
   0xd   :  { %73 = vst.msk [vmem:[#allocation2 + $0x138] sm:$0x1] %vm60_vm2, %v3879_v2  ;;  %74 = vst.msk [vmem:[#allocation2 + $0x150] sm:$0x1] %vm60_vm2, %v3879_v2  ;;  %v317_v24 = vld [vmem:[#allocation2 + $0x2] ss:$2 sm:$0xff] }
   0xe   :  { %75 = vst.msk [vmem:[#allocation2 + $0x168] sm:$0x1] %vm60_vm2, %v3879_v2  ;;  %76 = vst.msk [vmem:[#allocation2 + $0x180] sm:$0x1] %vm60_vm2, %v3879_v2  ;;  %v319_v25 = vld [vmem:[#allocation2 + $0x32] ss:$2 sm:$0xff] }
   0xf   :  { %77 = vst.msk [vmem:[#allocation2 + $0x1c8] sm:$0x1] %vm60_vm2, %v3879_v2  ;;  %78 = vst.msk [vmem:[#allocation2 + $0x1e0] sm:$0x1] %vm60_vm2, %v3879_v2  ;;  %v285_v26 = vld [vmem:[#allocation2 + $0x1] ss:$2 sm:$0xff]  ;;  %v3213_v27 = vpack.i.bf16 %v319_v25, %v317_v24 }
  0x10   :  { %79 = vst.msk [vmem:[#allocation2 + $0x1f8] sm:$0x1] %vm60_vm2, %v3879_v2  ;;  %80 = vst.msk [vmem:[#allocation2 + $0x210] sm:$0x1] %vm60_vm2, %v3879_v2  ;;  %v287_v28 = vld [vmem:[#allocation2 + $0x31] ss:$2 sm:$0xff] }
  0x11   :  { %81 = vst.msk [vmem:[#allocation2 + $0x228] sm:$0x1] %vm60_vm2, %v3879_v2  ;;  %82 = vst.msk [vmem:[#allocation2 + $0x240] sm:$0x1] %vm60_vm2, %v3879_v2  ;;  %v321_v29 = vld [vmem:[#allocation2 + $0x62] ss:$2 sm:$0xff]  ;;  %v3203_v31 = vpack.i.bf16 %v287_v28, %v285_v26  ;;  %3214 = vrot.lane.b32.xlu1 %v3213_v27, %s3880_s13 }
  0x12   :  { %83 = vst.msk [vmem:[#allocation2 + $0x258] sm:$0x1] %vm60_vm2, %v3879_v2  ;;  %84 = vst.msk [vmem:[#allocation2 + $0x270] sm:$0x1] %vm60_vm2, %v3879_v2  ;;  %v289_v30 = vld [vmem:[#allocation2 + $0x61] ss:$2 sm:$0xff] }
  0x13   :  { %85 = vst.msk [vmem:[#allocation2 + $0x288] sm:$0x1] %vm60_vm2, %v3879_v2  ;;  %86 = vst.msk [vmem:[#allocation2 + $0x2a0] sm:$0x1] %vm60_vm2, %v3879_v2  ;;  %v323_v32 = vld [vmem:[#allocation2 + $0x92] ss:$2 sm:$0xff]  ;;  %3204 = vrot.lane.b32.xlu0 %v3203_v31, %s3881_s14 }
  0x14   :  { %87 = vst.msk [vmem:[#allocation2 + $0x2b8] sm:$0x1] %vm60_vm2, %v3879_v2  ;;  %88 = vst.msk [vmem:[#allocation2 + $0x2d0] sm:$0x1] %vm60_vm2, %v3879_v2  ;;  %v291_v33 = vld [vmem:[#allocation2 + $0x91] ss:$2 sm:$0xff]  ;;  %v3218_v34 = vpack.i.bf16 %v323_v32, %v321_v29 }
  0x15   :  { %89 = vst.msk [vmem:[#allocation2 + $0x2e8] sm:$0x1] %vm60_vm2, %v3879_v2  ;;  %90 = vst.msk [vmem:[#allocation2 + $0x300] sm:$0x1] %vm60_vm2, %v3879_v2  ;;  %v3208_v37 = vpack.i.bf16 %v291_v33, %v289_v30  ;;  %v153_v55 = vld [vmem:[%s5492_s0 + $0xe0] sm:$0xff]  ;;  %v154_v56 = vld [vmem:[%s5492_s0 + $0xe8] sm:$0xff] }
  0x16   :  { %91 = vst.msk [vmem:[#allocation2 + $0x318] sm:$0x1] %vm60_vm2, %v3879_v2  ;;  %92 = vst.msk [vmem:[#allocation2 + $0x330] sm:$0x1] %vm60_vm2, %v3879_v2  ;;  %3219 = vrot.lane.b32.xlu1 %v3218_v34, %s3880_s13  ;;  %v141_v57 = vld [vmem:[%s5492_s0 + $0x80] sm:$0xff]  ;;  %v142_v58 = vld [vmem:[%s5492_s0 + $0x88] sm:$0xff] }
  0x17   :  { %197 = vst.msk [vmem:[#allocation2 + $0x79] sm:$0xff] %vm44_vm0, %v133_v7  ;;  %198 = vst.msk [vmem:[#allocation2 + $0x81] sm:$0xff] %vm44_vm0, %v134_v8  ;;  %3209 = vrot.lane.b32.xlu0 %v3208_v37, %s3881_s14  ;;  %v145_v60 = vld [vmem:[%s5492_s0 + $0xa0] sm:$0xff]  ;;  %v146_v61 = vld [vmem:[%s5492_s0 + $0xa8] sm:$0xff] }
  0x18   :  { %1693 = vst.msk [vmem:[#allocation3] sm:$0xff] %vm1067_vm3, %v3879_v2  ;;  %1696 = vst.msk [vmem:[#allocation3 + $0xa0] sm:$0xff] %vm1067_vm3, %v3879_v2  ;;  %v155_v62 = vld [vmem:[%s5492_s0 + $0xf0] sm:$0xff]  ;;  %v156_v3 = vld [vmem:[%s5492_s0 + $0xf8] sm:$0xff] }
  0x19   :  { %1699 = vst.msk [vmem:[#allocation3 + $0x90] sm:$0xff] %vm1067_vm3, %v3879_v2  ;;  %1701 = vst.msk [vmem:[#allocation3 + $0x130] sm:$0xff] %vm1067_vm3, %v3879_v2  ;;  %v448_v0 = vld [vmem:[#allocation2 + $0x90] ss:$2 sm:$0xff]  ;;  %v446_v5 = vld [vmem:[#allocation2 + $0x60] ss:$2 sm:$0xff] }
  0x1a   :  { %201 = vst.msk [vmem:[#allocation2 + $0xa9] sm:$0xff] %vm44_vm0, %v137_v9  ;;  %202 = vst.msk [vmem:[#allocation2 + $0xb1] sm:$0xff] %vm44_vm0, %v138_v10  ;;  %v444_v4 = vld [vmem:[#allocation2 + $0x30] ss:$2 sm:$0xff]  ;;  %v480_v9 = vld [vmem:[#allocation2 + $0x91] ss:$2 sm:$0xff] }
  0x1b   :  { %189 = vst.msk [vmem:[#allocation2 + $0x19] sm:$0xff] %vm44_vm0, %v125_v11  ;;  %190 = vst.msk [vmem:[#allocation2 + $0x21] sm:$0xff] %vm44_vm0, %v126_v12  ;;  %v159_v6 = vld [vmem:[%s5492_s0 + $0x110] sm:$0xff]  ;;  %v160_v7 = vld [vmem:[%s5492_s0 + $0x118] sm:$0xff]  ;;  %v3253_v11 = vpack.i.bf16 %v446_v5, %v444_v4 }
  0x1c   :  { %193 = vst.msk [vmem:[#allocation2 + $0x49] sm:$0xff] %vm44_vm0, %v129_v13  ;;  %194 = vst.msk [vmem:[#allocation2 + $0x51] sm:$0xff] %vm44_vm0, %v130_v14  ;;  %v163_v12 = vld [vmem:[%s5492_s0 + $0x130] sm:$0xff]  ;;  %v164_v13 = vld [vmem:[%s5492_s0 + $0x138] sm:$0xff] }
  0x1d   :  { %203 = vst.msk [vmem:[#allocation2 + $0xc1] sm:$0xff] %vm44_vm0, %v139_v15  ;;  %204 = vst.msk [vmem:[#allocation2 + $0xc9] sm:$0xff] %vm44_vm0, %v140_v16  ;;  %v167_v14 = vld [vmem:[%s5492_s0 + $0x150] sm:$0xff]  ;;  %v478_v16 = vld [vmem:[#allocation2 + $0x61] ss:$2 sm:$0xff] }
  0x1e   :  { %207 = vst.msk [vmem:[#allocation2 + $0xf1] sm:$0xff] %vm44_vm0, %v143_v17  ;;  %208 = vst.msk [vmem:[#allocation2 + $0xf9] sm:$0xff] %vm44_vm0, %v144_v18  ;;  %v4133_v35 = vld [vmem:[#allocation2 + $0x79] ss:$2 sm:$0xff]  ;;  %v352_v38 = vld [vmem:[#allocation2 + $0x78] ss:$2 sm:$0xff] }
  0x1f   :  { %211 = vst.msk [vmem:[#allocation2 + $0x121] sm:$0xff] %vm44_vm0, %v147_v19  ;;  %212 = vst.msk [vmem:[#allocation2 + $0x129] sm:$0xff] %vm44_vm0, %v148_v20  ;;  %v416_v50 = vld [vmem:[#allocation2 + $0x7a] ss:$2 sm:$0xff]  ;;  %v476_v15 = vld [vmem:[#allocation2 + $0x31] ss:$2 sm:$0xff] }
  0x20   :  { %215 = vst.msk [vmem:[#allocation2 + $0x151] sm:$0xff] %vm44_vm0, %v151_v21  ;;  %216 = vst.msk [vmem:[#allocation2 + $0x159] sm:$0xff] %vm44_vm0, %v152_v22  ;;  %v3263_v21 = vpack.i.bf16 %v478_v16, %v476_v15  ;;  %v508_v24 = vld [vmem:[#allocation2 + $0x32] ss:$2 sm:$0xff]  ;;  %v510_v25 = vld [vmem:[#allocation2 + $0x62] ss:$2 sm:$0xff] }
  0x21   :  { %213 = vst.msk [vmem:[#allocation2 + $0x139] sm:$0xff] %vm44_vm0, %v149_v23  ;;  %v4135_v36 = vld [vmem:[#allocation2 + $0xa9] ss:$2 sm:$0xff]  ;;  %v354_v39 = vld [vmem:[#allocation2 + $0xa8] ss:$2 sm:$0xff]  ;;  %214 = vst.msk [vmem:[#allocation2 + $0x141] sm:$0xff] %vm44_vm0, %v150_v54  ;;  %v3273_v31 = vpack.i.bf16 %v510_v25, %v508_v24 }
  0x22   :  { %v348_v40 = vld [vmem:[#allocation2 + $0x18] ss:$2 sm:$0xff]  ;;  %v1348_v41 = vpack.c.bf16 %v4135_v36, %v4133_v35  ;;  %v4140_v43 = vld [vmem:[#allocation2 + $0x19] ss:$2 sm:$0xff]  ;;  %v3228_v46 = vpack.i.bf16 %v354_v39, %v352_v38  ;;  %v3238_v48 = vpack.i.bf16 %v4135_v36, %v4133_v35  ;;  %217 = vst.msk [vmem:[#allocation2 + $0x169] sm:$0xff] %vm44_vm0, %v153_v55  ;;  %218 = vst.msk [vmem:[#allocation2 + $0x171] sm:$0xff] %vm44_vm0, %v154_v56 }
  0x23   :  { %v350_v42 = vld [vmem:[#allocation2 + $0x48] ss:$2 sm:$0xff]  ;;  %v4142_v44 = vld [vmem:[#allocation2 + $0x49] ss:$2 sm:$0xff]  ;;  %205 = vst.msk [vmem:[#allocation2 + $0xd9] sm:$0xff] %vm44_vm0, %v141_v57  ;;  %206 = vst.msk [vmem:[#allocation2 + $0xe1] sm:$0xff] %vm44_vm0, %v142_v58 }
  0x24   :  { %v1347_v45 = vpack.c.bf16 %v4142_v44, %v4140_v43  ;;  %v3223_v47 = vpack.i.bf16 %v350_v42, %v348_v40  ;;  %3229 = vrot.lane.b32.xlu1 %v3228_v46, %s3882_s15  ;;  %v3233_v49 = vpack.i.bf16 %v4142_v44, %v4140_v43  ;;  %v418_v51 = vld [vmem:[#allocation2 + $0xaa] ss:$2 sm:$0xff]  ;;  %v412_v52 = vld [vmem:[#allocation2 + $0x1a] ss:$2 sm:$0xff]  ;;  %209 = vst.msk [vmem:[#allocation2 + $0x109] sm:$0xff] %vm44_vm0, %v145_v60  ;;  %210 = vst.msk [vmem:[#allocation2 + $0x111] sm:$0xff] %vm44_vm0, %v146_v61 }
  0x25   :  { %v414_v53 = vld [vmem:[#allocation2 + $0x4a] ss:$2 sm:$0xff]  ;;  %v3248_v59 = vpack.i.bf16 %v418_v51, %v416_v50  ;;  %219 = vst.msk [vmem:[#allocation2 + $0x181] sm:$0xff] %vm44_vm0, %v155_v62  ;;  %220 = vst.msk [vmem:[#allocation2 + $0x189] sm:$0xff] %vm44_vm0, %v156_v3  ;;  %v482_v10 = vld [vmem:[#allocation2 + $0xc1] ss:$2 sm:$0xff] }
  0x26   :  { %3224 = vrot.lane.b32.xlu0 %v3223_v47, %s3882_s15  ;;  %v3243_v63 = vpack.i.bf16 %v414_v53, %v412_v52  ;;  %v450_v1 = vld [vmem:[#allocation2 + $0xc0] ss:$2 sm:$0xff]  ;;  %223 = vst.msk [vmem:[#allocation2 + $0x1e1] sm:$0xff] %vm44_vm0, %v159_v6  ;;  %224 = vst.msk [vmem:[#allocation2 + $0x1e9] sm:$0xff] %vm44_vm0, %v160_v7  ;;  %v3268_v19 = vpack.i.bf16 %v482_v10, %v480_v9  ;;  %v293_v22 = vld [vmem:[#allocation2 + $0xc1] ss:$2 sm:$0xff] }
  0x27   :  { %v3258_v8 = vpack.i.bf16 %v450_v1, %v448_v0  ;;  %227 = vst.msk [vmem:[#allocation2 + $0x211] sm:$0xff] %vm44_vm0, %v163_v12  ;;  %228 = vst.msk [vmem:[#allocation2 + $0x219] sm:$0xff] %vm44_vm0, %v164_v13  ;;  %v295_v23 = vld [vmem:[#allocation2 + $0xf1] ss:$2 sm:$0xff]  ;;  %v297_v28 = vld [vmem:[#allocation2 + $0x121] ss:$2 sm:$0xff] }
  0x28   :  { %3239 = vrot.lane.b32.xlu1 %v3238_v48, %s3883_s26  ;;  %231 = vst.msk [vmem:[#allocation2 + $0x241] sm:$0xff] %vm44_vm0, %v167_v14  ;;  %v4214_v17 = vld [vmem:[#allocation2 + $0x139] ss:$2 sm:$0xff]  ;;  %v3278_v27 = vpack.i.bf16 %v295_v23, %v293_v22  ;;  %v512_v32 = vld [vmem:[#allocation2 + $0x92] ss:$2 sm:$0xff]  ;;  %v166_v34 = vld [vmem:[%s5492_s0 + $0x148] sm:$0xff] }
  0x29   :  { %v4216_v18 = vld [vmem:[#allocation2 + $0x169] ss:$2 sm:$0xff]  ;;  %v168_v26 = vld [vmem:[%s5492_s0 + $0x158] sm:$0xff]  ;;  %v165_v30 = vld [vmem:[%s5492_s0 + $0x140] sm:$0xff]  ;;  %230 = vst.msk [vmem:[#allocation2 + $0x231] sm:$0xff] %vm44_vm0, %v166_v34 }
  0x2a   :  { %3234 = vrot.lane.b32.xlu0 %v3233_v49, %s3883_s26  ;;  %v1350_v20 = vpack.c.bf16 %v4216_v18, %v4214_v17  ;;  %232 = vst.msk [vmem:[#allocation2 + $0x249] sm:$0xff] %vm44_vm0, %v168_v26  ;;  %v299_v29 = vld [vmem:[#allocation2 + $0x151] ss:$2 sm:$0xff]  ;;  %v514_v33 = vld [vmem:[#allocation2 + $0xc2] ss:$2 sm:$0xff]  ;;  %229 = vst.msk [vmem:[#allocation2 + $0x229] sm:$0xff] %vm44_vm0, %v165_v30  ;;  %v3318_v16 = vpack.i.bf16 %v4216_v18, %v4214_v17 }
  0x2b   :  { %v169_v37 = vld [vmem:[%s5492_s0 + $0x160] sm:$0xff]  ;;  %v170_v38 = vld [vmem:[%s5492_s0 + $0x168] sm:$0xff]  ;;  %v3288_v47 = vpack.i.bf16 %v299_v29, %v297_v28  ;;  %v171_v48 = vld [vmem:[%s5492_s0 + $0x170] sm:$0xff]  ;;  %v3283_v50 = vpack.i.bf16 %v514_v33, %v512_v32 }
  0x2c   :  { %3249 = vrot.lane.b32.xlu1 %v3248_v59, %s3884_s24  ;;  %v157_v39 = vld [vmem:[%s5492_s0 + $0x100] sm:$0xff]  ;;  %233 = vst.msk [vmem:[#allocation2 + $0x259] sm:$0xff] %vm44_vm0, %v169_v37  ;;  %234 = vst.msk [vmem:[#allocation2 + $0x261] sm:$0xff] %vm44_vm0, %v170_v38  ;;  %v158_v40 = vld [vmem:[%s5492_s0 + $0x108] sm:$0xff] }
  0x2d   :  { %v161_v42 = vld [vmem:[%s5492_s0 + $0x120] sm:$0xff]  ;;  %v162_v46 = vld [vmem:[%s5492_s0 + $0x128] sm:$0xff]  ;;  %221 = vst.msk [vmem:[#allocation2 + $0x1c9] sm:$0xff] %vm44_vm0, %v157_v39  ;;  %222 = vst.msk [vmem:[#allocation2 + $0x1d1] sm:$0xff] %vm44_vm0, %v158_v40 }
  0x2e   :  { %3244 = vrot.lane.b32.xlu0 %v3243_v63, %s3884_s24  ;;  %225 = vst.msk [vmem:[#allocation2 + $0x1f9] sm:$0xff] %vm44_vm0, %v161_v42  ;;  %226 = vst.msk [vmem:[#allocation2 + $0x201] sm:$0xff] %vm44_vm0, %v162_v46  ;;  %v172_v49 = vld [vmem:[%s5492_s0 + $0x178] sm:$0xff]  ;;  %v329_v51 = vld [vmem:[#allocation2 + $0x122] ss:$2 sm:$0xff] }
  0x2f   :  { %v331_v52 = vld [vmem:[#allocation2 + $0x152] ss:$2 sm:$0xff]  ;;  %235 = vst.msk [vmem:[#allocation2 + $0x271] sm:$0xff] %vm44_vm0, %v171_v48  ;;  %236 = vst.msk [vmem:[#allocation2 + $0x279] sm:$0xff] %vm44_vm0, %v172_v49  ;;  %v325_v53 = vld [vmem:[#allocation2 + $0xc2] ss:$2 sm:$0xff] }
  0x30   :  { %3259 = vrot.lane.b32.xlu1 %v3258_v8, %s3885_s17  ;;  %v327_v54 = vld [vmem:[#allocation2 + $0xf2] ss:$2 sm:$0xff]  ;;  %v3298_v57 = vpack.i.bf16 %v331_v52, %v329_v51  ;;  %v388_v8 = vld [vmem:[#allocation2 + $0xd9] ss:$2 sm:$0xff]  ;;  %v390_v9 = vld [vmem:[#allocation2 + $0x109] ss:$2 sm:$0xff] }
  0x31   :  { %v175_v55 = vld [vmem:[%s5492_s0 + $0x190] sm:$0xff]  ;;  %v176_v56 = vld [vmem:[%s5492_s0 + $0x198] sm:$0xff]  ;;  %v3293_v59 = vpack.i.bf16 %v327_v54, %v325_v53  ;;  %v181_v22 = vld [vmem:[%s5492_s0 + $0x1c0] sm:$0xff]  ;;  %v3313_v23 = vpack.i.bf16 %v390_v9, %v388_v8 }
  0x32   :  { %3254 = vrot.lane.b32.xlu0 %v3253_v11, %s3885_s17  ;;  %239 = vst.msk [vmem:[#allocation2 + $0x2a1] sm:$0xff] %vm44_vm0, %v175_v55  ;;  %240 = vst.msk [vmem:[#allocation2 + $0x2a9] sm:$0xff] %vm44_vm0, %v176_v56  ;;  %v179_v58 = vld [vmem:[%s5492_s0 + $0x1b0] sm:$0xff]  ;;  %v360_v60 = vld [vmem:[#allocation2 + $0x138] ss:$2 sm:$0xff] }
  0x33   :  { %v362_v61 = vld [vmem:[#allocation2 + $0x168] ss:$2 sm:$0xff]  ;;  %v356_v62 = vld [vmem:[#allocation2 + $0xd8] ss:$2 sm:$0xff]  ;;  %243 = vst.msk [vmem:[#allocation2 + $0x2d1] sm:$0xff] %vm44_vm0, %v179_v58  ;;  %245 = vst.msk [vmem:[#allocation2 + $0x2e9] sm:$0xff] %vm44_vm0, %v181_v22 }
  0x34   :  { %3269 = vrot.lane.b32.xlu1 %v3268_v19, %s3886_s20  ;;  %v358_v63 = vld [vmem:[#allocation2 + $0x108] ss:$2 sm:$0xff]  ;;  %v4284_v0 = vld [vmem:[#allocation2 + $0x229] ss:$2 sm:$0xff]  ;;  %v4286_v1 = vld [vmem:[#allocation2 + $0x259] ss:$2 sm:$0xff]  ;;  %v3308_v4 = vpack.i.bf16 %v362_v61, %v360_v60 }
  0x35   :  { %v1352_v3 = vpack.c.bf16 %v4286_v1, %v4284_v0  ;;  %v4291_v5 = vld [vmem:[#allocation2 + $0x1c9] ss:$2 sm:$0xff]  ;;  %v4293_v6 = vld [vmem:[#allocation2 + $0x1f9] ss:$2 sm:$0xff]  ;;  %v3303_v7 = vpack.i.bf16 %v358_v63, %v356_v62  ;;  %v424_v14 = vld [vmem:[#allocation2 + $0x13a] ss:$2 sm:$0xff] }
  0x36   :  { %3264 = vrot.lane.b32.xlu0 %v3263_v21, %s3886_s20  ;;  %v1351_v10 = vpack.c.bf16 %v4293_v6, %v4291_v5  ;;  %v180_v11 = vld [vmem:[%s5492_s0 + $0x1b8] sm:$0xff]  ;;  %v183_v12 = vld [vmem:[%s5492_s0 + $0x1d0] sm:$0xff]  ;;  %v182_v24 = vld [vmem:[%s5492_s0 + $0x1c8] sm:$0xff] }
  0x37   :  { %v184_v13 = vld [vmem:[%s5492_s0 + $0x1d8] sm:$0xff]  ;;  %244 = vst.msk [vmem:[#allocation2 + $0x2d9] sm:$0xff] %vm44_vm0, %v180_v11  ;;  %247 = vst.msk [vmem:[#allocation2 + $0x301] sm:$0xff] %vm44_vm0, %v183_v12  ;;  %v185_v25 = vld [vmem:[%s5492_s0 + $0x1e0] sm:$0xff] }
  0x38   :  { %3279 = vrot.lane.b32.xlu1 %v3278_v27, %s3881_s14  ;;  %v426_v15 = vld [vmem:[#allocation2 + $0x16a] ss:$2 sm:$0xff]  ;;  %248 = vst.msk [vmem:[#allocation2 + $0x309] sm:$0xff] %vm44_vm0, %v184_v13  ;;  %v420_v19 = vld [vmem:[#allocation2 + $0xda] ss:$2 sm:$0xff]  ;;  %246 = vst.msk [vmem:[#allocation2 + $0x2f1] sm:$0xff] %vm44_vm0, %v182_v24 }
  0x39   :  { %v422_v21 = vld [vmem:[#allocation2 + $0x10a] ss:$2 sm:$0xff]  ;;  %249 = vst.msk [vmem:[#allocation2 + $0x319] sm:$0xff] %vm44_vm0, %v185_v25  ;;  %v173_v27 = vld [vmem:[%s5492_s0 + $0x180] sm:$0xff]  ;;  %v484_v49 = vld [vmem:[#allocation2 + $0xf1] ss:$2 sm:$0xff] }
  0x3a   :  { %3274 = vrot.lane.b32.xlu0 %v3273_v31, %s3887_s18  ;;  %v186_v26 = vld [vmem:[%s5492_s0 + $0x1e8] sm:$0xff]  ;;  %v177_v29 = vld [vmem:[%s5492_s0 + $0x1a0] sm:$0xff]  ;;  %237 = vst.msk [vmem:[#allocation2 + $0x289] sm:$0xff] %vm44_vm0, %v173_v27  ;;  %v3328_v31 = vpack.i.bf16 %v426_v15, %v424_v14  ;;  %v187_v32 = vld [vmem:[%s5492_s0 + $0x1f0] sm:$0xff]  ;;  %v3323_v34 = vpack.i.bf16 %v422_v21, %v420_v19 }
  0x3b   :  { %250 = vst.msk [vmem:[#allocation2 + $0x321] sm:$0xff] %vm44_vm0, %v186_v26  ;;  %v174_v28 = vld [vmem:[%s5492_s0 + $0x188] sm:$0xff]  ;;  %241 = vst.msk [vmem:[#allocation2 + $0x2b9] sm:$0xff] %vm44_vm0, %v177_v29  ;;  %v188_v33 = vld [vmem:[%s5492_s0 + $0x1f8] sm:$0xff] }
  0x3c   :  { %3289 = vrot.lane.b32.xlu1 %v3288_v47, %s3881_s14  ;;  %v178_v30 = vld [vmem:[%s5492_s0 + $0x1a8] sm:$0xff]  ;;  %238 = vst.msk [vmem:[#allocation2 + $0x291] sm:$0xff] %vm44_vm0, %v174_v28  ;;  %v456_v37 = vld [vmem:[#allocation2 + $0x150] ss:$2 sm:$0xff]  ;;  %251 = vst.msk [vmem:[#allocation2 + $0x331] sm:$0xff] %vm44_vm0, %v187_v32 }
  0x3d   :  { %242 = vst.msk [vmem:[#allocation2 + $0x2c1] sm:$0xff] %vm44_vm0, %v178_v30  ;;  %v458_v38 = vld [vmem:[#allocation2 + $0x180] ss:$2 sm:$0xff]  ;;  %252 = vst.msk [vmem:[#allocation2 + $0x339] sm:$0xff] %vm44_vm0, %v188_v33  ;;  %v452_v39 = vld [vmem:[#allocation2 + $0xf0] ss:$2 sm:$0xff] }
  0x3e   :  { %3284 = vrot.lane.b32.xlu0 %v3283_v50, %s3887_s18  ;;  %v454_v40 = vld [vmem:[#allocation2 + $0x120] ss:$2 sm:$0xff]  ;;  %v3338_v42 = vpack.i.bf16 %v458_v38, %v456_v37  ;;  %v488_v47 = vld [vmem:[#allocation2 + $0x151] ss:$2 sm:$0xff]  ;;  %v490_v48 = vld [vmem:[#allocation2 + $0x181] ss:$2 sm:$0xff] }
  0x3f   :  { %v3333_v46 = vpack.i.bf16 %v454_v40, %v452_v39  ;;  %v486_v50 = vld [vmem:[#allocation2 + $0x121] ss:$2 sm:$0xff]  ;;  %v3348_v56 = vpack.i.bf16 %v490_v48, %v488_v47  ;;  %v516_v61 = vld [vmem:[#allocation2 + $0xf2] ss:$2 sm:$0xff]  ;;  %v518_v62 = vld [vmem:[#allocation2 + $0x122] ss:$2 sm:$0xff] }
  0x40   :  { %3299 = vrot.lane.b32.xlu1 %v3298_v57, %s3880_s13  ;;  %v4358_v51 = vld [vmem:[#allocation2 + $0x2e9] ss:$2 sm:$0xff]  ;;  %v3343_v58 = vpack.i.bf16 %v486_v50, %v484_v49  ;;  %v3843_v63 = vld [vmem:[%s5493_s1 + $0x10] ss:$0 sps:$4 sm:$0x33]   ;;  %v3353_v9 = vpack.i.bf16 %v518_v62, %v516_v61  ;;  %v3845_v19 = vld [vmem:[%s5493_s1] sm:$0xff]  }
  0x41   :  { %v303_v60 = vld [vmem:[#allocation2 + $0x1e1] ss:$2 sm:$0xff]  ;;  %v520_v8 = vld [vmem:[#allocation2 + $0x152] ss:$2 sm:$0xff]  ;;  %v305_v11 = vld [vmem:[#allocation2 + $0x211] ss:$2 sm:$0xff]  ;;  %3185 = vmatprep.subr.msk.bf16.mxu0 %vm1246_vm4, %v3843_v63 }
  0x42   :  { %3294 = vrot.lane.b32.xlu0 %v3293_v59, %s3880_s13  ;;  %v4360_v52 = vld [vmem:[#allocation2 + $0x319] ss:$2 sm:$0xff]  ;;  %v1248_v13 = vsel %vm1246_vm4, %v3843_v63, 0  ;;  %v522_v14 = vld [vmem:[#allocation2 + $0x182] ss:$2 sm:$0xff] }
  0x43   :  { %v1354_v53 = vpack.c.bf16 %v4360_v52, %v4358_v51  ;;  %v4364_v54 = vld [vmem:[#allocation2 + $0x289] ss:$2 sm:$0xff]  ;;  %3118 = vmatpush3.bf16.msra.mxu0 %v1248_v13  ;;  %v337_v15 = vld [vmem:[#allocation2 + $0x212] ss:$2 sm:$0xff]  ;;  %v3363_v24 = vpack.i.bf16 %v522_v14, %v520_v8 }
  0x44   :  { %3309 = vrot.lane.b32.xlu1 %v3308_v4, %s3882_s15  ;;  %v4366_v55 = vld [vmem:[#allocation2 + $0x2b9] ss:$2 sm:$0xff]  ;;  %v3844_v4 = vld [vmem:[%s5493_s1 + $0x8] sm:$0xff]   ;;  %v333_v22 = vld [vmem:[#allocation2 + $0x1b2] ss:$2 sm:$0xff] }
  0x45   :  { %v1353_v57 = vpack.c.bf16 %v4366_v55, %v4364_v54  ;;  %v301_v59 = vld [vmem:[#allocation2 + $0x1b1] ss:$2 sm:$0xff]  ;;  %v307_v12 = vld [vmem:[#allocation2 + $0x241] ss:$2 sm:$0xff]  ;;  %3119 = vmatprep.subr.bf16.mxu0 %v3844_v4 }
  0x46   :  { %3304 = vrot.lane.b32.xlu0 %v3303_v7, %s3882_s15  ;;  %v3358_v7 = vpack.i.bf16 %v303_v60, %v301_v59  ;;  %v3368_v21 = vpack.i.bf16 %v307_v12, %v305_v11 }
  0x47   :  { %3120 = vmatpush3.bf16.msra.mxu0 %v3844_v4 }
  0x48   :  { %3319 = vrot.lane.b32.xlu1 %v3318_v16, %s3883_s26  ;;  %v339_v16 = vld [vmem:[#allocation2 + $0x242] ss:$2 sm:$0xff]  ;;  %3121 = vmatprep.subr.bf16.mxu0 %v3845_v19 }
  0x4a   :  { %3314 = vrot.lane.b32.xlu0 %v3313_v23, %s3883_s26  ;;  %v335_v23 = vld [vmem:[#allocation2 + $0x1e2] ss:$2 sm:$0xff] }
  0x4c   :  { %3329 = vrot.lane.b32.xlu1 %v3328_v31, %s3884_s24 }
  0x4e   :  { %3324 = vrot.lane.b32.xlu0 %v3323_v34, %s3884_s24 }
  0x50   :  { %3339 = vrot.lane.b32.xlu1 %v3338_v42, %s3885_s17 }
  0x52   :  { %3334 = vrot.lane.b32.xlu0 %v3333_v46, %s3885_s17 }
  0x54   :  { %3349 = vrot.lane.b32.xlu1 %v3348_v56, %s3886_s20 }
  0x56   :  { %3344 = vrot.lane.b32.xlu0 %v3343_v58, %s3886_s20 }
  0x58   :  { %3359 = vrot.lane.b32.xlu1 %v3358_v7, %s3881_s14 }
  0x5a   :  { %3354 = vrot.lane.b32.xlu0 %v3353_v9, %s3887_s18 }
  0x5b   :  { %18 = vsyncpa [#allocation6], 0  ;;  %v3378_v25 = vpack.i.bf16 %v339_v16, %v337_v15  ;;  %v3373_v26 = vpack.i.bf16 %v335_v23, %v333_v22  ;;  %v368_v27 = vld [vmem:[#allocation2 + $0x228] ss:$2 sm:$0xff]  ;;  %v370_v28 = vld [vmem:[#allocation2 + $0x258] ss:$2 sm:$0xff]  ;;  %3122 = vmatpush3.bf16.msra.mxu0 %v3845_v19  ;;  %v3398_v33 = vpack.i.bf16 %v4286_v1, %v4284_v0  ;;  %v3393_v34 = vpack.i.bf16 %v4293_v6, %v4291_v5 }
  0x5c   :  { %3369 = vrot.lane.b32.xlu1 %v3368_v21, %s3881_s14  ;;  %v364_v29 = vld [vmem:[#allocation2 + $0x1c8] ss:$2 sm:$0xff]  ;;  %v366_v30 = vld [vmem:[#allocation2 + $0x1f8] ss:$2 sm:$0xff]  ;;  %v3388_v31 = vpack.i.bf16 %v370_v28, %v368_v27  ;;  %v496_v59 = vld [vmem:[#allocation2 + $0x241] ss:$2 sm:$0xff] }
  0x5d   :  { %v3383_v32 = vpack.i.bf16 %v366_v30, %v364_v29  ;;  %v432_v37 = vld [vmem:[#allocation2 + $0x22a] ss:$2 sm:$0xff]  ;;  %v434_v38 = vld [vmem:[#allocation2 + $0x25a] ss:$2 sm:$0xff]  ;;  %v498_v60 = vld [vmem:[#allocation2 + $0x271] ss:$2 sm:$0xff] }
  0x5e   :  { %3364 = vrot.lane.b32.xlu0 %v3363_v24, %s3887_s18  ;;  %v428_v39 = vld [vmem:[#allocation2 + $0x1ca] ss:$2 sm:$0xff]  ;;  %v430_v40 = vld [vmem:[#allocation2 + $0x1fa] ss:$2 sm:$0xff]  ;;  %v3408_v42 = vpack.i.bf16 %v434_v38, %v432_v37  ;;  %v492_v61 = vld [vmem:[#allocation2 + $0x1e1] ss:$2 sm:$0xff]  ;;  %v3428_v63 = vpack.i.bf16 %v498_v60, %v496_v59  ;;  %v3478_v37 = vpack.i.bf16 %v4360_v52, %v4358_v51  ;;  %v3473_v38 = vpack.i.bf16 %v4366_v55, %v4364_v54 }
  0x5f   :  { %v3403_v46 = vpack.i.bf16 %v430_v40, %v428_v39  ;;  %v464_v47 = vld [vmem:[#allocation2 + $0x240] ss:$2 sm:$0xff]  ;;  %v466_v48 = vld [vmem:[#allocation2 + $0x270] ss:$2 sm:$0xff]  ;;  %v494_v62 = vld [vmem:[#allocation2 + $0x211] ss:$2 sm:$0xff] }
  0x60   :  { %3379 = vrot.lane.b32.xlu1 %v3378_v25, %s3880_s13  ;;  %v460_v49 = vld [vmem:[#allocation2 + $0x1e0] ss:$2 sm:$0xff]  ;;  %v462_v50 = vld [vmem:[#allocation2 + $0x210] ss:$2 sm:$0xff]  ;;  %v3418_v56 = vpack.i.bf16 %v466_v48, %v464_v47  ;;  %v3423_v4 = vpack.i.bf16 %v494_v62, %v492_v61  ;;  %v309_v7 = vld [vmem:[#allocation2 + $0x271] ss:$2 sm:$0xff] }
  0x61   :  { %v3413_v58 = vpack.i.bf16 %v462_v50, %v460_v49  ;;  %v311_v8 = vld [vmem:[#allocation2 + $0x2a1] ss:$2 sm:$0xff]  ;;  %v524_v9 = vld [vmem:[#allocation2 + $0x1e2] ss:$2 sm:$0xff]  ;;  %v526_v11 = vld [vmem:[#allocation2 + $0x212] ss:$2 sm:$0xff] }
  0x62   :  { %3374 = vrot.lane.b32.xlu0 %v3373_v26, %s3880_s13  ;;  %v3438_v12 = vpack.i.bf16 %v311_v8, %v309_v7  ;;  %v3433_v13 = vpack.i.bf16 %v526_v11, %v524_v9  ;;  %v313_v14 = vld [vmem:[#allocation2 + $0x2d1] ss:$2 sm:$0xff]  ;;  %v315_v15 = vld [vmem:[#allocation2 + $0x301] ss:$2 sm:$0xff]  ;;  %v528_v16 = vld [vmem:[#allocation2 + $0x242] ss:$2 sm:$0xff] }
  0x63   :  { %v530_v19 = vld [vmem:[#allocation2 + $0x272] ss:$2 sm:$0xff]  ;;  %v3448_v21 = vpack.i.bf16 %v315_v15, %v313_v14  ;;  %v347_v24 = vld [vmem:[#allocation2 + $0x302] ss:$2 sm:$0xff]  ;;  %v504_v61 = vld [vmem:[#allocation2 + $0x301] ss:$2 sm:$0xff] }
  0x64   :  { %3389 = vrot.lane.b32.xlu1 %v3388_v31, %s3882_s15  ;;  %v3443_v22 = vpack.i.bf16 %v530_v19, %v528_v16  ;;  %v345_v23 = vld [vmem:[#allocation2 + $0x2d2] ss:$2 sm:$0xff]  ;;  %v343_v26 = vld [vmem:[#allocation2 + $0x2a2] ss:$2 sm:$0xff]  ;;  %v506_v62 = vld [vmem:[#allocation2 + $0x331] ss:$2 sm:$0xff] }
  0x65   :  { %v341_v25 = vld [vmem:[#allocation2 + $0x272] ss:$2 sm:$0xff]  ;;  %v3458_v27 = vpack.i.bf16 %v347_v24, %v345_v23  ;;  %v502_v7 = vld [vmem:[#allocation2 + $0x2d1] ss:$2 sm:$0xff]  ;;  %v3508_v9 = vpack.i.bf16 %v506_v62, %v504_v61  ;;  %v532_v15 = vld [vmem:[#allocation2 + $0x2a2] ss:$2 sm:$0xff] }
  0x66   :  { %3384 = vrot.lane.b32.xlu0 %v3383_v32, %s3882_s15  ;;  %v3453_v28 = vpack.i.bf16 %v343_v26, %v341_v25  ;;  %v376_v29 = vld [vmem:[#allocation2 + $0x2e8] ss:$2 sm:$0xff]  ;;  %v378_v30 = vld [vmem:[#allocation2 + $0x318] ss:$2 sm:$0xff]  ;;  %vm1084_vm5 = vcmask 97280   ;;  %vm1101_vm6 = vcmask 130048  }
  0x67   :  { %v372_v31 = vld [vmem:[#allocation2 + $0x288] ss:$2 sm:$0xff]  ;;  %v374_v32 = vld [vmem:[#allocation2 + $0x2b8] ss:$2 sm:$0xff]  ;;  %vm1118_vm7 = vcmask 162816   ;;  %vm5506_vm8 = vcmask 195584  }
  0x68   :  { %3399 = vrot.lane.b32.xlu1 %v3398_v33, %s3883_s26  ;;  %v3468_v33 = vpack.i.bf16 %v378_v30, %v376_v29  ;;  %v440_v39 = vld [vmem:[#allocation2 + $0x2ea] ss:$2 sm:$0xff]  ;;  %v442_v40 = vld [vmem:[#allocation2 + $0x31a] ss:$2 sm:$0xff]  ;;  %vm1152_vm9 = vcmask 228352   ;;  %vm5505_vm10 = vcmask 261120  }
  0x69   :  { %v3488_v47 = vpack.i.bf16 %v442_v40, %v440_v39  ;;  %v472_v49 = vld [vmem:[#allocation2 + $0x300] ss:$2 sm:$0xff]  ;;  %v474_v50 = vld [vmem:[#allocation2 + $0x330] ss:$2 sm:$0xff]  ;;  %vm1221_vm11 = vcmask 293888   ;;  %vm1694_vm12 = vcmask 58368  }
  0x6a   :  { %3394 = vrot.lane.b32.xlu0 %v3393_v34, %s3883_s26  ;;  %v3463_v34 = vpack.i.bf16 %v374_v32, %v372_v31  ;;  %v3498_v59 = vpack.i.bf16 %v474_v50, %v472_v49  ;;  %v534_v16 = vld [vmem:[#allocation2 + $0x2d2] ss:$2 sm:$0xff]  ;;  %vm1704_vm13 = vcmask 57344   ;;  %1695 = vst.msk [vmem:[#allocation3 + $0x8] sm:$0x3] %vm1694_vm12, %v3879_v2  ;;  %s3888_s22 = smov 40  }
  0x6b   :  { %v255_v30 = vld [vmem:[#allocation2 + $0x30] ss:$2 sm:$0xff]  ;;  %v253_v31 = vld [vmem:[#allocation2] ss:$2 sm:$0xff]  ;;  %1697 = vst.msk [vmem:[#allocation3 + $0xa8] sm:$0x3] %vm1694_vm12, %v3879_v2 }
  0x6c   :  { %3409 = vrot.lane.b32.xlu1 %v3408_v42, %s3884_s24  ;;  %v436_v42 = vld [vmem:[#allocation2 + $0x28a] ss:$2 sm:$0xff]  ;;  %1700 = vst.msk [vmem:[#allocation3 + $0x98] sm:$0x3] %vm1694_vm12, %v3879_v2  ;;  %1702 = vst.msk [vmem:[#allocation3 + $0x138] sm:$0x3] %vm1694_vm12, %v3879_v2 }
  0x6d   :  { %1722 = vst.msk [vmem:[#allocation3 + $0x29] sm:$0x1] %vm1704_vm13, %v3879_v2  ;;  %1723 = vst.msk [vmem:[#allocation3 + $0x39] sm:$0x1] %vm1704_vm13, %v3879_v2  ;;  %v3849_v35 = vld [vmem:[%s5498_s6 + $0x8] sm:$0xff]   ;;  %s3889_s27 = smov 48  }
  0x6e   :  { %3404 = vrot.lane.b32.xlu0 %v3403_v46, %s3884_s24  ;;  %v438_v46 = vld [vmem:[#allocation2 + $0x2ba] ss:$2 sm:$0xff]  ;;  %1705 = vst.msk [vmem:[#allocation3 + $0x10] sm:$0x1] %vm1704_vm13, %v3879_v2  ;;  %1706 = vst.msk [vmem:[#allocation3 + $0x20] sm:$0x1] %vm1704_vm13, %v3879_v2 }
  0x6f   :  { %v3483_v48 = vpack.i.bf16 %v438_v46, %v436_v42  ;;  %1707 = vst.msk [vmem:[#allocation3 + $0x30] sm:$0x1] %vm1704_vm13, %v3879_v2  ;;  %1708 = vst.msk [vmem:[#allocation3 + $0x40] sm:$0x1] %vm1704_vm13, %v3879_v2 }
  0x70   :  { %3419 = vrot.lane.b32.xlu1 %v3418_v56, %s3885_s17  ;;  %v468_v56 = vld [vmem:[#allocation2 + $0x2a0] ss:$2 sm:$0xff]  ;;  %1709 = vst.msk [vmem:[#allocation3 + $0x50] sm:$0x1] %vm1704_vm13, %v3879_v2  ;;  %1710 = vst.msk [vmem:[#allocation3 + $0x60] sm:$0x1] %vm1704_vm13, %v3879_v2 }
  0x71   :  { %1711 = vst.msk [vmem:[#allocation3 + $0x70] sm:$0x1] %vm1704_vm13, %v3879_v2  ;;  %1712 = vst.msk [vmem:[#allocation3 + $0x80] sm:$0x1] %vm1704_vm13, %v3879_v2 }
  0x72   :  { %3414 = vrot.lane.b32.xlu0 %v3413_v58, %s3885_s17  ;;  %v470_v58 = vld [vmem:[#allocation2 + $0x2d0] ss:$2 sm:$0xff]  ;;  %1713 = vst.msk [vmem:[#allocation3 + $0xb0] sm:$0x1] %vm1704_vm13, %v3879_v2  ;;  %1714 = vst.msk [vmem:[#allocation3 + $0xc0] sm:$0x1] %vm1704_vm13, %v3879_v2 }
  0x73   :  { %v3493_v60 = vpack.i.bf16 %v470_v58, %v468_v56  ;;  %1715 = vst.msk [vmem:[#allocation3 + $0xd0] sm:$0x1] %vm1704_vm13, %v3879_v2  ;;  %1716 = vst.msk [vmem:[#allocation3 + $0xe0] sm:$0x1] %vm1704_vm13, %v3879_v2 }
  0x74   :  { %3429 = vrot.lane.b32.xlu1 %v3428_v63, %s3886_s20  ;;  %1717 = vst.msk [vmem:[#allocation3 + $0xf0] sm:$0x1] %vm1704_vm13, %v3879_v2  ;;  %1718 = vst.msk [vmem:[#allocation3 + $0x100] sm:$0x1] %vm1704_vm13, %v3879_v2 }
  0x75   :  { %1719 = vst.msk [vmem:[#allocation3 + $0x110] sm:$0x1] %vm1704_vm13, %v3879_v2  ;;  %1720 = vst.msk [vmem:[#allocation3 + $0x120] sm:$0x1] %vm1704_vm13, %v3879_v2 }
  0x76   :  { %3424 = vrot.lane.b32.xlu0 %v3423_v4, %s3886_s20  ;;  %v500_v4 = vld [vmem:[#allocation2 + $0x2a1] ss:$2 sm:$0xff]  ;;  %1721 = vst.msk [vmem:[#allocation3 + $0x19] sm:$0x1] %vm1704_vm13, %v3879_v2  ;;  %1724 = vst.msk [vmem:[#allocation3 + $0x49] sm:$0x1] %vm1704_vm13, %v3879_v2 }
  0x77   :  { %v3503_v11 = vpack.i.bf16 %v502_v7, %v500_v4  ;;  %1725 = vst.msk [vmem:[#allocation3 + $0x59] sm:$0x1] %vm1704_vm13, %v3879_v2  ;;  %1726 = vst.msk [vmem:[#allocation3 + $0x69] sm:$0x1] %vm1704_vm13, %v3879_v2 }
  0x78   :  { %3439 = vrot.lane.b32.xlu1 %v3438_v12, %s3881_s14  ;;  %v536_v12 = vld [vmem:[#allocation2 + $0x302] ss:$2 sm:$0xff]  ;;  %1727 = vst.msk [vmem:[#allocation3 + $0x79] sm:$0x1] %vm1704_vm13, %v3879_v2  ;;  %1728 = vst.msk [vmem:[#allocation3 + $0x89] sm:$0x1] %vm1704_vm13, %v3879_v2 }
  0x79   :  { %1729 = vst.msk [vmem:[#allocation3 + $0xb9] sm:$0x1] %vm1704_vm13, %v3879_v2  ;;  %1730 = vst.msk [vmem:[#allocation3 + $0xc9] sm:$0x1] %vm1704_vm13, %v3879_v2 }
  0x7a   :  { %3434 = vrot.lane.b32.xlu0 %v3433_v13, %s3887_s18  ;;  %v538_v13 = vld [vmem:[#allocation2 + $0x332] ss:$2 sm:$0xff]  ;;  %1731 = vst.msk [vmem:[#allocation3 + $0xd9] sm:$0x1] %vm1704_vm13, %v3879_v2  ;;  %1732 = vst.msk [vmem:[#allocation3 + $0xe9] sm:$0x1] %vm1704_vm13, %v3879_v2 }
  0x7b   :  { %1733 = vst.msk [vmem:[#allocation3 + $0xf9] sm:$0x1] %vm1704_vm13, %v3879_v2  ;;  %1734 = vst.msk [vmem:[#allocation3 + $0x109] sm:$0x1] %vm1704_vm13, %v3879_v2 }
  0x7c   :  { %3449 = vrot.lane.b32.xlu1 %v3448_v21, %s3881_s14  ;;  %v3518_v21 = vpack.i.bf16 %v538_v13, %v536_v12  ;;  %1735 = vst.msk [vmem:[#allocation3 + $0x119] sm:$0x1] %vm1704_vm13, %v3879_v2  ;;  %1736 = vst.msk [vmem:[#allocation3 + $0x129] sm:$0x1] %vm1704_vm13, %v3879_v2  ;;  %s3890_s14 = smov 56  }
  0x7e   :  { %3444 = vrot.lane.b32.xlu0 %v3443_v22, %s3887_s18  ;;  %v3513_v22 = vpack.i.bf16 %v534_v16, %v532_v15 }
  0x80   :  { %3459 = vrot.lane.b32.xlu1 %v3458_v27, %s3880_s13 }
  0x82   :  { %3454 = vrot.lane.b32.xlu0 %v3453_v28, %s3880_s13 }
  0x83   :  { %v3215_v63 = vpop.permute.xlu1 %3214 }
  0x84   :  { %3469 = vrot.lane.b32.xlu1 %v3468_v33, %s3882_s15  ;;  %v3217_v39 = vunpack.i.h.bf16 %v3215_v63  ;;  %v3216_v40 = vunpack.i.l.bf16 %v3215_v63 }
  0x85   :  { %v3205_v8 = vpop.permute.xlu0 %3204 }
  0x86   :  { %3464 = vrot.lane.b32.xlu0 %v3463_v34, %s3882_s15  ;;  %v3207_v27 = vunpack.i.h.bf16 %v3205_v8  ;;  %v3206_v28 = vunpack.i.l.bf16 %v3205_v8 }
  0x88   :  { %3479 = vrot.lane.b32.xlu1 %v3478_v37, %s3883_s26  ;;  %v3220_v14 = vpop.permute.xlu1 %3219  ;;  %v257_v37 = vld [vmem:[#allocation2 + $0x60] ss:$2 sm:$0xff]  ;;  %v1052_v42 = vsel %vm44_vm0, %v255_v30, %v3207_v27  ;;  %v1051_v46 = vsel %vm44_vm0, %v253_v31, %v3206_v28 }
  0x89   :  { %v3210_v19 = vpop.permute.xlu0 %3209  ;;  %v1068_v63 = vsel %vm1067_vm3, %v1051_v46, %v3216_v40  ;;  %v1069_v4 = vsel %vm1067_vm3, %v1052_v42, %v3217_v39 }
  0x8a   :  { %3474 = vrot.lane.b32.xlu0 %v3473_v38, %s3883_s26  ;;  %v3212_v32 = vunpack.i.h.bf16 %v3210_v19  ;;  %v3211_v33 = vunpack.i.l.bf16 %v3210_v19  ;;  %v259_v38 = vld [vmem:[#allocation2 + $0x90] ss:$2 sm:$0xff] }
  0x8c   :  { %3489 = vrot.lane.b32.xlu1 %v3488_v47, %s3884_s24  ;;  %v3222_v47 = vunpack.i.h.bf16 %v3220_v14  ;;  %v1054_v50 = vsel %vm44_vm0, %v259_v38, %v3212_v32  ;;  %v1053_v56 = vsel %vm44_vm0, %v257_v37, %v3211_v33 }
  0x8e   :  { %3484 = vrot.lane.b32.xlu0 %v3483_v48, %s3884_s24  ;;  %v3221_v48 = vunpack.i.l.bf16 %v3220_v14  ;;  %v1071_v8 = vsel %vm1067_vm3, %v1054_v50, %v3222_v47 }
  0x90   :  { %3499 = vrot.lane.b32.xlu1 %v3498_v59, %s3885_s17  ;;  %v1070_v7 = vsel %vm1067_vm3, %v1053_v56, %v3221_v48 }
  0x92   :  { %3494 = vrot.lane.b32.xlu0 %v3493_v60, %s3885_s17 }
  0x94   :  { %3509 = vrot.lane.b32.xlu1 %v3508_v9, %s3886_s20 }
  0x96   :  { %3504 = vrot.lane.b32.xlu0 %v3503_v11, %s3886_s20  ;;  %v3230_v23 = vpop.permute.xlu1 %3229 }
  0x97   :  { %v3232_v58 = vunpack.i.h.bf16 %v3230_v23  ;;  %v3231_v59 = vunpack.i.l.bf16 %v3230_v23 }
  0x98   :  { %v3225_v24 = vpop.permute.xlu0 %3224  ;;  %3519 = vrot.lane.b32.xlu1 %v3518_v21, %s3887_s18 }
  0x99   :  { %v3227_v61 = vunpack.i.h.bf16 %v3225_v24  ;;  %v3226_v62 = vunpack.i.l.bf16 %v3225_v24  ;;  %v1087_v13 = vsel %vm1084_vm5, %v1070_v7, %v3231_v59  ;;  %v1088_v14 = vsel %vm1084_vm5, %v1071_v8, %v3232_v58 }
  0x9a   :  { %3514 = vrot.lane.b32.xlu0 %v3513_v22, %s3887_s18  ;;  %v4427_v25 = vpop.permute.xlu1 %3239 }
  0x9b   :  { %v1085_v21 = vsel %vm1084_vm5, %v1068_v63, %v3226_v62  ;;  %v1086_v22 = vsel %vm1084_vm5, %v1069_v4, %v3227_v61  ;;  %v3242_v27 = vunpack.i.h.bf16 %v4427_v25  ;;  %v3241_v28 = vunpack.i.l.bf16 %v4427_v25 }
  0x9c   :  { %v3235_v26 = vpop.permute.xlu0 %3234 }
  0x9d   :  { %v3237_v9 = vunpack.i.h.bf16 %v3235_v26  ;;  %v3236_v11 = vunpack.i.l.bf16 %v3235_v26  ;;  %v1105_v61 = vsel %vm1101_vm6, %v1088_v14, %v3242_v27 }
  0x9e   :  { %v4429_v29 = vpop.permute.xlu1 %3249 }
  0x9f   :  { %v1102_v31 = vsel %vm1101_vm6, %v1085_v21, %v3236_v11  ;;  %v1103_v32 = vsel %vm1101_vm6, %v1086_v22, %v3237_v9  ;;  %v3252_v33 = vunpack.i.h.bf16 %v4429_v29 }
  0xa0   :  { %v3245_v34 = vpop.permute.xlu0 %3244 }
  0xa1   :  { %v3247_v15 = vunpack.i.h.bf16 %v3245_v34  ;;  %v3246_v16 = vunpack.i.l.bf16 %v3245_v34  ;;  %v3251_v34 = vunpack.i.l.bf16 %v4429_v29  ;;  %v1122_v7 = vsel %vm1118_vm7, %v1105_v61, %v3252_v33 }
  0xa2   :  { %v4433_v49 = vpop.permute.xlu1 %3259 }
  0xa3   :  { %v1119_v38 = vsel %vm1118_vm7, %v1102_v31, %v3246_v16  ;;  %v1120_v39 = vsel %vm1118_vm7, %v1103_v32, %v3247_v15  ;;  %v3262_v40 = vunpack.i.h.bf16 %v4433_v49  ;;  %v3261_v25 = vunpack.i.l.bf16 %v4433_v49 }
  0xa4   :  { %v3255_v60 = vpop.permute.xlu0 %3254 }
  0xa5   :  { %v3257_v23 = vunpack.i.h.bf16 %v3255_v60  ;;  %v3256_v24 = vunpack.i.l.bf16 %v3255_v60  ;;  %v1104_v60 = vsel %vm1101_vm6, %v1087_v13, %v3241_v28 }
  0xa6   :  { %v3270_v12 = vpop.permute.xlu1 %3269  ;;  %v1121_v4 = vsel %vm1118_vm7, %v1104_v60, %v3251_v34 }
  0xa7   :  { %v1136_v48 = vsel %vm5506_vm8, %v1119_v38, %v3256_v24  ;;  %v1137_v50 = vsel %vm5506_vm8, %v1120_v39, %v3257_v23  ;;  %v3272_v56 = vunpack.i.h.bf16 %v3270_v12  ;;  %v3271_v58 = vunpack.i.l.bf16 %v3270_v12 }
  0xa8   :  { %v3265_v19 = vpop.permute.xlu0 %3264  ;;  %v1138_v11 = vsel %vm5506_vm8, %v1121_v4, %v3261_v25  ;;  %v1139_v12 = vsel %vm5506_vm8, %v1122_v7, %v3262_v40  ;;  %v265_v40 = vld [vmem:[#allocation2 + $0x120] ss:$2 sm:$0xff]  ;;  %v267_v25 = vld [vmem:[#allocation2 + $0x150] ss:$2 sm:$0xff] }
  0xa9   :  { %v3267_v26 = vunpack.i.h.bf16 %v3265_v19  ;;  %v3266_v30 = vunpack.i.l.bf16 %v3265_v19  ;;  %v1155_v13 = vsel %vm1152_vm9, %v1138_v11, %v3271_v58  ;;  %v1156_v14 = vsel %vm1152_vm9, %v1139_v12, %v3272_v56 }
  0xaa   :  { %v4451_v37 = vpop.permute.xlu1 %3279 }
  0xab   :  { %v1153_v29 = vsel %vm1152_vm9, %v1136_v48, %v3266_v30  ;;  %v1154_v59 = vsel %vm1152_vm9, %v1137_v50, %v3267_v26  ;;  %v3282_v38 = vunpack.i.h.bf16 %v4451_v37  ;;  %v3281_v39 = vunpack.i.l.bf16 %v4451_v37  ;;  %v263_v48 = vld [vmem:[#allocation2 + $0xf0] ss:$2 sm:$0xff] }
  0xac   :  { %v3275_v42 = vpop.permute.xlu0 %3274 }
  0xad   :  { %v3277_v46 = vunpack.i.h.bf16 %v3275_v42  ;;  %v3276_v47 = vunpack.i.l.bf16 %v3275_v42  ;;  %v1056_v37 = vsel %vm44_vm0, %v263_v48, %v3282_v38 }
  0xae   :  { %v3290_v62 = vpop.permute.xlu1 %3289 }
  0xaf   :  { %v1170_v49 = vsel %vm5505_vm10, %v1153_v29, %v3276_v47  ;;  %v1171_v63 = vsel %vm5505_vm10, %v1154_v59, %v3277_v46  ;;  %v3292_v33 = vunpack.i.h.bf16 %v3290_v62  ;;  %v3291_v34 = vunpack.i.l.bf16 %v3290_v62  ;;  %v261_v47 = vld [vmem:[#allocation2 + $0xc0] ss:$2 sm:$0xff] }
  0xb0   :  { %v3285_v8 = vpop.permute.xlu0 %3284  ;;  %v1186_v9 = vpack.c.bf16 %v1171_v63, %v1170_v49  ;;  %v1055_v4 = vsel %vm44_vm0, %v261_v47, %v3281_v39 }
  0xb1   :  { %v3287_v15 = vunpack.i.h.bf16 %v3285_v8  ;;  %v3286_v16 = vunpack.i.l.bf16 %v3285_v8  ;;  %v1058_v61 = vsel %vm44_vm0, %v267_v25, %v3292_v33  ;;  %v1057_v62 = vsel %vm44_vm0, %v265_v40, %v3291_v34 }
  0xb2   :  { %3123 = vmatprep.mubr.msk.bf16.mxu0 %vm1221_vm11, %v1186_v9  ;;  %v3300_v22 = vpop.permute.xlu1 %3299 }
  0xb3   :  { %v1172_v19 = vsel %vm5505_vm10, %v1155_v13, %v3286_v16  ;;  %v1173_v21 = vsel %vm5505_vm10, %v1156_v14, %v3287_v15  ;;  %v3302_v42 = vunpack.i.h.bf16 %v3300_v22  ;;  %v3301_v46 = vunpack.i.l.bf16 %v3300_v22 }
  0xb4   :  { %v3295_v23 = vpop.permute.xlu0 %3294  ;;  %v1187_v24 = vpack.c.bf16 %v1173_v21, %v1172_v19 }
  0xb5   :  { %v3297_v50 = vunpack.i.h.bf16 %v3295_v23  ;;  %v3296_v56 = vunpack.i.l.bf16 %v3295_v23  ;;  %v1074_v7 = vsel %vm1067_vm3, %v1057_v62, %v3301_v46  ;;  %v1075_v8 = vsel %vm1067_vm3, %v1058_v61, %v3302_v42 }
  0xb6   :  { %3124 = vmatmul.mubr.msk.bf16.vlgmr.msra.gmra.mxu0 %vm1221_vm11, %v1187_v24  ;;  %v3310_v27 = vpop.permute.xlu1 %3309 }
  0xb7   :  { %v3312_v29 = vunpack.i.h.bf16 %v3310_v27  ;;  %v3311_v59 = vunpack.i.l.bf16 %v3310_v27  ;;  %v1073_v9 = vsel %vm1067_vm3, %v1056_v37, %v3297_v50  ;;  %v1072_v11 = vsel %vm1067_vm3, %v1055_v4, %v3296_v56 }
  0xb8   :  { %v3305_v28 = vpop.permute.xlu0 %3304 }
  0xb9   :  { %v3307_v49 = vunpack.i.h.bf16 %v3305_v28  ;;  %v3306_v63 = vunpack.i.l.bf16 %v3305_v28  ;;  %v1091_v13 = vsel %vm1084_vm5, %v1074_v7, %v3311_v59  ;;  %v1092_v14 = vsel %vm1084_vm5, %v1075_v8, %v3312_v29 }
  0xba   :  { %v4475_v26 = vpop.permute.xlu1 %3319 }
  0xbb   :  { %v1089_v23 = vsel %vm1084_vm5, %v1072_v11, %v3306_v63  ;;  %v1090_v24 = vsel %vm1084_vm5, %v1073_v9, %v3307_v49  ;;  %v3322_v33 = vunpack.i.h.bf16 %v4475_v26  ;;  %v3321_v34 = vunpack.i.l.bf16 %v4475_v26 }
  0xbc   :  { %v3315_v30 = vpop.permute.xlu0 %3314 }
  0xbd   :  { %v3317_v12 = vunpack.i.h.bf16 %v3315_v30  ;;  %v3316_v15 = vunpack.i.l.bf16 %v3315_v30  ;;  %v1108_v63 = vsel %vm1101_vm6, %v1091_v13, %v3321_v34  ;;  %v1109_v37 = vsel %vm1101_vm6, %v1092_v14, %v3322_v33 }
  0xbe   :  { %v4477_v31 = vpop.permute.xlu1 %3329 }
  0xbf   :  { %v1106_v39 = vsel %vm1101_vm6, %v1089_v23, %v3316_v15  ;;  %v1107_v40 = vsel %vm1101_vm6, %v1090_v24, %v3317_v12  ;;  %v3332_v25 = vunpack.i.h.bf16 %v4477_v31 }
  0xc0   :  { %v3325_v32 = vpop.permute.xlu0 %3324 }
  0xc1   :  { %v3327_v19 = vunpack.i.h.bf16 %v3325_v32  ;;  %v3326_v21 = vunpack.i.l.bf16 %v3325_v32  ;;  %v3331_v32 = vunpack.i.l.bf16 %v4477_v31  ;;  %v1126_v9 = vsel %vm1118_vm7, %v1109_v37, %v3332_v25 }
  0xc2   :  { %v3340_v58 = vpop.permute.xlu1 %3339 }
  0xc3   :  { %v1123_v46 = vsel %vm1118_vm7, %v1106_v39, %v3326_v21  ;;  %v1124_v47 = vsel %vm1118_vm7, %v1107_v40, %v3327_v19  ;;  %v3342_v48 = vunpack.i.h.bf16 %v3340_v58  ;;  %v3341_v50 = vunpack.i.l.bf16 %v3340_v58 }
  0xc4   :  { %v3335_v60 = vpop.permute.xlu0 %3334  ;;  %v1125_v8 = vsel %vm1118_vm7, %v1108_v63, %v3331_v32 }
  0xc5   :  { %v3337_v27 = vunpack.i.h.bf16 %v3335_v60  ;;  %v3336_v28 = vunpack.i.l.bf16 %v3335_v60  ;;  %v1142_v15 = vsel %vm5506_vm8, %v1125_v8, %v3341_v50  ;;  %v275_v50 = vld [vmem:[#allocation2 + $0x240] ss:$2 sm:$0xff] }
  0xc6   :  { %v3350_v16 = vpop.permute.xlu1 %3349 }
  0xc7   :  { %v1140_v26 = vsel %vm5506_vm8, %v1123_v46, %v3336_v28  ;;  %v1141_v29 = vsel %vm5506_vm8, %v1124_v47, %v3337_v27  ;;  %v3352_v61 = vunpack.i.h.bf16 %v3350_v16  ;;  %v3351_v62 = vunpack.i.l.bf16 %v3350_v16 }
  0xc8   :  { %v3345_v22 = vpop.permute.xlu0 %3344  ;;  %v1143_v16 = vsel %vm5506_vm8, %v1126_v9, %v3342_v48  ;;  %v273_v48 = vld [vmem:[#allocation2 + $0x210] ss:$2 sm:$0xff] }
  0xc9   :  { %v3347_v38 = vunpack.i.h.bf16 %v3345_v22  ;;  %v3346_v30 = vunpack.i.l.bf16 %v3345_v22  ;;  %v1159_v13 = vsel %vm1152_vm9, %v1142_v15, %v3351_v62  ;;  %v1160_v14 = vsel %vm1152_vm9, %v1143_v16, %v3352_v61 }
  0xca   :  { %v4499_v42 = vpop.permute.xlu1 %3359 }
  0xcb   :  { %v1157_v49 = vsel %vm1152_vm9, %v1140_v26, %v3346_v30  ;;  %v1158_v31 = vsel %vm1152_vm9, %v1141_v29, %v3347_v38  ;;  %v3362_v46 = vunpack.i.h.bf16 %v4499_v42  ;;  %v3361_v47 = vunpack.i.l.bf16 %v4499_v42  ;;  %v269_v29 = vld [vmem:[#allocation2 + $0x1b0] ss:$2 sm:$0xff] }
  0xcc   :  { %v3355_v56 = vpop.permute.xlu0 %3354 }
  0xcd   :  { %v3357_v59 = vunpack.i.h.bf16 %v3355_v56  ;;  %v3356_v60 = vunpack.i.l.bf16 %v3355_v56  ;;  %v1059_v8 = vsel %vm44_vm0, %v269_v29, %v3361_v47 }
  0xce   :  { %v3370_v7 = vpop.permute.xlu1 %3369 }
  0xcf   :  { %v1174_v4 = vsel %vm5505_vm10, %v1157_v49, %v3356_v60  ;;  %v1175_v58 = vsel %vm5505_vm10, %v1158_v31, %v3357_v59  ;;  %v3372_v25 = vunpack.i.h.bf16 %v3370_v7  ;;  %v3371_v32 = vunpack.i.l.bf16 %v3370_v7  ;;  %v271_v59 = vld [vmem:[#allocation2 + $0x1e0] ss:$2 sm:$0xff] }
  0xd0   :  { %v3365_v11 = vpop.permute.xlu0 %3364  ;;  %v1188_v12 = vpack.c.bf16 %v1175_v58, %v1174_v4  ;;  %v1060_v42 = vsel %vm44_vm0, %v271_v59, %v3362_v46 }
  0xd1   :  { %v3367_v19 = vunpack.i.h.bf16 %v3365_v11  ;;  %v3366_v21 = vunpack.i.l.bf16 %v3365_v11  ;;  %v1062_v37 = vsel %vm44_vm0, %v275_v50, %v3372_v25  ;;  %v1061_v4 = vsel %vm44_vm0, %v273_v48, %v3371_v32 }
  0xd2   :  { %3127 = vmatprep.mubr.msk.bf16.mxu0 %vm1221_vm11, %v1188_v12  ;;  %v3380_v24 = vpop.permute.xlu1 %3379 }
  0xd3   :  { %v1177_v22 = vsel %vm5505_vm10, %v1160_v14, %v3367_v19  ;;  %v1176_v23 = vsel %vm5505_vm10, %v1159_v13, %v3366_v21  ;;  %v3382_v56 = vunpack.i.h.bf16 %v3380_v24  ;;  %v3381_v26 = vunpack.i.l.bf16 %v3380_v24 }
  0xd4   :  { %v1189_v27 = vpack.c.bf16 %v1177_v22, %v1176_v23  ;;  %v3375_v28 = vpop.permute.xlu0 %3374 }
  0xd5   :  { %v3377_v60 = vunpack.i.h.bf16 %v3375_v28  ;;  %v3376_v61 = vunpack.i.l.bf16 %v3375_v28  ;;  %v1078_v9 = vsel %vm1067_vm3, %v1061_v4, %v3381_v26  ;;  %v1079_v11 = vsel %vm1067_vm3, %v1062_v37, %v3382_v56 }
  0xd6   :  { %3128 = vmatmul.mubr.msk.bf16.gmra.mxu0 %vm1221_vm11, %v1189_v27  ;;  %v3390_v33 = vpop.permute.xlu1 %3389 }
  0xd7   :  { %v3392_v49 = vunpack.i.h.bf16 %v3390_v33  ;;  %v3391_v31 = vunpack.i.l.bf16 %v3390_v33  ;;  %v1077_v12 = vsel %vm1067_vm3, %v1060_v42, %v3377_v60  ;;  %v1076_v15 = vsel %vm1067_vm3, %v1059_v8, %v3376_v61 }
  0xd8   :  { %v3385_v34 = vpop.permute.xlu0 %3384 }
  0xd9   :  { %v3387_v58 = vunpack.i.h.bf16 %v3385_v34  ;;  %v3386_v7 = vunpack.i.l.bf16 %v3385_v34  ;;  %v1095_v13 = vsel %vm1084_vm5, %v1078_v9, %v3391_v31  ;;  %v1096_v14 = vsel %vm1084_vm5, %v1079_v11, %v3392_v49 }
  0xda   :  { %v4521_v38 = vpop.permute.xlu1 %3399 }
  0xdb   :  { %v1093_v27 = vsel %vm1084_vm5, %v1076_v15, %v3386_v7  ;;  %v1094_v28 = vsel %vm1084_vm5, %v1077_v12, %v3387_v58  ;;  %v3402_v25 = vunpack.i.h.bf16 %v4521_v38  ;;  %v3401_v32 = vunpack.i.l.bf16 %v4521_v38 }
  0xdc   :  { %v3395_v30 = vpop.permute.xlu0 %3394 }
  0xdd   :  { %v3397_v16 = vunpack.i.h.bf16 %v3395_v30  ;;  %v3396_v19 = vunpack.i.l.bf16 %v3395_v30  ;;  %v1112_v7 = vsel %vm1101_vm6, %v1095_v13, %v3401_v32  ;;  %v1113_v42 = vsel %vm1101_vm6, %v1096_v14, %v3402_v25 }
  0xde   :  { %v4523_v39 = vpop.permute.xlu1 %3409 }
  0xdf   :  { %v1110_v47 = vsel %vm1101_vm6, %v1093_v27, %v3396_v19  ;;  %v1111_v48 = vsel %vm1101_vm6, %v1094_v28, %v3397_v16  ;;  %v3412_v50 = vunpack.i.h.bf16 %v4523_v39 }
  0xe0   :  { %v3405_v40 = vpop.permute.xlu0 %3404 }
  0xe1   :  { %v3407_v22 = vunpack.i.h.bf16 %v3405_v40  ;;  %v3406_v23 = vunpack.i.l.bf16 %v3405_v40  ;;  %v3411_v40 = vunpack.i.l.bf16 %v4523_v39  ;;  %v1130_v12 = vsel %vm1118_vm7, %v1113_v42, %v3412_v50 }
  0xe2   :  { %v3420_v62 = vpop.permute.xlu1 %3419 }
  0xe3   :  { %v1127_v26 = vsel %vm1118_vm7, %v1110_v47, %v3406_v23  ;;  %v1128_v29 = vsel %vm1118_vm7, %v1111_v48, %v3407_v22  ;;  %v3422_v59 = vunpack.i.h.bf16 %v3420_v62  ;;  %v3421_v60 = vunpack.i.l.bf16 %v3420_v62 }
  0xe4   :  { %v3415_v63 = vpop.permute.xlu0 %3414  ;;  %v1129_v11 = vsel %vm1118_vm7, %v1112_v7, %v3411_v40 }
  0xe5   :  { %v3417_v33 = vunpack.i.h.bf16 %v3415_v63  ;;  %v3416_v34 = vunpack.i.l.bf16 %v3415_v63  ;;  %v1146_v19 = vsel %vm5506_vm8, %v1129_v11, %v3421_v60 }
  0xe6   :  { %v3430_v21 = vpop.permute.xlu1 %3429 }
  0xe7   :  { %v1144_v38 = vsel %vm5506_vm8, %v1127_v26, %v3416_v34  ;;  %v1145_v49 = vsel %vm5506_vm8, %v1128_v29, %v3417_v33  ;;  %v3432_v37 = vunpack.i.h.bf16 %v3430_v21  ;;  %v3431_v4 = vunpack.i.l.bf16 %v3430_v21  ;;  %v281_v26 = vld [vmem:[#allocation2 + $0x2d0] ss:$2 sm:$0xff]  ;;  %v283_v29 = vld [vmem:[#allocation2 + $0x300] ss:$2 sm:$0xff] }
  0xe8   :  { %v3425_v24 = vpop.permute.xlu0 %3424  ;;  %v1147_v21 = vsel %vm5506_vm8, %v1130_v12, %v3422_v59 }
  0xe9   :  { %v3427_v46 = vunpack.i.h.bf16 %v3425_v24  ;;  %v3426_v30 = vunpack.i.l.bf16 %v3425_v24  ;;  %v1163_v13 = vsel %vm1152_vm9, %v1146_v19, %v3431_v4  ;;  %v1164_v14 = vsel %vm1152_vm9, %v1147_v21, %v3432_v37 }
  0xea   :  { %v4545_v56 = vpop.permute.xlu1 %3439 }
  0xeb   :  { %v1161_v58 = vsel %vm1152_vm9, %v1144_v38, %v3426_v30  ;;  %v1162_v39 = vsel %vm1152_vm9, %v1145_v49, %v3427_v46  ;;  %v3442_v50 = vunpack.i.h.bf16 %v4545_v56  ;;  %v3441_v40 = vunpack.i.l.bf16 %v4545_v56  ;;  %v277_v38 = vld [vmem:[#allocation2 + $0x270] ss:$2 sm:$0xff]  ;;  %v279_v49 = vld [vmem:[#allocation2 + $0x2a0] ss:$2 sm:$0xff] }
  0xec   :  { %v3435_v61 = vpop.permute.xlu0 %3434 }
  0xed   :  { %v3437_v31 = vunpack.i.h.bf16 %v3435_v61  ;;  %v3436_v63 = vunpack.i.l.bf16 %v3435_v61  ;;  %v1064_v56 = vsel %vm44_vm0, %v279_v49, %v3442_v50 }
  0xee   :  { %v3450_v9 = vpop.permute.xlu1 %3449 }
  0xef   :  { %v1178_v8 = vsel %vm5505_vm10, %v1161_v58, %v3436_v63  ;;  %v1179_v62 = vsel %vm5505_vm10, %v1162_v39, %v3437_v31  ;;  %v3452_v47 = vunpack.i.h.bf16 %v3450_v9  ;;  %v3451_v48 = vunpack.i.l.bf16 %v3450_v9 }
  0xf0   :  { %v1190_v15 = vpack.c.bf16 %v1179_v62, %v1178_v8  ;;  %v3445_v16 = vpop.permute.xlu0 %3444  ;;  %v1063_v62 = vsel %vm44_vm0, %v277_v38, %v3441_v40 }
  0xf1   :  { %v3447_v22 = vunpack.i.h.bf16 %v3445_v16  ;;  %v3446_v23 = vunpack.i.l.bf16 %v3445_v16  ;;  %v1066_v39 = vsel %vm44_vm0, %v283_v29, %v3452_v47  ;;  %v1065_v7 = vsel %vm44_vm0, %v281_v26, %v3451_v48 }
  0xf2   :  { %3131 = vmatprep.mubr.msk.bf16.mxu0 %vm1221_vm11, %v1190_v15  ;;  %v3460_v28 = vpop.permute.xlu1 %3459 }
  0xf3   :  { %v1181_v24 = vsel %vm5505_vm10, %v1164_v14, %v3447_v22  ;;  %v1180_v27 = vsel %vm5505_vm10, %v1163_v13, %v3446_v23  ;;  %v3462_v59 = vunpack.i.h.bf16 %v3460_v28  ;;  %v3461_v60 = vunpack.i.l.bf16 %v3460_v28 }
  0xf4   :  { %v1191_v33 = vpack.c.bf16 %v1181_v24, %v1180_v27  ;;  %v3455_v34 = vpop.permute.xlu0 %3454 }
  0xf5   :  { %v3457_v31 = vunpack.i.h.bf16 %v3455_v34  ;;  %v3456_v63 = vunpack.i.l.bf16 %v3455_v34  ;;  %v1082_v9 = vsel %vm1067_vm3, %v1065_v7, %v3461_v60  ;;  %v1083_v11 = vsel %vm1067_vm3, %v1066_v39, %v3462_v59 }
  0xf6   :  { %3132 = vmatmul.mubr.msk.bf16.gmra.mxu0 %vm1221_vm11, %v1191_v33  ;;  %v3470_v25 = vpop.permute.xlu1 %3469 }
  0xf7   :  { %v3472_v4 = vunpack.i.h.bf16 %v3470_v25  ;;  %v3471_v58 = vunpack.i.l.bf16 %v3470_v25  ;;  %v1081_v15 = vsel %vm1067_vm3, %v1064_v56, %v3457_v31  ;;  %v1080_v16 = vsel %vm1067_vm3, %v1063_v62, %v3456_v63 }
  0xf8   :  { %v3465_v32 = vpop.permute.xlu0 %3464 }
  0xf9   :  { %v3467_v42 = vunpack.i.h.bf16 %v3465_v32  ;;  %v3466_v8 = vunpack.i.l.bf16 %v3465_v32  ;;  %v1099_v23 = vsel %vm1084_vm5, %v1082_v9, %v3471_v58  ;;  %v1100_v13 = vsel %vm1084_vm5, %v1083_v11, %v3472_v4 }
  0xfa   :  { %v3480_v46 = vpop.permute.xlu1 %3479 }
  0xfb   :  { %v3482_v19 = vunpack.i.h.bf16 %v3480_v46  ;;  %v3481_v21 = vunpack.i.l.bf16 %v3480_v46  ;;  %v1097_v27 = vsel %vm1084_vm5, %v1080_v16, %v3466_v8  ;;  %v1098_v28 = vsel %vm1084_vm5, %v1081_v15, %v3467_v42 }
  0xfc   :  { %v3475_v30 = vpop.permute.xlu0 %3474 }
  0xfd   :  { %v3477_v14 = vunpack.i.h.bf16 %v3475_v30  ;;  %v3476_v24 = vunpack.i.l.bf16 %v3475_v30  ;;  %v1116_v46 = vsel %vm1101_vm6, %v1099_v23, %v3481_v21  ;;  %v1117_v40 = vsel %vm1101_vm6, %v1100_v13, %v3482_v19 }
  0xfe   :  { %v3490_v61 = vpop.permute.xlu1 %3489 }
  0xff   :  { %v3492_v33 = vunpack.i.h.bf16 %v3490_v61  ;;  %v3491_v34 = vunpack.i.l.bf16 %v3490_v61  ;;  %v1114_v30 = vsel %vm1101_vm6, %v1097_v27, %v3476_v24  ;;  %v1115_v60 = vsel %vm1101_vm6, %v1098_v28, %v3477_v14 }
 0x100   :  { %v3485_v37 = vpop.permute.xlu0 %3484 }
 0x101   :  { %v3487_v25 = vunpack.i.h.bf16 %v3485_v37  ;;  %v3486_v32 = vunpack.i.l.bf16 %v3485_v37  ;;  %v1133_v61 = vsel %vm1118_vm7, %v1116_v46, %v3491_v34  ;;  %v1134_v31 = vsel %vm1118_vm7, %v1117_v40, %v3492_v33 }
 0x102   :  { %v3500_v12 = vpop.permute.xlu1 %3499 }
 0x103   :  { %v3502_v47 = vunpack.i.h.bf16 %v3500_v12  ;;  %v3501_v48 = vunpack.i.l.bf16 %v3500_v12  ;;  %v1131_v4 = vsel %vm1118_vm7, %v1114_v30, %v3486_v32  ;;  %v1132_v58 = vsel %vm1118_vm7, %v1115_v60, %v3487_v25 }
 0x104   :  { %v3495_v22 = vpop.permute.xlu0 %3494 }
 0x105   :  { %v3497_v26 = vunpack.i.h.bf16 %v3495_v22  ;;  %v3496_v29 = vunpack.i.l.bf16 %v3495_v22  ;;  %v1150_v39 = vsel %vm5506_vm8, %v1133_v61, %v3501_v48  ;;  %v1151_v7 = vsel %vm5506_vm8, %v1134_v31, %v3502_v47  ;;  %v4610_v48 = vld [vmem:[%s5494_s2] ss:$0 sm:$0xff]  ;;  %s3891_s2 = smov 64  }
 0x106   :  { %v3510_v50 = vpop.permute.xlu1 %3509 }
 0x107   :  { %v3512_v38 = vunpack.i.h.bf16 %v3510_v50  ;;  %v3511_v49 = vunpack.i.l.bf16 %v3510_v50  ;;  %v1148_v8 = vsel %vm5506_vm8, %v1131_v4, %v3496_v29  ;;  %v1149_v56 = vsel %vm5506_vm8, %v1132_v58, %v3497_v26 }
 0x108   :  { %v3505_v59 = vpop.permute.xlu0 %3504 }
 0x109   :  { %v3507_v63 = vunpack.i.h.bf16 %v3505_v59  ;;  %v3506_v37 = vunpack.i.l.bf16 %v3505_v59  ;;  %v1167_v12 = vsel %vm1152_vm9, %v1150_v39, %v3511_v49  ;;  %v1168_v15 = vsel %vm1152_vm9, %v1151_v7, %v3512_v38 }
 0x10a   :  { %v3520_v42 = vpop.permute.xlu1 %3519 }
 0x10b   :  { %v3522_v62 = vunpack.i.h.bf16 %v3520_v42  ;;  %v3521_v9 = vunpack.i.l.bf16 %v3520_v42  ;;  %v1165_v21 = vsel %vm1152_vm9, %v1148_v8, %v3506_v37  ;;  %v1166_v22 = vsel %vm1152_vm9, %v1149_v56, %v3507_v63 }
 0x10c   :  { %v3515_v11 = vpop.permute.xlu0 %3514 }
 0x10d   :  { %v3517_v16 = vunpack.i.h.bf16 %v3515_v11  ;;  %v3516_v19 = vunpack.i.l.bf16 %v3515_v11  ;;  %v1184_v23 = vsel %vm5505_vm10, %v1167_v12, %v3521_v9  ;;  %v1185_v13 = vsel %vm5505_vm10, %v1168_v15, %v3522_v62 }
 0x10e   :  { %v1193_v14 = vpack.c.bf16 %v1185_v13, %v1184_v23 }
 0x10f   :  { %v1182_v24 = vsel %vm5505_vm10, %v1165_v21, %v3516_v19  ;;  %v1183_v27 = vsel %vm5505_vm10, %v1166_v22, %v3517_v16 }
 0x110   :  { %v1192_v28 = vpack.c.bf16 %v1183_v27, %v1182_v24 }
 0x112   :  { %3135 = vmatprep.mubr.msk.bf16.mxu0 %vm1221_vm11, %v1192_v28 }
 0x113   :  { %3136 = vmatmul.mubr.msk.bf16.gmra.mxu0 %vm1221_vm11, %v1193_v14 }
 0x114   :  { %3141 = vmatprep.mubr.msk.bf16.mxu0 %vm44_vm0, %v1347_v45 }
 0x176   :  { %v3125_v33 = vpop.f32.mrf.mxu0 }
 0x177   :  { %v4621_v45 = vadd.f32 %v3125_v33, %v4610_v48 }
 0x178   :  { %v1284_v34 = vpop.f32.mrf.mxu0 }
 0x179   :  { %v4616_v40 = vadd.f32 %v4610_v48, %v1284_v34  ;;  %v1490_v60 = vsel %vm1067_vm3, %v4621_v45, 0.0 }
 0x17a   :  { %v3126_v25 = vpop.f32.mrf.mxu0 }
 0x17b   :  { %v1487_v26 = vsel %vm1067_vm3, %v4616_v40, 0.0  ;;  %v4630_v38 = vadd.f32 %v3126_v25, %v4610_v48 }
 0x17c   :  { %v1287_v32 = vpop.f32.mrf.mxu0 }
 0x17d   :  { %v4613_v46 = vadd.f32 %v4610_v48, %v1287_v32  ;;  %v1492_v37 = vsel %vm1067_vm3, %v4630_v38, 0.0 }
 0x17f   :  { %v1488_v44 = vsel %vm1067_vm3, %v4613_v46, 0.0 }
 0x180   :  { %v1489_v29 = vadd.f32 %v1488_v44, %v1487_v26 }
 0x182   :  { %v1491_v61 = vadd.f32 %v1490_v60, %v1489_v29 }
 0x184   :  { %v1493_v58 = vadd.f32 %v1492_v37, %v1491_v61 }
 0x196   :  { %v3129_v47 = vpop.f32.mrf.mxu0 }
 0x197   :  { %v4645_v8 = vadd.f32 %v3129_v47, %v4610_v48 }
 0x198   :  { %v1300_v50 = vpop.f32.mrf.mxu0 }
 0x199   :  { %v4633_v49 = vadd.f32 %v4610_v48, %v1300_v50  ;;  %v1498_v9 = vsel %vm1067_vm3, %v4645_v8, 0.0 }
 0x19a   :  { %v3130_v43 = vpop.f32.mrf.mxu0 }
 0x19b   :  { %v1494_v4 = vsel %vm1067_vm3, %v4633_v49, 0.0  ;;  %v4650_v11 = vadd.f32 %v3130_v43, %v4610_v48 }
 0x19c   :  { %v1303_v59 = vpop.f32.mrf.mxu0  ;;  %v1495_v7 = vadd.f32 %v1494_v4, %v1493_v58 }
 0x19d   :  { %v4636_v31 = vadd.f32 %v4610_v48, %v1303_v59  ;;  %v1500_v19 = vsel %vm1067_vm3, %v4650_v11, 0.0 }
 0x19f   :  { %v1496_v39 = vsel %vm1067_vm3, %v4636_v31, 0.0 }
 0x1a0   :  { %v1497_v56 = vadd.f32 %v1496_v39, %v1495_v7 }
 0x1a2   :  { %v1499_v15 = vadd.f32 %v1498_v9, %v1497_v56 }
 0x1a4   :  { %v1501_v22 = vadd.f32 %v1500_v19, %v1499_v15 }
 0x1b6   :  { %v4625_v30 = vpop.f32.mrf.mxu0 }
 0x1b7   :  { %v1325_v14 = vadd.f32 %v4625_v30, %v4610_v48 }
 0x1b8   :  { %v1316_v63 = vpop.f32.mrf.mxu0 }
 0x1b9   :  { %v4653_v12 = vadd.f32 %v4610_v48, %v1316_v63  ;;  %v1506_v28 = vsel %vm1067_vm3, %v1325_v14, 0.0 }
 0x1ba   :  { %v3134_v42 = vpop.f32.mrf.mxu0 }
 0x1bb   :  { %v1502_v21 = vsel %vm1067_vm3, %v4653_v12, 0.0  ;;  %v1328_v33 = vadd.f32 %v3134_v42, %v4610_v48 }
 0x1bc   :  { %v1319_v62 = vpop.f32.mrf.mxu0  ;;  %v1503_v13 = vadd.f32 %v1502_v21, %v1501_v22 }
 0x1bd   :  { %v4656_v16 = vadd.f32 %v4610_v48, %v1319_v62  ;;  %v1508_v50 = vsel %vm1067_vm3, %v1328_v33, 0.0 }
 0x1bf   :  { %v1504_v23 = vsel %vm1067_vm3, %v4656_v16, 0.0 }
 0x1c0   :  { %v1505_v24 = vadd.f32 %v1504_v23, %v1503_v13 }
 0x1c2   :  { %v1507_v34 = vadd.f32 %v1506_v28, %v1505_v24 }
 0x1c4   :  { %v1509_v44 = vadd.f32 %v1508_v50, %v1507_v34 }
 0x1d3   :  { %v3137_v27 = vpop.f32.mrf.mxu0 }
 0x1d4   :  { %v1341_v26 = vadd.f32 %v3137_v27, %v4610_v48 }
 0x1d5   :  { %v1332_v25 = vpop.f32.mrf.mxu0 }
 0x1d6   :  { %v1333_v32 = vadd.f32 %v4610_v48, %v1332_v25  ;;  %v1514_v63 = vsel %vm1067_vm3, %v1341_v26, 0.0 }
 0x1d7   :  { %v3138_v47 = vpop.f32.mrf.mxu0 }
 0x1d8   :  { %v1510_v43 = vsel %vm1067_vm3, %v1333_v32, 0.0  ;;  %v4742_v30 = vadd.f32 %v3138_v47, %v4610_v48 }
 0x1d9   :  { %v1335_v2 = vpop.f32.mrf.mxu0  ;;  %v1511_v59 = vadd.f32 %v1510_v43, %v1509_v44 }
 0x1da   :  { %v1336_v29 = vadd.f32 %v4610_v48, %v1335_v2  ;;  %v1516_v4 = vsel %vm1067_vm3, %v4742_v30, 0.0 }
 0x1dc   :  { %v1512_v60 = vsel %vm1067_vm3, %v1336_v29, 0.0 }
 0x1dd   :  { %v1513_v61 = vadd.f32 %v1512_v60, %v1511_v59 }
 0x1df   :  { %v1515_v37 = vadd.f32 %v1514_v63, %v1513_v61 }
 0x1e1   :  { %v1517_v58 = vadd.f32 %v1516_v4, %v1515_v37 }
 0x1e3   :  { %v1518_v39 = vrot.slane %v1517_v58, 4 }
 0x1e5   :  { %v1519_v7 = vadd.f32 %v1518_v39, %v1517_v58 }
 0x1e7   :  { %v1520_v42 = vrot.slane %v1519_v7, 2 }
 0x1e9   :  { %v1521_v56 = vadd.f32 %v1520_v42, %v1519_v7 }
 0x1eb   :  { %v1522_v62 = vrot.slane %v1521_v56, 1 }
 0x1ed   :  { %v1523_v9 = vadd.f32 %v1522_v62, %v1521_v56 }
 0x1ef   :  { %v1525_v15 = vmul.f32 0.0078125, %v1523_v9 }
 0x1f1   :  { %v4749_v48 = vsub.f32 %v4616_v40, %v1525_v15  ;;  %v4752_v19 = vsub.f32 %v4613_v46, %v1525_v15  ;;  %v4755_v21 = vsub.f32 %v4621_v45, %v1525_v15  ;;  %v4758_v22 = vsub.f32 %v4630_v38, %v1525_v15 }
 0x1f2   :  { %v4765_v24 = vsub.f32 %v4633_v49, %v1525_v15  ;;  %v4770_v46 = vsub.f32 %v4636_v31, %v1525_v15  ;;  %v4777_v34 = vsub.f32 %v4645_v8, %v1525_v15  ;;  %v4783_v31 = vsub.f32 %v4650_v11, %v1525_v15 }
 0x1f3   :  { %v1542_v23 = vmul.f32 %v4749_v48, %v4749_v48  ;;  %v1543_v13 = vmul.f32 %v4752_v19, %v4752_v19  ;;  %v1544_v40 = vmul.f32 %v4755_v21, %v4755_v21  ;;  %v1545_v45 = vmul.f32 %v4758_v22, %v4758_v22 }
 0x1f4   :  { %v1546_v49 = vmul.f32 %v4765_v24, %v4765_v24  ;;  %v1547_v50 = vmul.f32 %v4770_v46, %v4770_v46  ;;  %v4789_v2 = vsub.f32 %v4653_v12, %v1525_v15  ;;  %v1548_v8 = vmul.f32 %v4777_v34, %v4777_v34 }
 0x1f5   :  { %v1558_v38 = vsel %vm1067_vm3, %v1542_v23, 0.0  ;;  %v1559_v27 = vsel %vm1067_vm3, %v1543_v13, 0.0  ;;  %v1561_v25 = vsel %vm1067_vm3, %v1544_v40, 0.0  ;;  %v1563_v43 = vsel %vm1067_vm3, %v1545_v45, 0.0 }
 0x1f6   :  { %v1560_v28 = vadd.f32 %v1559_v27, %v1558_v38  ;;  %v1565_v59 = vsel %vm1067_vm3, %v1546_v49, 0.0  ;;  %v4795_v61 = vsub.f32 %v4656_v16, %v1525_v15  ;;  %v1549_v11 = vmul.f32 %v4783_v31, %v4783_v31 }
 0x1f7   :  { %v1567_v63 = vsel %vm1067_vm3, %v1547_v50, 0.0  ;;  %v1536_v4 = vsub.f32 %v1325_v14, %v1525_v15  ;;  %v1550_v12 = vmul.f32 %v4789_v2, %v4789_v2  ;;  %v1569_v58 = vsel %vm1067_vm3, %v1548_v8, 0.0 }
 0x1f8   :  { %v1562_v47 = vadd.f32 %v1561_v25, %v1560_v28  ;;  %v1537_v7 = vsub.f32 %v1328_v33, %v1525_v15  ;;  %v1551_v42 = vmul.f32 %v4795_v61, %v4795_v61  ;;  %v1571_v16 = vsel %vm1067_vm3, %v1549_v11, 0.0 }
 0x1f9   :  { %v1538_v62 = vsub.f32 %v1333_v32, %v1525_v15  ;;  %v1552_v9 = vmul.f32 %v1536_v4, %v1536_v4  ;;  %v1573_v23 = vsel %vm1067_vm3, %v1550_v12, 0.0  ;;  %v1539_v40 = vsub.f32 %v1336_v29, %v1525_v15 }
 0x1fa   :  { %v1564_v44 = vadd.f32 %v1563_v43, %v1562_v47  ;;  %v1553_v14 = vmul.f32 %v1537_v7, %v1537_v7  ;;  %v1575_v45 = vsel %vm1067_vm3, %v1551_v42, 0.0  ;;  %v1540_v27 = vsub.f32 %v1341_v26, %v1525_v15 }
 0x1fb   :  { %v1554_v28 = vmul.f32 %v1538_v62, %v1538_v62  ;;  %v1577_v33 = vsel %vm1067_vm3, %v1552_v9, 0.0  ;;  %v1541_v25 = vsub.f32 %v4742_v30, %v1525_v15  ;;  %v1555_v47 = vmul.f32 %v1539_v40, %v1539_v40 }
 0x1fc   :  { %v1566_v60 = vadd.f32 %v1565_v59, %v1564_v44  ;;  %v1579_v50 = vsel %vm1067_vm3, %v1553_v14, 0.0  ;;  %v1556_v43 = vmul.f32 %v1540_v27, %v1540_v27  ;;  %v1600_v9 = vlaneseq }
 0x1fd   :  { %v1581_v44 = vsel %vm1067_vm3, %v1554_v28, 0.0  ;;  %v1557_v29 = vmul.f32 %v1541_v25, %v1541_v25  ;;  %v1583_v59 = vsel %vm1067_vm3, %v1555_v47, 0.0 }
 0x1fe   :  { %v1568_v37 = vadd.f32 %v1567_v63, %v1566_v60  ;;  %v1585_v26 = vsel %vm1067_vm3, %v1556_v43, 0.0 }
 0x1ff   :  { %v1587_v63 = vsel %vm1067_vm3, %v1557_v29, 0.0 }
 0x200   :  { %v1570_v39 = vadd.f32 %v1569_v58, %v1568_v37 }
 0x202   :  { %v1572_v56 = vadd.f32 %v1571_v16, %v1570_v39 }
 0x204   :  { %v1574_v13 = vadd.f32 %v1573_v23, %v1572_v56  ;;  %v4815_v23 = vshrl.u32 %v1600_v9, 7 }
 0x206   :  { %v1576_v38 = vadd.f32 %v1575_v45, %v1574_v13  ;;  %v1598_v13 = vld [vmem:[%s5495_s3] sm:$0x1]  ;;  %v1602_v14 = vsub.s32 0, %v4815_v23 }
 0x208   :  { %v1578_v49 = vadd.f32 %v1577_v33, %v1576_v38  ;;  %v4826_v33 = vstv %s5497_s5 }
 0x20a   :  { %v1580_v32 = vadd.f32 %v1579_v50, %v1578_v49 }
 0x20c   :  { %v1582_v8 = vadd.f32 %v1581_v44, %v1580_v32 }
 0x20e   :  { %v1584_v60 = vadd.f32 %v1583_v59, %v1582_v8  ;;  %v3068_v59 = vld [vmem:[%s5496_s4] ss:$0 sm:$0xff] }
 0x210   :  { %v1586_v11 = vadd.f32 %v1585_v26, %v1584_v60 }
 0x212   :  { %v1588_v37 = vadd.f32 %v1587_v63, %v1586_v11 }
 0x214   :  { %v1589_v12 = vrot.slane %v1588_v37, 4 }
 0x216   :  { %v1590_v30 = vadd.f32 %v1589_v12, %v1588_v37 }
 0x218   :  { %v1591_v15 = vrot.slane %v1590_v30, 2 }
 0x21a   :  { %v1592_v58 = vadd.f32 %v1591_v15, %v1590_v30 }
 0x21c   :  { %v1593_v39 = vrot.slane %v1592_v58, 1 }
 0x21e   :  { %v1594_v42 = vadd.f32 %v1593_v39, %v1592_v58 }
 0x220   :  { %v1595_v16 = vmul.f32 0.0078125, %v1594_v42 }
 0x222   :  { %v1596_v56 = vadd.f32 1e-05, %v1595_v16 }
 0x224   :  { %3851 = vrsqrt.f32 %v1596_v56 }
 0x231   :  { %v3852_v45 = vpop.eup %3851 }
 0x232   :  { %v1599_v38 = vmul.f32 %v3852_v45, %v1598_v13 }
 0x234   :  { %v1603_v28 = vrot.slane %v1599_v38, %v1602_v14 }
 0x236   :  { %v1604_v49 = vmul.f32 %v1603_v28, %v4749_v48  ;;  %v1605_v47 = vmul.f32 %v1603_v28, %v4752_v19  ;;  %v1606_v50 = vmul.f32 %v1603_v28, %v4755_v21  ;;  %v1607_v32 = vmul.f32 %v1603_v28, %v4758_v22 }
 0x237   :  { %v1608_v43 = vmul.f32 %v1603_v28, %v4765_v24  ;;  %v1609_v44 = vmul.f32 %v1603_v28, %v4770_v46  ;;  %v1610_v8 = vmul.f32 %v1603_v28, %v4777_v34  ;;  %v1611_v29 = vmul.f32 %v1603_v28, %v4783_v31 }
 0x238   :  { %v1612_v48 = vmul.f32 %v1603_v28, %v4789_v2  ;;  %v1613_v19 = vmul.f32 %v1603_v28, %v4795_v61  ;;  %v1614_v60 = vmul.f32 %v1603_v28, %v1536_v4  ;;  %v1615_v21 = vmul.f32 %v1603_v28, %v1537_v7 }
 0x239   :  { %v1616_v26 = vmul.f32 %v1603_v28, %v1538_v62  ;;  %v1617_v22 = vmul.f32 %v1603_v28, %v1539_v40  ;;  %v1618_v11 = vmul.f32 %v1603_v28, %v1540_v27  ;;  %v1619_v24 = vmul.f32 %v1603_v28, %v1541_v25 }
 0x23a   :  { %v4841_v63 = vadd.f32 %v3068_v59, %v1604_v49  ;;  %v4843_v46 = vadd.f32 %v3068_v59, %v1605_v47  ;;  %v4845_v34 = vadd.f32 %v3068_v59, %v1606_v50  ;;  %v4847_v31 = vadd.f32 %v3068_v59, %v1607_v32 }
 0x23b   :  { %v4849_v37 = vadd.f32 %v3068_v59, %v1608_v43  ;;  %v1632_v12 = vadd.f32 %v3068_v59, %v1609_v44  ;;  %v1633_v2 = vadd.f32 %v3068_v59, %v1610_v8  ;;  %v1634_v30 = vadd.f32 %v3068_v59, %v1611_v29 }
 0x23c   :  { %v1635_v61 = vadd.f32 %v3068_v59, %v1612_v48  ;;  %v1636_v4 = vadd.f32 %v3068_v59, %v1613_v19  ;;  %v1637_v7 = vadd.f32 %v3068_v59, %v1614_v60  ;;  %v1638_v62 = vadd.f32 %v3068_v59, %v1615_v21 }
 0x23d   :  { %v1639_v40 = vadd.f32 %v3068_v59, %v1616_v26  ;;  %v1640_v27 = vadd.f32 %v3068_v59, %v1617_v22  ;;  %v1641_v25 = vadd.f32 %v3068_v59, %v1618_v11  ;;  %v1642_v15 = vadd.f32 %v3068_v59, %v1619_v24 }
 0x23e   :  { %vm1648_vm14 = vcmp.ge.f32.partialorder %v4849_v37, 0.0  ;;  %vm1649_vm15 = vcmp.ge.f32.partialorder %v1632_v12, 0.0  ;;  %vm1650_vm1 = vcmp.ge.f32.partialorder %v1633_v2, 0.0  ;;  %vm1651_vm2 = vcmp.ge.f32.partialorder %v1634_v30, 0.0 }
 0x23f   :  { %vm1652_vm5 = vcmp.ge.f32.partialorder %v1635_v61, 0.0  ;;  %vm1653_vm7 = vcmp.ge.f32.partialorder %v1636_v4, 0.0  ;;  %vm1654_vm9 = vcmp.ge.f32.partialorder %v1637_v7, 0.0  ;;  %vm1655_vm11 = vcmp.ge.f32.partialorder %v1638_v62, 0.0 }
 0x240   :  { %vm1656_vm12 = vcmp.ge.f32.partialorder %v1639_v40, 0.0  ;;  %vm1657_vm13 = vcmp.ge.f32.partialorder %v1640_v27, 0.0  ;;  %vm1658_vm10 = vcmp.ge.f32.partialorder %v1641_v25, 0.0  ;;  %vm1659_vm8 = vcmp.ge.f32.partialorder %v1642_v15, 0.0 }
 0x241   :  { %v1664_v58 = vmul.f32 %v4826_v33, %v4847_v31  ;;  %v1665_v39 = vmul.f32 %v4826_v33, %v4849_v37  ;;  %v1666_v42 = vmul.f32 %v4826_v33, %v1632_v12  ;;  %v1667_v16 = vmul.f32 %v4826_v33, %v1633_v2 }
 0x242   :  { %v1668_v56 = vmul.f32 %v4826_v33, %v1634_v30  ;;  %v1669_v9 = vmul.f32 %v4826_v33, %v1635_v61  ;;  %v1670_v13 = vmul.f32 %v4826_v33, %v1636_v4  ;;  %v1671_v45 = vmul.f32 %v4826_v33, %v1637_v7 }
 0x243   :  { %v1672_v38 = vmul.f32 %v4826_v33, %v1638_v62  ;;  %v1673_v28 = vmul.f32 %v4826_v33, %v1639_v40  ;;  %v1674_v49 = vmul.f32 %v4826_v33, %v1640_v27  ;;  %v1675_v47 = vmul.f32 %v4826_v33, %v1641_v25 }
 0x244   :  { %v1676_v50 = vmul.f32 %v4826_v33, %v1642_v15  ;;  %v1682_v32 = vsel %vm1649_vm15, %v1632_v12, %v1666_v42  ;;  %v1683_v43 = vsel %vm1650_vm1, %v1633_v2, %v1667_v16  ;;  %v1684_v44 = vsel %vm1651_vm2, %v1634_v30, %v1668_v56  ;;  %v3855_v42 = vld [vmem:[#allocation2 + $0xd9] ss:$2 sm:$0xff]  ;;  %v3856_v16 = vld [vmem:[#allocation2 + $0x109] ss:$2 sm:$0xff] }
 0x245   :  { %v1685_v8 = vsel %vm1652_vm5, %v1635_v61, %v1669_v9  ;;  %v1686_v29 = vsel %vm1653_vm7, %v1636_v4, %v1670_v13  ;;  %v1687_v59 = vsel %vm1654_vm9, %v1637_v7, %v1671_v45  ;;  %v1688_v48 = vsel %vm1655_vm11, %v1638_v62, %v1672_v38  ;;  %1743 = vst.msk [vmem:[#allocation3 + $0x71] sm:$0xff] %vm1067_vm3, %v1683_v43  ;;  %v1769_v4 = vld [vmem:[#allocation3 + $0x1] sm:$0xff] }
 0x246   :  { %1744 = vst.msk [vmem:[#allocation3 + $0x81] sm:$0xff] %vm1067_vm3, %v1684_v44  ;;  %1742 = vst.msk [vmem:[#allocation3 + $0x61] sm:$0xff] %vm1067_vm3, %v1682_v32  ;;  %v1689_v19 = vsel %vm1656_vm12, %v1639_v40, %v1673_v28  ;;  %v1690_v60 = vsel %vm1657_vm13, %v1640_v27, %v1674_v49  ;;  %v1691_v21 = vsel %vm1658_vm10, %v1641_v25, %v1675_v47  ;;  %vm1645_vm10 = vcmp.ge.f32.partialorder %v4843_v46, 0.0  ;;  %v1785_v27 = vld [vmem:[#allocation3 + $0x2] sm:$0xff]  ;;  %v1355_v49 = vld [vmem:[%s5502_s10] sm:$0x3] }
 0x247   :  { %v1692_v26 = vsel %vm1659_vm8, %v1642_v15, %v1676_v50  ;;  %1745 = vst.msk [vmem:[#allocation3 + $0xb1] sm:$0xff] %vm1067_vm3, %v1685_v8  ;;  %1746 = vst.msk [vmem:[#allocation3 + $0xc1] sm:$0xff] %vm1067_vm3, %v1686_v29  ;;  %vm1646_vm8 = vcmp.ge.f32.partialorder %v4845_v34, 0.0  ;;  %v1662_v22 = vmul.f32 %v4826_v33, %v4843_v46  ;;  %v1663_v11 = vmul.f32 %v4826_v33, %v4845_v34  ;;  %v3846_v47 = vld [vmem:[%s5498_s6 + $0x20] ss:$0 sps:$4 sm:$0xff]   ;;  %v3847_v29 = vld [vmem:[%s5498_s6 + $0x18] sm:$0xff]  }
 0x248   :  { %1747 = vst.msk [vmem:[#allocation3 + $0xd1] sm:$0xff] %vm1067_vm3, %v1687_v59  ;;  %1748 = vst.msk [vmem:[#allocation3 + $0xe1] sm:$0xff] %vm1067_vm3, %v1688_v48  ;;  %vm1644_vm15 = vcmp.ge.f32.partialorder %v4841_v63, 0.0  ;;  %v1661_v24 = vmul.f32 %v4826_v33, %v4841_v63  ;;  %vm1647_vm1 = vcmp.ge.f32.partialorder %v4847_v31, 0.0  ;;  %v1681_v12 = vsel %vm1648_vm14, %v4849_v37, %v1665_v39  ;;  %3187 = vmatprep.subr.msk.bf16.mxu1 %vm1246_vm4, %v1355_v49 }
 0x249   :  { %1749 = vst.msk [vmem:[#allocation3 + $0xf1] sm:$0xff] %vm1067_vm3, %v1689_v19  ;;  %1750 = vst.msk [vmem:[#allocation3 + $0x101] sm:$0xff] %vm1067_vm3, %v1690_v60  ;;  %v1678_v2 = vsel %vm1645_vm10, %v4843_v46, %v1662_v22  ;;  %v1679_v30 = vsel %vm1646_vm8, %v4845_v34, %v1663_v11  ;;  %v1680_v61 = vsel %vm1647_vm1, %v4847_v31, %v1664_v58  ;;  %vm2618_vm14 = vcmask 1043456   ;;  %3186 = vmatprep.subr.msk.bf16.mxu0 %vm1246_vm4, %v1355_v49  ;;  %v3848_v60 = vld [vmem:[%s5498_s6 + $0x10] sm:$0xff]  }
 0x24a   :  { %1751 = vst.msk [vmem:[#allocation3 + $0x111] sm:$0xff] %vm1067_vm3, %v1691_v21  ;;  %1752 = vst.msk [vmem:[#allocation3 + $0x121] sm:$0xff] %vm1067_vm3, %v1692_v26  ;;  %v1677_v33 = vsel %vm1644_vm15, %v4841_v63, %v1661_v24  ;;  %v1349_v56 = vpack.c.bf16 %v3856_v16, %v3855_v42  ;;  %v1388_v50 = vsel %vm1246_vm4, %v1355_v49, 0  ;;  %v2620_v8 = vsel %vm2618_vm14, %v3846_v47, 0  ;;  %v1793_v42 = vld [vmem:[#allocation3 + $0xa2] sm:$0xff] }
 0x24b   :  { %1741 = vst.msk [vmem:[#allocation3 + $0x51] sm:$0xff] %vm1067_vm3, %v1681_v12  ;;  %1738 = vst.msk [vmem:[#allocation3 + $0x21] sm:$0xff] %vm1067_vm3, %v1678_v2  ;;  %3184 = vmatpush3.bf16.msra.mxu1 %v1388_v50  ;;  %3140 = vmatpush3.bf16.msra.mxu0 %v1388_v50  ;;  %vm2491_vm4 = vcmask 392192   ;;  %vm2508_vm2 = vcmask 457728   ;;  %vm2525_vm5 = vcmask 523264   ;;  %vm2593_vm7 = vcmask 588800  }
 0x24c   :  { %1739 = vst.msk [vmem:[#allocation3 + $0x31] sm:$0xff] %vm1067_vm3, %v1679_v30  ;;  %1740 = vst.msk [vmem:[#allocation3 + $0x41] sm:$0xff] %vm1067_vm3, %v1680_v61  ;;  %3145 = vmatprep.mubr.msk.bf16.mxu1 %vm44_vm0, %v1349_v56  ;;  %3188 = vmatprep.subr.msk.bf16.mxu1 %vm2618_vm14, %v3846_v47  ;;  %v1776_v1 = vld [vmem:[#allocation3 + $0x71] sm:$0xff]  ;;  %vm5507_vm9 = vcmask 195584   ;;  %vm5511_vm10 = vcmask 261120  }
 0x24d   :  { %1737 = vst.msk [vmem:[#allocation3 + $0x11] sm:$0xff] %vm1067_vm3, %v1677_v33  ;;  %v1775_v0 = vld [vmem:[#allocation3 + $0x61] sm:$0xff]  ;;  %v1792_v54 = vld [vmem:[#allocation3 + $0x72] sm:$0xff]  ;;  %vm5508_vm11 = vmmov %vm5507_vm9 }
 0x24e   :  { %3146 = vmatmul.mubr.msk.bf16.vlgmr.msra.gmra.mxu1 %vm44_vm0, %v1350_v20  ;;  %3142 = vmatmul.mubr.msk.bf16.vlgmr.msra.gmra.mxu0 %vm44_vm0, %v1348_v41  ;;  %v3850_v41 = vld [vmem:[%s5498_s6] sm:$0xff]   ;;  %v3608_v5 = vpack.i.bf16 %v1776_v1, %v1775_v0  ;;  %v1857_v30 = vld [vmem:[#allocation3 + $0x90] sm:$0xff]  ;;  %vm5509_vm12 = vmmov %vm5507_vm9 }
 0x24f   :  { %3158 = vmatpush3.bf16.msra.mxu1 %v2620_v8  ;;  %3149 = vmatprep.mubr.msk.bf16.mxu1 %vm44_vm0, %v1351_v10  ;;  %v1791_v10 = vld [vmem:[#allocation3 + $0x62] sm:$0xff]  ;;  %v1794_v16 = vld [vmem:[#allocation3 + $0xb2] sm:$0xff]  ;;  %vm5510_vm13 = vmmov %vm5507_vm9 }
 0x250   :  { %3159 = vmatprep.subr.bf16.mxu1 %v3847_v29  ;;  %v3618_v55 = vpack.i.bf16 %v1792_v54, %v1791_v10  ;;  %v1808_v21 = vld [vmem:[#allocation3 + $0x80] sm:$0xff]  ;;  %v5031_v49 = vld [vmem:[#allocation3 + $0xb0] sm:$0xff]  ;;  %vm5512_vm8 = vmmov %vm5511_vm10 }
 0x251   :  { %v5004_v26 = vld [vmem:[#allocation3 + $0x60] sm:$0xff]  ;;  %v3658_v61 = vpack.i.bf16 %v1857_v30, %v1808_v21  ;;  %v1865_v30 = vld [vmem:[#allocation3 + $0x130] sm:$0xff]  ;;  %vm5513_vm15 = vmmov %vm5512_vm8 }
 0x252   :  { %v1771_v37 = vld [vmem:[#allocation3 + $0x21] sm:$0xff]  ;;  %v4958_v19 = vld [vmem:[#allocation3 + $0x50] sm:$0xff]  ;;  %vm5514_vm1 = vmmov %vm5512_vm8 }
 0x253   :  { %v1772_v7 = vld [vmem:[#allocation3 + $0x31] sm:$0xff]  ;;  %v1787_v31 = vld [vmem:[#allocation3 + $0x22] sm:$0xff]  ;;  %3160 = vmatpush3.bf16.msra.mxu1 %v3847_v29  ;;  %v3623_v52 = vpack.i.bf16 %v5004_v26, %v4958_v19  ;;  %vm5515_vm14 = vmmov %vm5507_vm9 }
 0x254   :  { %v4911_v46 = vpack.i.bf16 %v1772_v7, %v1771_v37  ;;  %v1770_v34 = vld [vmem:[#allocation3 + $0x11] sm:$0xff]  ;;  %v4920_v39 = vld [vmem:[#allocation3 + $0x40] sm:$0xff]  ;;  %3161 = vmatprep.subr.bf16.mxu1 %v3848_v60 }
 0x255   :  { %v3523_v62 = vpack.i.bf16 %v1770_v34, %v1769_v4  ;;  %v1788_v40 = vld [vmem:[#allocation3 + $0x32] sm:$0xff]  ;;  %v4926_v13 = vld [vmem:[#allocation3 + $0x20] sm:$0xff]  ;;  %v3553_v43 = vpack.i.bf16 %v1771_v37, %v1770_v34  ;;  %v3578_v17 = vpack.i.bf16 %v4958_v19, %v4920_v39 }
 0x256   :  { %3529 = vrot.lane.b32.xlu1 %v4911_v46, %s3880_s13  ;;  %v1786_v25 = vld [vmem:[#allocation3 + $0x12] sm:$0xff]  ;;  %v4916_v63 = vpack.i.bf16 %v1788_v40, %v1787_v31  ;;  %v1820_v28 = vld [vmem:[#allocation3 + $0x41] sm:$0xff]  ;;  %3150 = vmatmul.mubr.msk.bf16.gmra.mxu1 %vm44_vm0, %v1352_v3 }
 0x257   :  { %3524 = vrot.lane.b32.xlu0 %v3523_v62, %s3880_s13  ;;  %v3533_v15 = vpack.i.bf16 %v1786_v25, %v1785_v27  ;;  %v4918_v58 = vld [vmem:[#allocation3 + $0x30] sm:$0xff]  ;;  %v3558_v32 = vpack.i.bf16 %v1820_v28, %v1772_v7  ;;  %v1836_v44 = vld [vmem:[#allocation3 + $0x42] sm:$0xff]  ;;  %v3563_v48 = vpack.i.bf16 %v1787_v31, %v1786_v25  ;;  %3162 = vmatpush3.bf16.msra.mxu1 %v3848_v60 }
 0x258   :  { %v4924_v9 = vld [vmem:[#allocation3 + $0x10] sm:$0xff]  ;;  %v3548_v45 = vpack.i.bf16 %v4920_v39, %v4918_v58  ;;  %v3568_v59 = vpack.i.bf16 %v1836_v44, %v1788_v40  ;;  %v3573_v18 = vpack.i.bf16 %v4918_v58, %v4926_v13  ;;  %3153 = vmatprep.mubr.msk.bf16.mxu1 %vm44_vm0, %v1353_v57  ;;  %3163 = vmatprep.subr.bf16.mxu1 %v3849_v35  ;;  %v1840_v24 = vld [vmem:[#allocation3 + $0x82] sm:$0xff] }
 0x259   :  { %v3543_v38 = vpack.i.bf16 %v4926_v13, %v4924_v9  ;;  %v1869_v20 = vld [vmem:[#allocation3 + $0x51] sm:$0xff]  ;;  %v3648_v12 = vpack.i.bf16 %v1840_v24, %v1792_v54  ;;  %v1777_v7 = vld [vmem:[#allocation3 + $0xa1] sm:$0xff] }
 0x25a   :  { %3539 = vrot.lane.b32.xlu1 %v4916_v63, %s3883_s26  ;;  %v3588_v36 = vpack.i.bf16 %v1869_v20, %v1820_v28  ;;  %v1885_v3 = vld [vmem:[#allocation3 + $0x52] sm:$0xff]  ;;  %v3633_v11 = vpack.i.bf16 %v1775_v0, %v1869_v20  ;;  %v1779_v62 = vld [vmem:[#allocation3 + $0xc1] sm:$0xff] }
 0x25b   :  { %3534 = vrot.lane.b32.xlu0 %v3533_v15, %s3883_s26  ;;  %3164 = vmatpush3.bf16.msra.mxu1 %v3849_v35  ;;  %v3603_v6 = vpack.i.bf16 %v1885_v3, %v1836_v44  ;;  %v5001_v57 = vld [vmem:[#allocation3 + $0x70] sm:$0xff]  ;;  %v3643_v2 = vpack.i.bf16 %v1791_v10, %v1885_v3  ;;  %v5028_v28 = vld [vmem:[#allocation3 + $0xe0] sm:$0xff] }
 0x25c   :  { %3165 = vmatprep.subr.bf16.mxu1 %v3850_v41  ;;  %v3628_v51 = vpack.i.bf16 %v1808_v21, %v5001_v57  ;;  %v3653_v33 = vpack.i.bf16 %v5001_v57, %v5004_v26  ;;  %v1873_v4 = vld [vmem:[#allocation3 + $0x91] sm:$0xff]  ;;  %v5033_v47 = vld [vmem:[#allocation3 + $0xc0] sm:$0xff] }
 0x25d   :  { %v1780_v31 = vld [vmem:[#allocation3 + $0xd1] sm:$0xff]  ;;  %v1844_v29 = vld [vmem:[#allocation3 + $0xe2] sm:$0xff] }
 0x25e   :  { %3549 = vrot.lane.b32.xlu1 %v3548_v45, %s3885_s17  ;;  %3154 = vmatmul.mubr.msk.bf16.gmra.mxu1 %vm44_vm0, %v1354_v53  ;;  %v1824_v53 = vld [vmem:[#allocation3 + $0x81] sm:$0xff]  ;;  %v1889_v40 = vld [vmem:[#allocation3 + $0x92] sm:$0xff]  ;;  %v3688_v27 = vpack.i.bf16 %v1780_v31, %v1779_v62  ;;  %v3693_v45 = vpack.i.bf16 %v1794_v16, %v1793_v42  ;;  %vm2474_vm0 = vcmask 326656  }
 0x25f   :  { %3544 = vrot.lane.b32.xlu0 %v3543_v38, %s3885_s17  ;;  %3166 = vmatpush3.bf16.msra.mxu1 %v3850_v41  ;;  %v3638_v22 = vpack.i.bf16 %v1824_v53, %v1776_v1  ;;  %v3668_v37 = vpack.i.bf16 %v1873_v4, %v1824_v53  ;;  %v3683_v25 = vpack.i.bf16 %v1889_v40, %v1840_v24  ;;  %v1796_v15 = vld [vmem:[#allocation3 + $0xd2] sm:$0xff]  ;;  %v5063_v21 = vld [vmem:[#allocation3 + $0x100] sm:$0xff] }
 0x260   :  { %v5026_v38 = vld [vmem:[#allocation3 + $0xd0] sm:$0xff]  ;;  %v1832_v53 = vld [vmem:[#allocation3 + $0x121] sm:$0xff] }
 0x261   :  { %v3708_v50 = vpack.i.bf16 %v5028_v28, %v5026_v38  ;;  %v5044_v60 = vld [vmem:[#allocation3 + $0xf0] sm:$0xff]  ;;  %v1848_v24 = vld [vmem:[#allocation3 + $0x122] sm:$0xff] }
 0x262   :  { %3559 = vrot.lane.b32.xlu1 %v3558_v32, %s3887_s18  ;;  %v3703_v32 = vpack.i.bf16 %v5033_v47, %v5031_v49  ;;  %v1877_v20 = vld [vmem:[#allocation3 + $0xf1] sm:$0xff] }
 0x263   :  { %3554 = vrot.lane.b32.xlu0 %v3553_v43, %s3887_s18  ;;  %v1828_v43 = vld [vmem:[#allocation3 + $0xe1] sm:$0xff]  ;;  %v1784_v41 = vld [vmem:[#allocation3 + $0x111] sm:$0xff] }
 0x264   :  { %v3718_v44 = vpack.i.bf16 %v1828_v43, %v1780_v31  ;;  %v3748_v35 = vpack.i.bf16 %v1877_v20, %v1828_v43  ;;  %v1893_v0 = vld [vmem:[#allocation3 + $0xf2] sm:$0xff] }
 0x265   :  { %v3763_v3 = vpack.i.bf16 %v1893_v0, %v1844_v29  ;;  %v5060_v54 = vld [vmem:[#allocation3 + $0x110] sm:$0xff] }
 0x266   :  { %3569 = vrot.lane.b32.xlu1 %v3568_v59, %s3888_s22  ;;  %v3728_v59 = vpack.i.bf16 %v1844_v29, %v1796_v15  ;;  %v1897_v31 = vld [vmem:[#allocation3 + $0x132] sm:$0xff] }
 0x267   :  { %3564 = vrot.lane.b32.xlu0 %v3563_v48, %s3888_s22 }
 0x26a   :  { %3579 = vrot.lane.b32.xlu1 %v3578_v17, %s3889_s27  ;;  %v3738_v17 = vpack.i.bf16 %v5044_v60, %v5028_v28 }
 0x26b   :  { %3574 = vrot.lane.b32.xlu0 %v3573_v18, %s3889_s27  ;;  %v3733_v18 = vpack.i.bf16 %v5026_v38, %v5033_v47 }
 0x26e   :  { %3589 = vrot.lane.b32.xlu1 %v3588_v36, %s3890_s14 }
 0x26f   :  { %3584 = vrot.lane.b32.xlu0 %v4911_v46, %s3890_s14  ;;  %v1778_v46 = vld [vmem:[#allocation3 + $0xb1] sm:$0xff] }
 0x270   :  { %v3678_v34 = vpack.i.bf16 %v1778_v46, %v1777_v7  ;;  %v3713_v8 = vpack.i.bf16 %v1779_v62, %v1778_v46  ;;  %v1881_v7 = vld [vmem:[#allocation3 + $0x131] sm:$0xff] }
 0x272   :  { %3599 = vrot.lane.b32.xlu1 %v3588_v36, %s3880_s13  ;;  %v1783_v36 = vld [vmem:[#allocation3 + $0x101] sm:$0xff] }
 0x273   :  { %3594 = vrot.lane.b32.xlu0 %v4916_v63, %s3891_s2  ;;  %v1795_v63 = vld [vmem:[#allocation3 + $0xc2] sm:$0xff]  ;;  %v3768_v1 = vpack.i.bf16 %v1784_v41, %v1783_v36 }
 0x274   :  { %v3698_v56 = vpack.i.bf16 %v1796_v15, %v1795_v63  ;;  %v3723_v48 = vpack.i.bf16 %v1795_v63, %v1794_v16 }
 0x276   :  { %3609 = vrot.lane.b32.xlu1 %v3608_v5, %s3880_s13 }
 0x277   :  { %3604 = vrot.lane.b32.xlu0 %v3603_v6, %s3891_s2 }
 0x27a   :  { %3619 = vrot.lane.b32.xlu1 %v3618_v55, %s3883_s26 }
 0x27b   :  { %3614 = vrot.lane.b32.xlu0 %v3603_v6, %s3883_s26  ;;  %v1800_v6 = vld [vmem:[#allocation3 + $0x112] sm:$0xff] }
 0x27e   :  { %3629 = vrot.lane.b32.xlu1 %v3628_v51, %s3885_s17 }
 0x27f   :  { %3624 = vrot.lane.b32.xlu0 %v3623_v52, %s3885_s17  ;;  %v3783_v52 = vpack.i.bf16 %v5063_v21, %v5044_v60 }
 0x282   :  { %3639 = vrot.lane.b32.xlu1 %v3638_v22, %s3887_s18  ;;  %v3798_v22 = vpack.i.bf16 %v1832_v53, %v1784_v41 }
 0x283   :  { %3634 = vrot.lane.b32.xlu0 %v3633_v11, %s3887_s18  ;;  %v3793_v11 = vpack.i.bf16 %v1783_v36, %v1877_v20 }
 0x286   :  { %3649 = vrot.lane.b32.xlu1 %v3648_v12, %s3888_s22  ;;  %v3808_v12 = vpack.i.bf16 %v1848_v24, %v1800_v6 }
 0x287   :  { %3644 = vrot.lane.b32.xlu0 %v3643_v2, %s3888_s22 }
 0x28a   :  { %3659 = vrot.lane.b32.xlu1 %v3658_v61, %s3889_s27 }
 0x28b   :  { %3654 = vrot.lane.b32.xlu0 %v3653_v33, %s3889_s27 }
 0x28e   :  { %3669 = vrot.lane.b32.xlu1 %v3668_v37, %s3890_s14  ;;  %v3813_v37 = vpack.i.bf16 %v5060_v54, %v5063_v21 }
 0x28f   :  { %3664 = vrot.lane.b32.xlu0 %v3608_v5, %s3890_s14  ;;  %v1799_v5 = vld [vmem:[#allocation3 + $0x102] sm:$0xff] }
 0x290   :  { %v3778_v10 = vpack.i.bf16 %v1800_v6, %v1799_v5  ;;  %v3803_v2 = vpack.i.bf16 %v1799_v5, %v1893_v0 }
 0x292   :  { %3679 = vrot.lane.b32.xlu1 %v3678_v34, %s3880_s13  ;;  %v3828_v34 = vpack.i.bf16 %v1881_v7, %v1832_v53 }
 0x293   :  { %3674 = vrot.lane.b32.xlu0 %v3618_v55, %s3891_s2  ;;  %v1816_v55 = vld [vmem:[#allocation3 + $0x120] sm:$0xff] }
 0x294   :  { %v3788_v51 = vpack.i.bf16 %v1816_v55, %v5060_v54  ;;  %v3818_v33 = vpack.i.bf16 %v1865_v30, %v1816_v55 }
 0x296   :  { %3689 = vrot.lane.b32.xlu1 %v3688_v27, %s3880_s13 }
 0x297   :  { %3684 = vrot.lane.b32.xlu0 %v3683_v25, %s3891_s2 }
 0x29a   :  { %3699 = vrot.lane.b32.xlu1 %v3698_v56, %s3883_s26 }
 0x29b   :  { %3694 = vrot.lane.b32.xlu0 %v3693_v45, %s3883_s26 }
 0x29e   :  { %3709 = vrot.lane.b32.xlu1 %v3708_v50, %s3885_s17 }
 0x29f   :  { %3704 = vrot.lane.b32.xlu0 %v3703_v32, %s3885_s17 }
 0x2a2   :  { %3719 = vrot.lane.b32.xlu1 %v3718_v44, %s3887_s18 }
 0x2a3   :  { %3714 = vrot.lane.b32.xlu0 %v3713_v8, %s3887_s18  ;;  %v1753_v8 = vld [vmem:[#allocation3] sm:$0xff] }
 0x2a6   :  { %3729 = vrot.lane.b32.xlu1 %v3728_v59, %s3888_s22 }
 0x2a7   :  { %3724 = vrot.lane.b32.xlu0 %v3723_v48, %s3888_s22 }
 0x2aa   :  { %3739 = vrot.lane.b32.xlu1 %v3738_v17, %s3889_s27 }
 0x2ab   :  { %3734 = vrot.lane.b32.xlu0 %v3733_v18, %s3889_s27 }
 0x2ae   :  { %3749 = vrot.lane.b32.xlu1 %v3748_v35, %s3890_s14 }
 0x2af   :  { %3744 = vrot.lane.b32.xlu0 %v3688_v27, %s3890_s14  ;;  %v3838_v27 = vpack.i.bf16 %v1897_v31, %v1848_v24 }
 0x2b2   :  { %3759 = vrot.lane.b32.xlu1 %v3748_v35, %s3880_s13 }
 0x2b3   :  { %3754 = vrot.lane.b32.xlu0 %v3698_v56, %s3891_s2 }
 0x2b6   :  { %3769 = vrot.lane.b32.xlu1 %v3768_v1, %s3880_s13 }
 0x2b7   :  { %3764 = vrot.lane.b32.xlu0 %v3763_v3, %s3891_s2 }
 0x2ba   :  { %3779 = vrot.lane.b32.xlu1 %v3778_v10, %s3883_s26 }
 0x2bb   :  { %3774 = vrot.lane.b32.xlu0 %v3763_v3, %s3883_s26 }
 0x2be   :  { %3789 = vrot.lane.b32.xlu1 %v3788_v51, %s3885_s17 }
 0x2bf   :  { %3784 = vrot.lane.b32.xlu0 %v3783_v52, %s3885_s17 }
 0x2c2   :  { %3799 = vrot.lane.b32.xlu1 %v3798_v22, %s3887_s18 }
 0x2c3   :  { %3794 = vrot.lane.b32.xlu0 %v3793_v11, %s3887_s18 }
 0x2c6   :  { %3809 = vrot.lane.b32.xlu1 %v3808_v12, %s3888_s22 }
 0x2c7   :  { %3804 = vrot.lane.b32.xlu0 %v3803_v2, %s3888_s22 }
 0x2c8   :  { %v3530_v61 = vpop.permute.xlu1 %3529 }
 0x2c9   :  { %v3525_v4 = vpop.permute.xlu0 %3524  ;;  %v3532_v56 = vunpack.i.h.bf16 %v3530_v61  ;;  %v3531_v45 = vunpack.i.l.bf16 %v3530_v61 }
 0x2ca   :  { %3819 = vrot.lane.b32.xlu1 %v3818_v33, %s3889_s27  ;;  %v3527_v50 = vunpack.i.h.bf16 %v3525_v4  ;;  %v3526_v32 = vunpack.i.l.bf16 %v3525_v4 }
 0x2cb   :  { %3814 = vrot.lane.b32.xlu0 %v3813_v37, %s3889_s27  ;;  %v2413_v35 = vsel %vm1067_vm3, %v4918_v58, %v3532_v56  ;;  %v2412_v36 = vsel %vm1067_vm3, %v4926_v13, %v3531_v45 }
 0x2cc   :  { %v3540_v46 = vpop.permute.xlu1 %3539  ;;  %v2411_v3 = vsel %vm1067_vm3, %v4924_v9, %v3527_v50 }
 0x2cd   :  { %v3535_v62 = vpop.permute.xlu0 %3534  ;;  %v3542_v43 = vunpack.i.h.bf16 %v3540_v46  ;;  %v3541_v44 = vunpack.i.l.bf16 %v3540_v46 }
 0x2ce   :  { %3829 = vrot.lane.b32.xlu1 %v3828_v34, %s3890_s14  ;;  %v3537_v29 = vunpack.i.h.bf16 %v3535_v62  ;;  %v3536_v59 = vunpack.i.l.bf16 %v3535_v62 }
 0x2cf   :  { %3824 = vrot.lane.b32.xlu0 %v3768_v1, %s3890_s14  ;;  %v2410_v1 = vsel %vm1067_vm3, %v1753_v8, %v3526_v32  ;;  %v2428_v5 = vsel %vm1101_vm6, %v2412_v36, %v3541_v44  ;;  %v2429_v6 = vsel %vm1101_vm6, %v2413_v35, %v3542_v43 }
 0x2d0   :  { %v3550_v40 = vpop.permute.xlu1 %3549  ;;  %v2427_v55 = vsel %vm1101_vm6, %v2411_v3, %v3537_v29 }
 0x2d1   :  { %v3545_v25 = vpop.permute.xlu0 %3544  ;;  %v3552_v17 = vunpack.i.h.bf16 %v3550_v40  ;;  %v3551_v18 = vunpack.i.l.bf16 %v3550_v40 }
 0x2d2   :  { %3839 = vrot.lane.b32.xlu1 %v3838_v27, %s3891_s2  ;;  %v3547_v41 = vunpack.i.h.bf16 %v3545_v25  ;;  %v3546_v0 = vunpack.i.l.bf16 %v3545_v25 }
 0x2d3   :  { %3834 = vrot.lane.b32.xlu0 %v3778_v10, %s3891_s2  ;;  %v2426_v10 = vsel %vm1101_vm6, %v2410_v1, %v3536_v59  ;;  %v2444_v13 = vsel %vm5507_vm9, %v2428_v5, %v3551_v18  ;;  %v2445_v53 = vsel %vm5508_vm11, %v2429_v6, %v3552_v17  ;;  %vm5516_vm11 = vmmov %vm5507_vm9 }
 0x2d4   :  { %v5083_v63 = vpop.permute.xlu1 %3559  ;;  %v2442_v9 = vsel %vm5509_vm12, %v2426_v10, %v3546_v0  ;;  %v2443_v12 = vsel %vm5510_vm13, %v2427_v55, %v3547_v41  ;;  %vm5517_vm12 = vmmov %vm5507_vm9 }
 0x2d5   :  { %v3555_v15 = vpop.permute.xlu0 %3554  ;;  %v3562_v61 = vunpack.i.h.bf16 %v5083_v63  ;;  %v3561_v33 = vunpack.i.l.bf16 %v5083_v63  ;;  %vm5518_vm13 = vmmov %vm5514_vm1 }
 0x2d6   :  { %v3557_v51 = vunpack.i.h.bf16 %v3555_v15  ;;  %v3556_v58 = vunpack.i.l.bf16 %v3555_v15 }
 0x2d7   :  { %v2460_v8 = vsel %vm5513_vm15, %v2444_v13, %v3561_v33  ;;  %v2461_v29 = vsel %vm5514_vm1, %v2445_v53, %v3562_v61  ;;  %vm5521_vm15 = vmmov %vm5514_vm1 }
 0x2d8   :  { %v5085_v42 = vpop.permute.xlu1 %3569  ;;  %v2458_v7 = vsel %vm5511_vm10, %v2442_v9, %v3556_v58  ;;  %v2459_v46 = vsel %vm5512_vm8, %v2443_v12, %v3557_v51  ;;  %vm5519_vm10 = vmmov %vm5514_vm1 }
 0x2d9   :  { %v3565_v16 = vpop.permute.xlu0 %3564  ;;  %v3572_v34 = vunpack.i.h.bf16 %v5085_v42  ;;  %v3571_v62 = vunpack.i.l.bf16 %v5085_v42  ;;  %vm5520_vm8 = vmmov %vm5514_vm1 }
 0x2da   :  { %v3567_v22 = vunpack.i.h.bf16 %v3565_v16  ;;  %v3566_v11 = vunpack.i.l.bf16 %v3565_v16  ;;  %vm5522_vm1 = vmmov %vm5507_vm9 }
 0x2db   :  { %v2477_v18 = vsel %vm2474_vm0, %v2460_v8, %v3571_v62 }
 0x2dc   :  { %v5087_v48 = vpop.permute.xlu1 %3579  ;;  %v2475_v40 = vsel %vm2474_vm0, %v2458_v7, %v3566_v11  ;;  %v2476_v27 = vsel %vm2474_vm0, %v2459_v46, %v3567_v22 }
 0x2dd   :  { %v3575_v20 = vpop.permute.xlu0 %3574  ;;  %v3582_v25 = vunpack.i.h.bf16 %v5087_v48  ;;  %v3581_v15 = vunpack.i.l.bf16 %v5087_v48 }
 0x2de   :  { %v3577_v2 = vunpack.i.h.bf16 %v3575_v20  ;;  %v3576_v30 = vunpack.i.l.bf16 %v3575_v20  ;;  %v2478_v20 = vsel %vm2474_vm0, %v2461_v29, %v3572_v34 }
 0x2df   :  { %v2494_v41 = vsel %vm2491_vm4, %v2477_v18, %v3581_v15  ;;  %v2495_v0 = vsel %vm2491_vm4, %v2478_v20, %v3582_v25 }
 0x2e0   :  { %v3590_v52 = vpop.permute.xlu1 %3589  ;;  %v2492_v16 = vsel %vm2491_vm4, %v2475_v40, %v3576_v30  ;;  %v2493_v56 = vsel %vm2491_vm4, %v2476_v27, %v3577_v2 }
 0x2e1   :  { %v3585_v24 = vpop.permute.xlu0 %3584  ;;  %v3592_v32 = vunpack.i.h.bf16 %v3590_v52  ;;  %v3591_v43 = vunpack.i.l.bf16 %v3590_v52 }
 0x2e2   :  { %v3587_v4 = vunpack.i.h.bf16 %v3585_v24  ;;  %v3586_v37 = vunpack.i.l.bf16 %v3585_v24 }
 0x2e3   :  { %v2511_v5 = vsel %vm2508_vm2, %v2494_v41, %v3591_v43  ;;  %v2512_v6 = vsel %vm2508_vm2, %v2495_v0, %v3592_v32 }
 0x2e4   :  { %v3600_v31 = vpop.permute.xlu1 %3599  ;;  %v2509_v42 = vsel %vm2508_vm2, %v2492_v16, %v3586_v37  ;;  %v2510_v44 = vsel %vm2508_vm2, %v2493_v56, %v3587_v4 }
 0x2e5   :  { %v3595_v63 = vpop.permute.xlu0 %3594  ;;  %v3602_v30 = vunpack.i.h.bf16 %v3600_v31  ;;  %v3601_v61 = vunpack.i.l.bf16 %v3600_v31 }
 0x2e6   :  { %v3597_v45 = vunpack.i.h.bf16 %v3595_v63  ;;  %v3596_v50 = vunpack.i.l.bf16 %v3595_v63 }
 0x2e7   :  { %v2415_v16 = vsel %vm1067_vm3, %v4958_v19, %v3602_v30  ;;  %v2414_v31 = vsel %vm1067_vm3, %v4920_v39, %v3601_v61 }
 0x2e8   :  { %v2526_v59 = vsel %vm2525_vm5, %v2509_v42, %v3596_v50  ;;  %v2527_v48 = vsel %vm2525_vm5, %v2510_v44, %v3597_v45  ;;  %v3610_v17 = vpop.permute.xlu1 %3609 }
 0x2e9   :  { %v2542_v35 = vpack.c.bf16 %v2527_v48, %v2526_v59  ;;  %v3605_v36 = vpop.permute.xlu0 %3604  ;;  %v3612_v12 = vunpack.i.h.bf16 %v3610_v17  ;;  %v3611_v2 = vunpack.i.l.bf16 %v3610_v17 }
 0x2ea   :  { %v3607_v1 = vunpack.i.h.bf16 %v3605_v36  ;;  %v3606_v3 = vunpack.i.l.bf16 %v3605_v36 }
 0x2eb   :  { %3167 = vmatprep.mubr.msk.bf16.mxu1 %vm2593_vm7, %v2542_v35  ;;  %v2417_v27 = vsel %vm1067_vm3, %v5001_v57, %v3612_v12  ;;  %v2416_v25 = vsel %vm1067_vm3, %v5004_v26, %v3611_v2 }
 0x2ec   :  { %v2529_v10 = vsel %vm2525_vm5, %v2512_v6, %v3607_v1  ;;  %v2528_v55 = vsel %vm2525_vm5, %v2511_v5, %v3606_v3  ;;  %v3620_v51 = vpop.permute.xlu1 %3619 }
 0x2ed   :  { %v2543_v58 = vpack.c.bf16 %v2529_v10, %v2528_v55  ;;  %v3615_v52 = vpop.permute.xlu0 %3614  ;;  %v3622_v33 = vunpack.i.h.bf16 %v3620_v51  ;;  %v3621_v4 = vunpack.i.l.bf16 %v3620_v51 }
 0x2ee   :  { %v3617_v37 = vunpack.i.h.bf16 %v3615_v52  ;;  %v3616_v7 = vunpack.i.l.bf16 %v3615_v52 }
 0x2ef   :  { %3168 = vmatmul.mubr.msk.bf16.vlgmr.msra.gmra.mxu1 %vm2593_vm7, %v2543_v58  ;;  %v2432_v56 = vsel %vm1101_vm6, %v2416_v25, %v3621_v4  ;;  %v2433_v45 = vsel %vm1101_vm6, %v2417_v27, %v3622_v33 }
 0x2f0   :  { %v3630_v13 = vpop.permute.xlu1 %3629  ;;  %v2431_v50 = vsel %vm1101_vm6, %v2415_v16, %v3617_v37  ;;  %v2430_v32 = vsel %vm1101_vm6, %v2414_v31, %v3616_v7 }
 0x2f1   :  { %v3625_v53 = vpop.permute.xlu0 %3624  ;;  %v3632_v34 = vunpack.i.h.bf16 %v3630_v13  ;;  %v3631_v62 = vunpack.i.l.bf16 %v3630_v13 }
 0x2f2   :  { %v3627_v15 = vunpack.i.h.bf16 %v3625_v53  ;;  %v3626_v63 = vunpack.i.l.bf16 %v3625_v53 }
 0x2f3   :  { %v2448_v26 = vsel %vm5515_vm14, %v2432_v56, %v3631_v62  ;;  %v2449_v44 = vsel %vm5507_vm9, %v2433_v45, %v3632_v34  ;;  %vm5523_vm14 = vmmov %vm5522_vm1 }
 0x2f4   :  { %v5132_v22 = vpop.permute.xlu1 %3639  ;;  %v2446_v39 = vsel %vm5516_vm11, %v2430_v32, %v3626_v63  ;;  %v2447_v59 = vsel %vm5517_vm12, %v2431_v50, %v3627_v15  ;;  %vm5524_vm9 = vmmov %vm5522_vm1 }
 0x2f5   :  { %v3635_v11 = vpop.permute.xlu0 %3634  ;;  %v3642_v18 = vunpack.i.h.bf16 %v5132_v22  ;;  %v3641_v20 = vunpack.i.l.bf16 %v5132_v22  ;;  %vm5525_vm11 = vmmov %vm5522_vm1 }
 0x2f6   :  { %v3637_v57 = vunpack.i.h.bf16 %v3635_v11  ;;  %v3636_v43 = vunpack.i.l.bf16 %v3635_v11  ;;  %vm5526_vm12 = vmmov %vm5520_vm8 }
 0x2f7   :  { %v2464_v2 = vsel %vm5520_vm8, %v2448_v26, %v3641_v20  ;;  %v2465_v30 = vsel %vm5521_vm15, %v2449_v44, %v3642_v18  ;;  %vm5529_vm15 = vmmov %vm5522_vm1 }
 0x2f8   :  { %v5134_v24 = vpop.permute.xlu1 %3649  ;;  %v2462_v41 = vsel %vm5518_vm13, %v2446_v39, %v3636_v43  ;;  %v2463_v0 = vsel %vm5519_vm10, %v2447_v59, %v3637_v57  ;;  %vm5527_vm13 = vmmov %vm5520_vm8 }
 0x2f9   :  { %v3645_v9 = vpop.permute.xlu0 %3644  ;;  %v3652_v1 = vunpack.i.h.bf16 %v5134_v24  ;;  %v3651_v3 = vunpack.i.l.bf16 %v5134_v24  ;;  %vm5528_vm10 = vmmov %vm5520_vm8 }
 0x2fa   :  { %v3647_v8 = vunpack.i.h.bf16 %v3645_v9  ;;  %v3646_v19 = vunpack.i.l.bf16 %v3645_v9 }
 0x2fb   :  { %v2481_v37 = vsel %vm2474_vm0, %v2464_v2, %v3651_v3  ;;  %v2482_v7 = vsel %vm2474_vm0, %v2465_v30, %v3652_v1 }
 0x2fc   :  { %v3660_v46 = vpop.permute.xlu1 %3659  ;;  %v2479_v6 = vsel %vm2474_vm0, %v2462_v41, %v3646_v19  ;;  %v2480_v10 = vsel %vm2474_vm0, %v2463_v0, %v3647_v8 }
 0x2fd   :  { %v3655_v40 = vpop.permute.xlu0 %3654  ;;  %v3662_v55 = vunpack.i.h.bf16 %v3660_v46  ;;  %v3661_v51 = vunpack.i.l.bf16 %v3660_v46 }
 0x2fe   :  { %v3657_v48 = vunpack.i.h.bf16 %v3655_v40  ;;  %v3656_v17 = vunpack.i.l.bf16 %v3655_v40 }
 0x2ff   :  { %v2498_v62 = vsel %vm2491_vm4, %v2481_v37, %v3661_v51  ;;  %v2499_v40 = vsel %vm2491_vm4, %v2482_v7, %v3662_v55 }
 0x300   :  { %v3670_v42 = vpop.permute.xlu1 %3669  ;;  %v2496_v52 = vsel %vm2491_vm4, %v2479_v6, %v3656_v17  ;;  %v2497_v13 = vsel %vm2491_vm4, %v2480_v10, %v3657_v48  ;;  %v1761_v17 = vld [vmem:[#allocation3 + $0xa0] sm:$0xff] }
 0x301   :  { %v3665_v29 = vpop.permute.xlu0 %3664  ;;  %v3672_v11 = vunpack.i.h.bf16 %v3670_v42  ;;  %v3671_v9 = vunpack.i.l.bf16 %v3670_v42 }
 0x302   :  { %v3667_v35 = vunpack.i.h.bf16 %v3665_v29  ;;  %v3666_v36 = vunpack.i.l.bf16 %v3665_v29 }
 0x303   :  { %v2515_v15 = vsel %vm2508_vm2, %v2498_v62, %v3671_v9  ;;  %v2516_v63 = vsel %vm2508_vm2, %v2499_v40, %v3672_v11 }
 0x304   :  { %v3680_v5 = vpop.permute.xlu1 %3679  ;;  %v2513_v12 = vsel %vm2508_vm2, %v2496_v52, %v3666_v36  ;;  %v2514_v24 = vsel %vm2508_vm2, %v2497_v13, %v3667_v35 }
 0x305   :  { %v3675_v58 = vpop.permute.xlu0 %3674  ;;  %v3682_v29 = vunpack.i.h.bf16 %v3680_v5  ;;  %v3681_v39 = vunpack.i.l.bf16 %v3680_v5 }
 0x306   :  { %v3677_v53 = vunpack.i.h.bf16 %v3675_v58  ;;  %v3676_v22 = vunpack.i.l.bf16 %v3675_v58 }
 0x307   :  { %v2419_v5 = vsel %vm1067_vm3, %v5031_v49, %v3682_v29  ;;  %v2418_v55 = vsel %vm1067_vm3, %v1761_v17, %v3681_v39 }
 0x308   :  { %v2530_v61 = vsel %vm2525_vm5, %v2513_v12, %v3676_v22  ;;  %v2531_v33 = vsel %vm2525_vm5, %v2514_v24, %v3677_v53  ;;  %v3690_v4 = vpop.permute.xlu1 %3689 }
 0x309   :  { %v2544_v46 = vpack.c.bf16 %v2531_v33, %v2530_v61  ;;  %v3685_v34 = vpop.permute.xlu0 %3684  ;;  %v3692_v8 = vunpack.i.h.bf16 %v3690_v4  ;;  %v3691_v19 = vunpack.i.l.bf16 %v3690_v4 }
 0x30a   :  { %v3687_v27 = vunpack.i.h.bf16 %v3685_v34  ;;  %v3686_v25 = vunpack.i.l.bf16 %v3685_v34 }
 0x30b   :  { %3171 = vmatprep.mubr.msk.bf16.mxu1 %vm2593_vm7, %v2544_v46  ;;  %v2421_v1 = vsel %vm1067_vm3, %v5026_v38, %v3692_v8  ;;  %v2420_v3 = vsel %vm1067_vm3, %v5033_v47, %v3691_v19 }
 0x30c   :  { %v2533_v16 = vsel %vm2525_vm5, %v2516_v63, %v3687_v27  ;;  %v2532_v31 = vsel %vm2525_vm5, %v2515_v15, %v3686_v25  ;;  %v3700_v56 = vpop.permute.xlu1 %3699 }
 0x30d   :  { %v2545_v45 = vpack.c.bf16 %v2533_v16, %v2532_v31  ;;  %v3695_v50 = vpop.permute.xlu0 %3694  ;;  %v3702_v59 = vunpack.i.h.bf16 %v3700_v56  ;;  %v3701_v48 = vunpack.i.l.bf16 %v3700_v56 }
 0x30e   :  { %v3697_v18 = vunpack.i.h.bf16 %v3695_v50  ;;  %v3696_v20 = vunpack.i.l.bf16 %v3695_v50 }
 0x30f   :  { %3172 = vmatmul.mubr.msk.bf16.gmra.mxu1 %vm2593_vm7, %v2545_v45  ;;  %v2436_v51 = vsel %vm1101_vm6, %v2420_v3, %v3701_v48  ;;  %v2437_v58 = vsel %vm1101_vm6, %v2421_v1, %v3702_v59 }
 0x310   :  { %v3710_v32 = vpop.permute.xlu1 %3709  ;;  %v2435_v52 = vsel %vm1101_vm6, %v2419_v5, %v3697_v18  ;;  %v2434_v13 = vsel %vm1101_vm6, %v2418_v55, %v3696_v20 }
 0x311   :  { %v3705_v57 = vpop.permute.xlu0 %3704  ;;  %v3712_v36 = vunpack.i.h.bf16 %v3710_v32  ;;  %v3711_v41 = vunpack.i.l.bf16 %v3710_v32 }
 0x312   :  { %v3707_v6 = vunpack.i.h.bf16 %v3705_v57  ;;  %v3706_v10 = vunpack.i.l.bf16 %v3705_v57 }
 0x313   :  { %v2452_v47 = vsel %vm5522_vm1, %v2436_v51, %v3711_v41  ;;  %v2453_v11 = vsel %vm5523_vm14, %v2437_v58, %v3712_v36  ;;  %vm5530_vm14 = vmmov %vm5522_vm1 }
 0x314   :  { %v5178_v43 = vpop.permute.xlu1 %3719  ;;  %v2450_v24 = vsel %vm5524_vm9, %v2434_v13, %v3706_v10  ;;  %v2451_v2 = vsel %vm5525_vm11, %v2435_v52, %v3707_v6  ;;  %vm5531_vm9 = vmmov %vm5522_vm1 }
 0x315   :  { %v3715_v42 = vpop.permute.xlu0 %3714  ;;  %v3722_v33 = vunpack.i.h.bf16 %v5178_v43  ;;  %v3721_v4 = vunpack.i.l.bf16 %v5178_v43 }
 0x316   :  { %v3717_v53 = vunpack.i.h.bf16 %v3715_v42  ;;  %v3716_v38 = vunpack.i.l.bf16 %v3715_v42 }
 0x317   :  { %v2469_v8 = vsel %vm5520_vm8, %v2453_v11, %v3722_v33 }
 0x318   :  { %v5180_v26 = vpop.permute.xlu1 %3729  ;;  %v2466_v46 = vsel %vm5526_vm12, %v2450_v24, %v3716_v38  ;;  %v2467_v34 = vsel %vm5527_vm13, %v2451_v2, %v3717_v53 }
 0x319   :  { %v3725_v44 = vpop.permute.xlu0 %3724  ;;  %v3732_v62 = vunpack.i.h.bf16 %v5180_v26  ;;  %v3731_v40 = vunpack.i.l.bf16 %v5180_v26 }
 0x31a   :  { %v3727_v9 = vunpack.i.h.bf16 %v3725_v44  ;;  %v3726_v12 = vunpack.i.l.bf16 %v3725_v44  ;;  %v2468_v44 = vsel %vm5528_vm10, %v2452_v47, %v3721_v4 }
 0x31b   :  { %v2485_v59 = vsel %vm2474_vm0, %v2468_v44, %v3731_v40  ;;  %v2486_v48 = vsel %vm2474_vm0, %v2469_v8, %v3732_v62 }
 0x31c   :  { %v3740_v35 = vpop.permute.xlu1 %3739  ;;  %v2483_v25 = vsel %vm2474_vm0, %v2466_v46, %v3726_v12  ;;  %v2484_v15 = vsel %vm2474_vm0, %v2467_v34, %v3727_v9 }
 0x31d   :  { %v3735_v0 = vpop.permute.xlu0 %3734  ;;  %v3742_v63 = vunpack.i.h.bf16 %v3740_v35  ;;  %v3741_v16 = vunpack.i.l.bf16 %v3740_v35 }
 0x31e   :  { %v3737_v30 = vunpack.i.h.bf16 %v3735_v0  ;;  %v3736_v61 = vunpack.i.l.bf16 %v3735_v0 }
 0x31f   :  { %v2502_v20 = vsel %vm2491_vm4, %v2485_v59, %v3741_v16  ;;  %v2503_v35 = vsel %vm2491_vm4, %v2486_v48, %v3742_v63 }
 0x320   :  { %v3750_v22 = vpop.permute.xlu1 %3749  ;;  %v2500_v56 = vsel %vm2491_vm4, %v2483_v25, %v3736_v61  ;;  %v2501_v45 = vsel %vm2491_vm4, %v2484_v15, %v3737_v30 }
 0x321   :  { %v3745_v49 = vpop.permute.xlu0 %3744  ;;  %v3752_v57 = vunpack.i.h.bf16 %v3750_v22  ;;  %v3751_v43 = vunpack.i.l.bf16 %v3750_v22 }
 0x322   :  { %v3747_v37 = vunpack.i.h.bf16 %v3745_v49  ;;  %v3746_v7 = vunpack.i.l.bf16 %v3745_v49 }
 0x323   :  { %v2519_v0 = vsel %vm2508_vm2, %v2502_v20, %v3751_v43  ;;  %v2520_v1 = vsel %vm2508_vm2, %v2503_v35, %v3752_v57 }
 0x324   :  { %v3760_v27 = vpop.permute.xlu1 %3759  ;;  %v2517_v42 = vsel %vm2508_vm2, %v2500_v56, %v3746_v7  ;;  %v2518_v26 = vsel %vm2508_vm2, %v2501_v45, %v3747_v37 }
 0x325   :  { %v3755_v31 = vpop.permute.xlu0 %3754  ;;  %v3762_v22 = vunpack.i.h.bf16 %v3760_v27  ;;  %v3761_v47 = vunpack.i.l.bf16 %v3760_v27 }
 0x326   :  { %v3757_v50 = vunpack.i.h.bf16 %v3755_v31  ;;  %v3756_v32 = vunpack.i.l.bf16 %v3755_v31 }
 0x327   :  { %v2423_v46 = vsel %vm1067_vm3, %v5044_v60, %v3762_v22  ;;  %v2422_v34 = vsel %vm1067_vm3, %v5028_v28, %v3761_v47 }
 0x328   :  { %v2534_v19 = vsel %vm2525_vm5, %v2517_v42, %v3756_v32  ;;  %v2535_v29 = vsel %vm2525_vm5, %v2518_v26, %v3757_v50  ;;  %v3770_v39 = vpop.permute.xlu1 %3769 }
 0x329   :  { %v2546_v17 = vpack.c.bf16 %v2535_v29, %v2534_v19  ;;  %v3765_v18 = vpop.permute.xlu0 %3764  ;;  %v3772_v53 = vunpack.i.h.bf16 %v3770_v39  ;;  %v3771_v38 = vunpack.i.l.bf16 %v3770_v39 }
 0x32a   :  { %v3767_v36 = vunpack.i.h.bf16 %v3765_v18  ;;  %v3766_v41 = vunpack.i.l.bf16 %v3765_v18 }
 0x32b   :  { %3175 = vmatprep.mubr.msk.bf16.mxu1 %vm2593_vm7, %v2546_v17  ;;  %v2425_v33 = vsel %vm1067_vm3, %v5060_v54, %v3772_v53  ;;  %v2424_v4 = vsel %vm1067_vm3, %v5063_v21, %v3771_v38 }
 0x32c   :  { %v2537_v3 = vsel %vm2525_vm5, %v2520_v1, %v3767_v36  ;;  %v2536_v6 = vsel %vm2525_vm5, %v2519_v0, %v3766_v41  ;;  %v3780_v10 = vpop.permute.xlu1 %3779 }
 0x32d   :  { %v2547_v5 = vpack.c.bf16 %v2537_v3, %v2536_v6  ;;  %v3775_v55 = vpop.permute.xlu0 %3774  ;;  %v3782_v11 = vunpack.i.h.bf16 %v3780_v10  ;;  %v3781_v9 = vunpack.i.l.bf16 %v3780_v10 }
 0x32e   :  { %v3777_v49 = vunpack.i.h.bf16 %v3775_v55  ;;  %v3776_v24 = vunpack.i.l.bf16 %v3775_v55 }
 0x32f   :  { %3176 = vmatmul.mubr.msk.bf16.gmra.mxu1 %vm2593_vm7, %v2547_v5  ;;  %v2440_v62 = vsel %vm1101_vm6, %v2424_v4, %v3781_v9  ;;  %v2441_v40 = vsel %vm1101_vm6, %v2425_v33, %v3782_v11  ;;  %v5261_v33 = vpop.f32.mrf.mxu1 }
 0x330   :  { %v3790_v51 = vpop.permute.xlu1 %3789  ;;  %v2439_v25 = vsel %vm1101_vm6, %v2423_v46, %v3777_v49  ;;  %v2438_v54 = vsel %vm1101_vm6, %v2422_v34, %v3776_v24  ;;  %vm5532_vm6 = vmmov %vm5520_vm8 }
 0x331   :  { %v3785_v58 = vpop.permute.xlu0 %3784  ;;  %v3792_v30 = vunpack.i.h.bf16 %v3790_v51  ;;  %v3791_v61 = vunpack.i.l.bf16 %v3790_v51  ;;  %vm5533_vm11 = vmmov %vm5532_vm6  ;;  %v5263_v4 = vpop.f32.mrf.mxu1 }
 0x332   :  { %v3787_v37 = vunpack.i.h.bf16 %v3785_v58  ;;  %v3786_v7 = vunpack.i.l.bf16 %v3785_v58  ;;  %vm5534_vm12 = vmmov %vm5532_vm6 }
 0x333   :  { %v2456_v16 = vsel %vm5529_vm15, %v2440_v62, %v3791_v61  ;;  %v2457_v31 = vsel %vm5522_vm1, %v2441_v40, %v3792_v30  ;;  %vm5535_vm13 = vmmov %vm5532_vm6 }
 0x334   :  { %v3800_v52 = vpop.permute.xlu1 %3799  ;;  %v2454_v28 = vsel %vm5530_vm14, %v2438_v54, %v3786_v7  ;;  %v2455_v45 = vsel %vm5531_vm9, %v2439_v25, %v3787_v37  ;;  %v5265_v37 = vpop.f32.mrf.mxu1 }
 0x335   :  { %v3795_v13 = vpop.permute.xlu0 %3794  ;;  %v3802_v15 = vunpack.i.h.bf16 %v3800_v52  ;;  %v3801_v63 = vunpack.i.l.bf16 %v3800_v52 }
 0x336   :  { %v3797_v60 = vunpack.i.h.bf16 %v3795_v13  ;;  %v3796_v56 = vunpack.i.l.bf16 %v3795_v13  ;;  %v5267_v7 = vpop.f32.mrf.mxu1 }
 0x337   :  { %v2472_v8 = vsel %vm5532_vm6, %v2456_v16, %v3801_v63  ;;  %v2473_v19 = vsel %vm5533_vm11, %v2457_v31, %v3802_v15 }
 0x338   :  { %v3810_v12 = vpop.permute.xlu1 %3809  ;;  %v2470_v48 = vsel %vm5534_vm12, %v2454_v28, %v3796_v56  ;;  %v2471_v17 = vsel %vm5535_vm13, %v2455_v45, %v3797_v60  ;;  %v5269_v46 = vpop.f32.mrf.mxu1  ;;  %v3069_v56 = vld [vmem:[%s5499_s7] ss:$0 sm:$0xff] }
 0x339   :  { %v3805_v2 = vpop.permute.xlu0 %3804  ;;  %v3812_v50 = vunpack.i.h.bf16 %v3810_v12  ;;  %v3811_v32 = vunpack.i.l.bf16 %v3810_v12 }
 0x33a   :  { %v3807_v57 = vunpack.i.h.bf16 %v3805_v2  ;;  %v3806_v43 = vunpack.i.l.bf16 %v3805_v2  ;;  %v5271_v34 = vpop.f32.mrf.mxu1 }
 0x33b   :  { %v2489_v35 = vsel %vm2474_vm0, %v2472_v8, %v3811_v32  ;;  %v2490_v36 = vsel %vm2474_vm0, %v2473_v19, %v3812_v50 }
 0x33c   :  { %v3820_v27 = vpop.permute.xlu1 %3819  ;;  %v2487_v1 = vsel %vm2474_vm0, %v2470_v48, %v3806_v43  ;;  %v2488_v3 = vsel %vm2474_vm0, %v2471_v17, %v3807_v57  ;;  %v5273_v62 = vpop.f32.mrf.mxu1 }
 0x33d   :  { %v3815_v21 = vpop.permute.xlu0 %3814  ;;  %v3822_v42 = vunpack.i.h.bf16 %v3820_v27  ;;  %v3821_v26 = vunpack.i.l.bf16 %v3820_v27 }
 0x33e   :  { %v3817_v29 = vunpack.i.h.bf16 %v3815_v21  ;;  %v3816_v39 = vunpack.i.l.bf16 %v3815_v21  ;;  %v5275_v40 = vpop.f32.mrf.mxu1 }
 0x33f   :  { %v2506_v6 = vsel %vm2491_vm4, %v2489_v35, %v3821_v26  ;;  %v2507_v10 = vsel %vm2491_vm4, %v2490_v36, %v3822_v42 }
 0x340   :  { %v3830_v44 = vpop.permute.xlu1 %3829  ;;  %v2504_v55 = vsel %vm2491_vm4, %v2487_v1, %v3816_v39  ;;  %v2505_v51 = vsel %vm2491_vm4, %v2488_v3, %v3817_v29  ;;  %v5277_v27 = vpop.f32.mrf.mxu1 }
 0x341   :  { %v3825_v59 = vpop.permute.xlu0 %3824  ;;  %v3832_v18 = vunpack.i.h.bf16 %v3830_v44  ;;  %v3831_v20 = vunpack.i.l.bf16 %v3830_v44 }
 0x342   :  { %v3827_v41 = vunpack.i.h.bf16 %v3825_v59  ;;  %v3826_v0 = vunpack.i.l.bf16 %v3825_v59  ;;  %v5279_v25 = vpop.f32.mrf.mxu1 }
 0x343   :  { %v2523_v53 = vsel %vm2508_vm2, %v2506_v6, %v3831_v20  ;;  %v2524_v38 = vsel %vm2508_vm2, %v2507_v10, %v3832_v18 }
 0x344   :  { %v3840_v5 = vpop.permute.xlu1 %3839  ;;  %v2521_v11 = vsel %vm2508_vm2, %v2504_v55, %v3826_v0  ;;  %v2522_v9 = vsel %vm2508_vm2, %v2505_v51, %v3827_v41  ;;  %v5281_v54 = vpop.f32.mrf.mxu1 }
 0x345   :  { %v3842_v58 = vunpack.i.h.bf16 %v3840_v5  ;;  %v3841_v52 = vunpack.i.l.bf16 %v3840_v5  ;;  %v3835_v13 = vpop.permute.xlu0 %3834 }
 0x346   :  { %v3837_v22 = vunpack.i.h.bf16 %v3835_v13  ;;  %v3836_v47 = vunpack.i.l.bf16 %v3835_v13  ;;  %v5283_v15 = vpop.f32.mrf.mxu1 }
 0x347   :  { %v2540_v12 = vsel %vm2525_vm5, %v2523_v53, %v3841_v52  ;;  %v2541_v49 = vsel %vm2525_vm5, %v2524_v38, %v3842_v58 }
 0x348   :  { %v2549_v24 = vpack.c.bf16 %v2541_v49, %v2540_v12  ;;  %v2538_v2 = vsel %vm2525_vm5, %v2521_v11, %v3836_v47  ;;  %v2539_v30 = vsel %vm2525_vm5, %v2522_v9, %v3837_v22 }
 0x349   :  { %v2548_v61 = vpack.c.bf16 %v2539_v30, %v2538_v2 }
 0x34b   :  { %3179 = vmatprep.mubr.msk.bf16.mxu1 %vm2593_vm7, %v2548_v61 }
 0x34c   :  { %3180 = vmatmul.mubr.msk.bf16.gmra.mxu1 %vm2593_vm7, %v2549_v24 }
 0x3af   :  { %v3169_v63 = vpop.f32.mrf.mxu1 }
 0x3b0   :  { %v2665_v43 = vadd.f32 %v3169_v63, %v3069_v56 }
 0x3b1   :  { %v2656_v21 = vpop.f32.mrf.mxu1 }
 0x3b2   :  { %v5290_v50 = vadd.f32 %v3069_v56, %v2656_v21  ;;  %v2722_v19 = vsel %vm1067_vm3, %v2665_v43, 0.0 }
 0x3b3   :  { %v3170_v16 = vpop.f32.mrf.mxu1 }
 0x3b4   :  { %v2719_v42 = vsel %vm1067_vm3, %v5290_v50, 0.0  ;;  %v2668_v29 = vadd.f32 %v3170_v16, %v3069_v56 }
 0x3b5   :  { %v2659_v31 = vpop.f32.mrf.mxu1 }
 0x3b6   :  { %v5288_v45 = vadd.f32 %v3069_v56, %v2659_v31  ;;  %v2724_v18 = vsel %vm1067_vm3, %v2668_v29, 0.0 }
 0x3b8   :  { %v2720_v57 = vsel %vm1067_vm3, %v5288_v45, 0.0 }
 0x3b9   :  { %v2721_v26 = vadd.f32 %v2720_v57, %v2719_v42 }
 0x3bb   :  { %v2723_v59 = vadd.f32 %v2722_v19, %v2721_v26 }
 0x3bd   :  { %v2725_v35 = vadd.f32 %v2724_v18, %v2723_v59 }
 0x3cf   :  { %v3173_v60 = vpop.f32.mrf.mxu1 }
 0x3d0   :  { %v2681_v1 = vadd.f32 %v3173_v60, %v3069_v56 }
 0x3d1   :  { %v2672_v28 = vpop.f32.mrf.mxu1 }
 0x3d2   :  { %v2673_v39 = vadd.f32 %v3069_v56, %v2672_v28  ;;  %v2730_v10 = vsel %vm1067_vm3, %v2681_v1, 0.0 }
 0x3d3   :  { %v3174_v32 = vpop.f32.mrf.mxu1 }
 0x3d4   :  { %v2726_v20 = vsel %vm1067_vm3, %v2673_v39, 0.0  ;;  %v2684_v5 = vadd.f32 %v3174_v32, %v3069_v56 }
 0x3d5   :  { %v2675_v44 = vpop.f32.mrf.mxu1  ;;  %v2727_v41 = vadd.f32 %v2726_v20, %v2725_v35 }
 0x3d6   :  { %v2676_v48 = vadd.f32 %v3069_v56, %v2675_v44  ;;  %v2732_v52 = vsel %vm1067_vm3, %v2684_v5, 0.0 }
 0x3d8   :  { %v2728_v36 = vsel %vm1067_vm3, %v2676_v48, 0.0 }
 0x3d9   :  { %v2729_v3 = vadd.f32 %v2728_v36, %v2727_v41 }
 0x3db   :  { %v2731_v51 = vadd.f32 %v2730_v10, %v2729_v3 }
 0x3dd   :  { %v2733_v53 = vadd.f32 %v2732_v52, %v2731_v51 }
 0x3ef   :  { %v3177_v8 = vpop.f32.mrf.mxu1 }
 0x3f0   :  { %v2697_v47 = vadd.f32 %v3177_v8, %v3069_v56 }
 0x3f1   :  { %v2688_v17 = vpop.f32.mrf.mxu1 }
 0x3f2   :  { %v2689_v55 = vadd.f32 %v3069_v56, %v2688_v17  ;;  %v2738_v12 = vsel %vm1067_vm3, %v2697_v47, 0.0 }
 0x3f3   :  { %v3178_v0 = vpop.f32.mrf.mxu1 }
 0x3f4   :  { %v2734_v13 = vsel %vm1067_vm3, %v2689_v55, 0.0  ;;  %v2700_v49 = vadd.f32 %v3178_v0, %v3069_v56 }
 0x3f5   :  { %v2691_v6 = vpop.f32.mrf.mxu1  ;;  %v2735_v22 = vadd.f32 %v2734_v13, %v2733_v53 }
 0x3f6   :  { %v2692_v58 = vadd.f32 %v3069_v56, %v2691_v6  ;;  %v2740_v63 = vsel %vm1067_vm3, %v2700_v49, 0.0 }
 0x3f8   :  { %v2736_v38 = vsel %vm1067_vm3, %v2692_v58, 0.0 }
 0x3f9   :  { %v2737_v11 = vadd.f32 %v2736_v38, %v2735_v22 }
 0x3fb   :  { %v2739_v24 = vadd.f32 %v2738_v12, %v2737_v11 }
 0x3fd   :  { %v2741_v16 = vadd.f32 %v2740_v63, %v2739_v24 }
 0x40c   :  { %v3181_v9 = vpop.f32.mrf.mxu1 }
 0x40d   :  { %v2713_v60 = vadd.f32 %v3181_v9, %v3069_v56 }
 0x40e   :  { %v2704_v2 = vpop.f32.mrf.mxu1 }
 0x40f   :  { %v2705_v30 = vadd.f32 %v3069_v56, %v2704_v2  ;;  %v2746_v44 = vsel %vm1067_vm3, %v2713_v60, 0.0 }
 0x410   :  { %v3182_v61 = vpop.f32.mrf.mxu1 }
 0x411   :  { %v2742_v21 = vsel %vm1067_vm3, %v2705_v30, 0.0  ;;  %v5307_v57 = vadd.f32 %v3182_v61, %v3069_v56 }
 0x412   :  { %v2707_v31 = vpop.f32.mrf.mxu1  ;;  %v2743_v32 = vadd.f32 %v2742_v21, %v2741_v16 }
 0x413   :  { %v2708_v28 = vadd.f32 %v3069_v56, %v2707_v31  ;;  %v2748_v19 = vsel %vm1067_vm3, %v5307_v57, 0.0 }
 0x415   :  { %v2744_v42 = vsel %vm1067_vm3, %v2708_v28, 0.0 }
 0x416   :  { %v2745_v26 = vadd.f32 %v2744_v42, %v2743_v32 }
 0x418   :  { %v2747_v8 = vadd.f32 %v2746_v44, %v2745_v26 }
 0x41a   :  { %v2749_v59 = vadd.f32 %v2748_v19, %v2747_v8 }
 0x41c   :  { %v2750_v17 = vrot.slane %v2749_v59, 4 }
 0x41e   :  { %v2751_v18 = vadd.f32 %v2750_v17, %v2749_v59 }
 0x420   :  { %v2752_v20 = vrot.slane %v2751_v18, 2 }
 0x422   :  { %v2753_v35 = vadd.f32 %v2752_v20, %v2751_v18 }
 0x424   :  { %v2754_v36 = vrot.slane %v2753_v35, 1 }
 0x426   :  { %v2755_v41 = vadd.f32 %v2754_v36, %v2753_v35 }
 0x428   :  { %v2756_v0 = vmul.f32 0.0078125, %v2755_v41 }
 0x42a   :  { %v5314_v56 = vsub.f32 %v5290_v50, %v2756_v0  ;;  %v5317_v3 = vsub.f32 %v5288_v45, %v2756_v0  ;;  %v5319_v6 = vsub.f32 %v2665_v43, %v2756_v0  ;;  %v5321_v10 = vsub.f32 %v2668_v29, %v2756_v0 }
 0x42b   :  { %v5327_v13 = vsub.f32 %v2673_v39, %v2756_v0  ;;  %v5331_v50 = vsub.f32 %v2676_v48, %v2756_v0  ;;  %v5337_v22 = vsub.f32 %v2681_v1, %v2756_v0  ;;  %v5342_v12 = vsub.f32 %v2684_v5, %v2756_v0 }
 0x42c   :  { %v2773_v51 = vmul.f32 %v5314_v56, %v5314_v56  ;;  %v2774_v52 = vmul.f32 %v5317_v3, %v5317_v3  ;;  %v2775_v53 = vmul.f32 %v5319_v6, %v5319_v6  ;;  %v2776_v45 = vmul.f32 %v5321_v10, %v5321_v10 }
 0x42d   :  { %v2777_v11 = vmul.f32 %v5327_v13, %v5327_v13  ;;  %v2778_v48 = vmul.f32 %v5331_v50, %v5331_v50  ;;  %v5347_v61 = vsub.f32 %v2689_v55, %v2756_v0  ;;  %v2779_v1 = vmul.f32 %v5337_v22, %v5337_v22 }
 0x42e   :  { %v2789_v43 = vsel %vm1067_vm3, %v2773_v51, 0.0  ;;  %v2790_v29 = vsel %vm1067_vm3, %v2774_v52, 0.0  ;;  %v2792_v39 = vsel %vm1067_vm3, %v2775_v53, 0.0  ;;  %v2794_v24 = vsel %vm1067_vm3, %v2776_v45, 0.0 }
 0x42f   :  { %v2791_v38 = vadd.f32 %v2790_v29, %v2789_v43  ;;  %v2796_v63 = vsel %vm1067_vm3, %v2777_v11, 0.0  ;;  %v5352_v16 = vsub.f32 %v2692_v58, %v2756_v0  ;;  %v2780_v5 = vmul.f32 %v5342_v12, %v5342_v12 }
 0x430   :  { %v2798_v31 = vsel %vm1067_vm3, %v2778_v48, 0.0  ;;  %v5357_v42 = vsub.f32 %v2697_v47, %v2756_v0  ;;  %v2781_v55 = vmul.f32 %v5347_v61, %v5347_v61  ;;  %v2800_v26 = vsel %vm1067_vm3, %v2779_v1, 0.0 }
 0x431   :  { %v2793_v9 = vadd.f32 %v2792_v39, %v2791_v38  ;;  %v5362_v8 = vsub.f32 %v2700_v49, %v2756_v0  ;;  %v2782_v58 = vmul.f32 %v5352_v16, %v5352_v16  ;;  %v2802_v19 = vsel %vm1067_vm3, %v2780_v5, 0.0 }
 0x432   :  { %v5367_v17 = vsub.f32 %v2705_v30, %v2756_v0  ;;  %v2783_v47 = vmul.f32 %v5357_v42, %v5357_v42  ;;  %v2804_v18 = vsel %vm1067_vm3, %v2781_v55, 0.0  ;;  %v5372_v35 = vsub.f32 %v2708_v28, %v2756_v0 }
 0x433   :  { %v2795_v2 = vadd.f32 %v2794_v24, %v2793_v9  ;;  %v2784_v49 = vmul.f32 %v5362_v8, %v5362_v8  ;;  %v2806_v36 = vsel %vm1067_vm3, %v2782_v58, 0.0  ;;  %v5377_v51 = vsub.f32 %v2713_v60, %v2756_v0  ;;  %v2829_v58 = vld [vmem:[%s5500_s8] sm:$0x1]  ;;  %s3892_s8 = smov [#allocation5]  }
 0x434   :  { %v2785_v30 = vmul.f32 %v5367_v17, %v5367_v17  ;;  %v2808_v52 = vsel %vm1067_vm3, %v2783_v47, 0.0  ;;  %v5383_v45 = vsub.f32 %v5307_v57, %v2756_v0  ;;  %v2786_v28 = vmul.f32 %v5372_v35, %v5372_v35 }
 0x435   :  { %v2797_v21 = vadd.f32 %v2796_v63, %v2795_v2  ;;  %v2810_v43 = vsel %vm1067_vm3, %v2784_v49, 0.0  ;;  %v2787_v38 = vmul.f32 %v5377_v51, %v5377_v51  ;;  %v5406_v49 = vld [vmem:[%s5501_s9] ss:$0 sm:$0xff]  ;;  %s2945_s9 = sshll.u32 %s3892_s8, 4  ;;  %s2946_s9 = int_to_ptr.vmem [resolvable:$true] %s2945_s9 }
 0x436   :  { %v2812_v60 = vsel %vm1067_vm3, %v2785_v30, 0.0  ;;  %v2788_v39 = vmul.f32 %v5383_v45, %v5383_v45  ;;  %v2814_v9 = vsel %vm1067_vm3, %v2786_v28, 0.0  ;;  %p3862_p1 = scmp.lt.s32.totalorder %s2946_s9, %s2946_s9 }
 0x437   :  { %v2799_v32 = vadd.f32 %v2798_v31, %v2797_v21  ;;  %v2816_v57 = vsel %vm1067_vm3, %v2787_v38, 0.0 }
 0x438   :  { %v2818_v24 = vsel %vm1067_vm3, %v2788_v39, 0.0 }
 0x439   :  { %v2801_v44 = vadd.f32 %v2800_v26, %v2799_v32 }
 0x43b   :  { %v2803_v59 = vadd.f32 %v2802_v19, %v2801_v44  ;;  %v3143_v44 = vpop.f32.mrf.mxu0 }
 0x43d   :  { %v2805_v20 = vadd.f32 %v2804_v18, %v2803_v59  ;;  %v1424_v19 = vpop.f32.mrf.mxu0 }
 0x43f   :  { %v2807_v41 = vadd.f32 %v2806_v36, %v2805_v20  ;;  %v3144_v18 = vpop.f32.mrf.mxu0 }
 0x441   :  { %v2809_v53 = vadd.f32 %v2808_v52, %v2807_v41  ;;  %v5413_v41 = vld [vmem:[%s5503_s11] ss:$0 sm:$0xff]  ;;  %v1427_v30 = vpop.f32.mrf.mxu0  ;;  %s3857_s11 = scalar_lea.vmem %s2946_s9, 128 }
 0x442   :  { %p3858_p0 = scmp.ne.s32.totalorder %s2946_s9, %s3857_s11  ;;  %p3863_p2 = scmp.lt.s32.totalorder %s3857_s11, %s3857_s11 }
 0x443   :  { %v2811_v29 = vadd.f32 %v2810_v43, %v2809_v53 }
 0x444   :  { %p3864_p3 = por %p3863_p2, %p3862_p1 }
 0x445   :  { %v2813_v11 = vadd.f32 %v2812_v60, %v2811_v29 }
 0x446   :  { %p3865_p4 = pnand %p3864_p3, %p3858_p0 }
 0x447   :  { %v2815_v48 = vadd.f32 %v2814_v9, %v2813_v11 }
 0x449   :  { %v2817_v0 = vadd.f32 %v2816_v57, %v2815_v48  ;;  %v1436_v57 = vadd.f32 %v3144_v18, %v5413_v41 }
 0x44b   :  { %v2819_v2 = vadd.f32 %v2818_v24, %v2817_v0 }
 0x44d   :  { %v2820_v1 = vrot.slane %v2819_v2, 4 }
 0x44f   :  { %v2821_v63 = vadd.f32 %v2820_v1, %v2819_v2  ;;  %v1441_v1 = vadd.f32 %v5413_v41, %v5263_v4  ;;  %v1449_v4 = vadd.f32 %v5261_v33, %v5413_v41  ;;  %v1457_v33 = vadd.f32 %v5413_v41, %v5271_v34 }
 0x450   :  { %v1465_v34 = vadd.f32 %v5269_v46, %v5413_v41  ;;  %v1473_v46 = vadd.f32 %v5413_v41, %v5279_v25  ;;  %v1481_v25 = vadd.f32 %v5277_v27, %v5413_v41 }
 0x451   :  { %v2822_v21 = vrot.slane %v2821_v63, 2 }
 0x453   :  { %v2823_v5 = vadd.f32 %v2822_v21, %v2821_v63 }
 0x455   :  { %v2824_v31 = vrot.slane %v2823_v5, 1 }
 0x457   :  { %v2825_v32 = vadd.f32 %v2824_v31, %v2823_v5  ;;  %v1444_v31 = vadd.f32 %v5413_v41, %v5267_v7  ;;  %v1452_v7 = vadd.f32 %v5265_v37, %v5413_v41  ;;  %v1460_v37 = vadd.f32 %v5413_v41, %v5275_v40 }
 0x458   :  { %v1468_v40 = vadd.f32 %v5273_v62, %v5413_v41  ;;  %v1476_v62 = vadd.f32 %v5413_v41, %v5283_v15 }
 0x459   :  { %v2826_v55 = vmul.f32 0.0078125, %v2825_v32 }
 0x45b   :  { %v2827_v26 = vadd.f32 1e-05, %v2826_v55 }
 0x45d   :  { %3853 = vrsqrt.f32 %v2827_v26 }
 0x46a   :  { %v3854_v59 = vpop.eup %3853 }
 0x46b   :  { %v2830_v47 = vmul.f32 %v3854_v59, %v2829_v58 }
 0x46d   :  { %v5401_v20 = vrot.slane %v2830_v47, %v1602_v14  ;;  %v1425_v14 = vadd.f32 %v5413_v41, %v1424_v19 }
 0x46f   :  { %v2835_v36 = vmul.f32 %v5401_v20, %v5314_v56  ;;  %v2836_v52 = vmul.f32 %v5401_v20, %v5317_v3  ;;  %v2837_v23 = vmul.f32 %v5401_v20, %v5319_v6  ;;  %v1428_v56 = vadd.f32 %v5413_v41, %v1427_v30 }
 0x470   :  { %v2838_v60 = vmul.f32 %v5401_v20, %v5321_v10  ;;  %v1433_v3 = vadd.f32 %v3143_v44, %v5413_v41  ;;  %v2839_v48 = vmul.f32 %v5401_v20, %v5327_v13  ;;  %v2840_v10 = vmul.f32 %v5401_v20, %v5331_v50 }
 0x471   :  { %v2858_v53 = vadd.f32 %v5406_v49, %v2835_v36  ;;  %v2859_v28 = vadd.f32 %v5406_v49, %v2836_v52  ;;  %v2860_v29 = vadd.f32 %v5406_v49, %v2837_v23  ;;  %v2841_v13 = vmul.f32 %v5401_v20, %v5337_v22 }
 0x472   :  { %v2861_v39 = vadd.f32 %v5406_v49, %v2838_v60  ;;  %v2862_v2 = vadd.f32 %v5406_v49, %v2839_v48  ;;  %v2863_v5 = vadd.f32 %v5406_v49, %v2840_v10  ;;  %v2842_v50 = vmul.f32 %v5401_v20, %v5342_v12 }
 0x473   :  { %v2874_v43 = vadd.f32 %v2858_v53, %v1425_v14  ;;  %v2875_v11 = vadd.f32 %v2859_v28, %v1428_v56  ;;  %v2876_v6 = vadd.f32 %v2860_v29, %v1433_v3  ;;  %v2864_v26 = vadd.f32 %v5406_v49, %v2841_v13 }
 0x474   :  { %v2877_v24 = vadd.f32 %v2861_v39, %v1436_v57  ;;  %v2878_v21 = vadd.f32 %v2862_v2, %v1441_v1  ;;  %v2879_v55 = vadd.f32 %v2863_v5, %v1444_v31  ;;  %v2865_v19 = vadd.f32 %v5406_v49, %v2842_v50 }
 0x475   :  { %v2890_v38 = vmax.f32 %v2874_v43, 0.0  ;;  %v2891_v9 = vmax.f32 %v2875_v11, 0.0  ;;  %v2892_v0 = vmax.f32 %v2876_v6, 0.0  ;;  %v2880_v58 = vadd.f32 %v2864_v26, %v1449_v4 }
 0x476   :  { %v2893_v63 = vmax.f32 %v2877_v24, 0.0  ;;  %v2894_v32 = vmax.f32 %v2878_v21, 0.0  ;;  %v2895_v44 = vmax.f32 %v2879_v55, 0.0  ;;  %v2843_v22 = vmul.f32 %v5401_v20, %v5347_v61 }
 0x477   :  { %2906 = vxpose.xlu0.b32.start [1/16] (narrow) %v2890_v38, 8  ;;  %v2896_v59 = vmax.f32 %v2880_v58, 0.0  ;;  %v2881_v47 = vadd.f32 %v2865_v19, %v1452_v7  ;;  %v2844_v12 = vmul.f32 %v5401_v20, %v5352_v16  ;;  %v2845_v61 = vmul.f32 %v5401_v20, %v5357_v42 }
 0x478   :  { %v2866_v18 = vadd.f32 %v5406_v49, %v2843_v22  ;;  %v2846_v16 = vmul.f32 %v5401_v20, %v5362_v8  ;;  %v2847_v42 = vmul.f32 %v5401_v20, %v5367_v17  ;;  %v2848_v29 = vmul.f32 %v5401_v20, %v5372_v35 }
 0x479   :  { %v2897_v36 = vmax.f32 %v2881_v47, 0.0  ;;  %v2867_v52 = vadd.f32 %v5406_v49, %v2844_v12  ;;  %v2868_v53 = vadd.f32 %v5406_v49, %v2845_v61  ;;  %v2849_v17 = vmul.f32 %v5401_v20, %v5377_v51 }
 0x47a   :  { %v2882_v30 = vadd.f32 %v2866_v18, %v1457_v33  ;;  %v2869_v56 = vadd.f32 %v5406_v49, %v2846_v16  ;;  %v2870_v60 = vadd.f32 %v5406_v49, %v2847_v42  ;;  %v2871_v6 = vadd.f32 %v5406_v49, %v2848_v29 }
 0x47b   :  { %2907 = vxpose.xlu0.b32.cont [2/16] (narrow) %v2891_v9, 8  ;;  %v2883_v14 = vadd.f32 %v2867_v52, %v1460_v37  ;;  %v2884_v43 = vadd.f32 %v2868_v53, %v1465_v34  ;;  %v2872_v9 = vadd.f32 %v5406_v49, %v2849_v17  ;;  %v2850_v48 = vmul.f32 %v5401_v20, %v5383_v45 }
 0x47c   :  { %v2898_v23 = vmax.f32 %v2882_v30, 0.0  ;;  %v2885_v8 = vadd.f32 %v2869_v56, %v1468_v40  ;;  %v2886_v3 = vadd.f32 %v2870_v60, %v1473_v46  ;;  %v2887_v39 = vadd.f32 %v2871_v6, %v1476_v62 }
 0x47d   :  { %v2899_v28 = vmax.f32 %v2883_v14, 0.0  ;;  %v2900_v38 = vmax.f32 %v2884_v43, 0.0  ;;  %v2873_v24 = vadd.f32 %v5406_v49, %v2850_v48  ;;  %v1484_v51 = vadd.f32 %v5281_v54, %v5413_v41 }
 0x47e   :  { %v2901_v11 = vmax.f32 %v2885_v8, 0.0  ;;  %v2902_v35 = vmax.f32 %v2886_v3, 0.0  ;;  %v2903_v57 = vmax.f32 %v2887_v39, 0.0 }
 0x47f   :  { %2908 = vxpose.xlu0.b32.cont [3/16] (narrow) %v2892_v0, 8  ;;  %v2888_v0 = vadd.f32 %v2872_v9, %v1481_v25  ;;  %v2889_v2 = vadd.f32 %v2873_v24, %v1484_v51 }
 0x481   :  { %v2904_v15 = vmax.f32 %v2888_v0, 0.0  ;;  %v2905_v10 = vmax.f32 %v2889_v2, 0.0 }
 0x483   :  { %2909 = vxpose.xlu0.b32.cont [4/16] (narrow) %v2893_v63, 8 }
 0x487   :  { %2910 = vxpose.xlu0.b32.cont [5/16] (narrow) %v2894_v32, 8 }
 0x48b   :  { %2911 = vxpose.xlu0.b32.cont [6/16] (narrow) %v2895_v44, 8 }
 0x48f   :  { %2912 = vxpose.xlu0.b32.cont [7/16] (narrow) %v2896_v59, 8 }
 0x493   :  { %2913 = vxpose.xlu0.b32.cont [8/16] (narrow) %v2897_v36, 8 }
 0x497   :  { %2914 = vxpose.xlu0.b32.cont [9/16] (narrow) %v2898_v23, 8 }
 0x49b   :  { %2915 = vxpose.xlu0.b32.cont [10/16] (narrow) %v2899_v28, 8 }
 0x49f   :  { %2916 = vxpose.xlu0.b32.cont [11/16] (narrow) %v2900_v38, 8 }
 0x4a3   :  { %2917 = vxpose.xlu0.b32.cont [12/16] (narrow) %v2901_v11, 8 }
 0x4a7   :  { %2918 = vxpose.xlu0.b32.cont [13/16] (narrow) %v2902_v35, 8 }
 0x4ab   :  { %2919 = vxpose.xlu0.b32.cont [14/16] (narrow) %v2903_v57, 8 }
 0x4af   :  { %2920 = vxpose.xlu0.b32.cont [15/16] (narrow) %v2904_v15, 8 }
 0x4b3   :  { %2921 = vxpose.xlu0.b32.end [16/16] (narrow) %v2905_v10, 8 }
 0x4f3   :  { %v2922_v45 = vpop.trf.xlu0 }
 0x4f4   :  { %2938 = vst [vmem:[#allocation5] sm:$0xff] %v2922_v45 }
 0x4f5   :  { %3868 = shalt.err (!%p3865_p4)
}
 0x4f6   :  { %2948 = dma.vmem_to_hbm [thread:$0]  %s2946_s9, 128, %s5504_s12, [#allocation6]  }
 0x4f7   :  { %3877 = dma.done.wait [#allocation6], 128  }
 0x4f8   :  { %3878 = vsyncadd [#allocation6], 4294967168 }
 0x4f9   :  { %2952 = vsyncpa [#allocation6], 1 }

</bundles_post_ra>
